<compile_context>
chip_gen: v5e
topology: v5e:2x2
jax: 0.10.0
libtpu: 0.0.40
codegen_flags: <defaults>
</compile_context>

<pallas_src>
import functools

import jax
import jax.numpy as jnp
import numpy as np
from jax import lax
from jax.experimental import pallas as pl
from jax.experimental.pallas import tpu as pltpu


# ----------------------------------------------------------------------------
# Fused Pallas kernel: SiLU(BN(conv2)) of SiLU(BN(conv1)) (+ residual)
# ----------------------------------------------------------------------------
def _bottleneck_fused_kernel(x_ref, w1_ref, b1_ref, w2_ref, b2_ref, o_ref,
                             xpad_ref, hpad_ref, *, H, W, add, compute_dtype):
    """One batch element, channel-major layout.

    x_ref    : (Cin, H*W)        input activation (f32, lane-dense)
    w1_ref   : (C1,  9*Cin)      cv1 folded weight matrix (compute_dtype)
    b1_ref   : (C1,  1)          cv1 folded bias (f32)
    w2_ref   : (C2,  9*C1)       cv2 folded weight matrix (compute_dtype)
    b2_ref   : (C2,  1)          cv2 folded bias (f32)
    o_ref    : (C2,  H*W)        output (f32, lane-dense)
    xpad_ref : (Cin, H+2, W+2)   VMEM scratch, padded cv1 input
    hpad_ref : (C1,  H+2, W+2)   VMEM scratch, padded cv2 input
    """
    Cin = x_ref.shape[0]
    C1 = w1_ref.shape[0]
    HW = H * W

    def im2col(pad_ref, c):
        # Build the (9*c, H*W) slab once -> single K=9*c matmul per conv.
        slabs = []
        for kh in range(3):
            for kw in range(3):
                slabs.append(pad_ref[:, kh:kh + H, kw:kw + W].reshape(c, HW))
        return jnp.concatenate(slabs, axis=0)

    # ---------------- cv1 ----------------
    xpad_ref[...] = jnp.zeros(xpad_ref.shape, xpad_ref.dtype)
    xpad_ref[:, 1:H + 1, 1:W + 1] = (
        x_ref[...].reshape(Cin, H, W).astype(compute_dtype))
    xcol = im2col(xpad_ref, Cin)                             # (9*Cin, HW)
    h = jnp.dot(w1_ref[...], xcol,
                preferred_element_type=jnp.float32)          # (C1, HW) f32
    h = h + b1_ref[...]                                      # bias bcast over lanes
    h = h * jax.nn.sigmoid(h)                                # SiLU (f32, EUP)

    # ---------------- cv2 ----------------
    hpad_ref[...] = jnp.zeros(hpad_ref.shape, hpad_ref.dtype)
    hpad_ref[:, 1:H + 1, 1:W + 1] = (
        h.reshape(C1, H, W).astype(compute_dtype))
    hcol = im2col(hpad_ref, C1)                              # (9*C1, HW)
    y = jnp.dot(w2_ref[...], hcol,
                preferred_element_type=jnp.float32)          # (C2, HW) f32
    y = y + b2_ref[...]
    y = y * jax.nn.sigmoid(y)

    # ---------------- residual ----------------
    if add:
        y = y + x_ref[...]                                   # same layout, no relayout

    o_ref[...] = y.astype(o_ref.dtype)                       # lane-dense store


# ----------------------------------------------------------------------------
# Wrapper
# ----------------------------------------------------------------------------
def bottleneck_pruned_forward(x_nchw, params, shortcut=True,
                              compute_dtype=jnp.float32):
    """BottleneckPruned.forward. Input/output in NCHW (PyTorch convention).

    params = (w1_mat, b1_col, w2_mat, b2_col) with
      w*_mat : (Cout, 9*Cin) BN-folded weights (column order kh, kw, ci)
      b*_col : (Cout, 1)     BN-folded bias
    compute_dtype: jnp.float32 (default) or jnp.bfloat16 for the matmul
      inputs on v6e/v7x (f32 accumulation is kept either way).
    """
    w1, b1, w2, b2 = params
    N, Cin, H, W = x_nchw.shape
    C1 = w1.shape[0]
    C2 = w2.shape[0]
    add = bool(shortcut) and (Cin == C2)

    # Free, contiguity-preserving reshape: lane-dense (..., H*W) in/out slabs.
    x_flat = x_nchw.reshape(N, Cin, H * W).astype(jnp.float32)
    w1c = w1.astype(compute_dtype)
    w2c = w2.astype(compute_dtype)
    b1c = b1.astype(jnp.float32)
    b2c = b2.astype(jnp.float32)

    kernel = functools.partial(_bottleneck_fused_kernel, H=H, W=W, add=add,
                               compute_dtype=compute_dtype)

    out = pl.pallas_call(
        kernel,
        out_shape=jax.ShapeDtypeStruct((N, C2, H * W), jnp.float32),
        grid=(N,),
        in_specs=[
            pl.BlockSpec((None, Cin, H * W), lambda n: (n, 0, 0)),
            pl.BlockSpec((C1, 9 * Cin), lambda n: (0, 0)),
            pl.BlockSpec((C1, 1), lambda n: (0, 0)),
            pl.BlockSpec((C2, 9 * C1), lambda n: (0, 0)),
            pl.BlockSpec((C2, 1), lambda n: (0, 0)),
        ],
        out_specs=pl.BlockSpec((None, C2, H * W), lambda n: (n, 0, 0)),
        scratch_shapes=[
            pltpu.VMEM((Cin, H + 2, W + 2), compute_dtype),
            pltpu.VMEM((C1, H + 2, W + 2), compute_dtype),
        ],
        compiler_params=pltpu.CompilerParams(
            dimension_semantics=("parallel",),
        ),
    )(x_flat, w1c, b1c, w2c, b2c)

    return out.reshape(N, C2, H, W)


# ----------------------------------------------------------------------------
# Parameter construction (Conv2d weight + BN fold, PyTorch style)
# ----------------------------------------------------------------------------
def make_conv_bn_params(key, cin, cout, eps=1e-3):
    kw_, kg, kb, km, kv = jax.random.split(key, 5)
    w_oihw = 0.1 * jax.random.normal(kw_, (cout, cin, 3, 3), jnp.float32)
    gamma = jax.random.uniform(kg, (cout,), jnp.float32, 0.5, 1.5)
    beta = 0.1 * jax.random.normal(kb, (cout,), jnp.float32)
    mean = 0.1 * jax.random.normal(km, (cout,), jnp.float32)
    var = jax.random.uniform(kv, (cout,), jnp.float32, 0.5, 1.5)
    scale = gamma / jnp.sqrt(var + eps)          # BN (eval) fold
    w_folded = w_oihw * scale[:, None, None, None]
    b_folded = beta - mean * scale
    return w_folded, b_folded                    # OIHW, (Cout,)


def to_matmul_weight(w_oihw):
    """(Cout, Cin, 3, 3) -> (Cout, 9*Cin), column order (kh, kw, ci)."""
    cout, cin = w_oihw.shape[0], w_oihw.shape[1]
    return jnp.transpose(w_oihw, (0, 2, 3, 1)).reshape(cout, 9 * cin)


# ----------------------------------------------------------------------------
# Pure-JAX reference (for correctness check)
# ----------------------------------------------------------------------------
def _conv_bn_silu_ref(x_nchw, w_oihw, bias):
    y = lax.conv_general_dilated(
        x_nchw, w_oihw, window_strides=(1, 1), padding="SAME",
        dimension_numbers=("NCHW", "OIHW", "NCHW"),
    ) + bias[None, :, None, None]
    return y * jax.nn.sigmoid(y)


def bottleneck_pruned_ref(x_nchw, raw_params, shortcut=True):
    w1, b1, w2, b2 = raw_params
    add = shortcut and (x_nchw.shape[1] == w2.shape[0])
    y = _conv_bn_silu_ref(_conv_bn_silu_ref(x_nchw, w1, b1), w2, b2)
    return x_nchw + y if add else y


# ----------------------------------------------------------------------------
if __name__ == "__main__":
    # BottleneckPruned(cv1in=4, cv1out=6, cv2out=4, shortcut=True, g=1)
    N, cv1in, cv1out, cv2out, H, W = 2, 4, 6, 4, 16, 16

    key = jax.random.PRNGKey(0)
    kx, k1, k2 = jax.random.split(key, 3)
    x = jax.random.normal(kx, (N, cv1in, H, W), jnp.float32)      # NCHW input

    w1_oihw, b1 = make_conv_bn_params(k1, cv1in, cv1out)
    w2_oihw, b2 = make_conv_bn_params(k2, cv1out, cv2out)

    kernel_params = (to_matmul_weight(w1_oihw), b1.reshape(-1, 1),
                     to_matmul_weight(w2_oihw), b2.reshape(-1, 1))
    raw_params = (w1_oihw, b1, w2_oihw, b2)

    ref = jax.block_until_ready(
        bottleneck_pruned_ref(x, raw_params, shortcut=True))

    # f32 matmul path (v5e-friendly, tight tolerance).
    out_f32 = jax.block_until_ready(
        bottleneck_pruned_forward(x, kernel_params, shortcut=True,
                                  compute_dtype=jnp.float32))
    np.testing.assert_allclose(np.asarray(out_f32), np.asarray(ref),
                               rtol=1e-3, atol=1e-3)

    # bf16 matmul inputs (v6e/v7x recommendation), f32 accumulation.
    out_bf16 = jax.block_until_ready(
        bottleneck_pruned_forward(x, kernel_params, shortcut=True,
                                  compute_dtype=jnp.bfloat16))
    np.testing.assert_allclose(np.asarray(out_bf16), np.asarray(ref),
                               rtol=5e-2, atol=5e-2)

    print("KERNEL_OK")
</pallas_src>

<mosaic_0001>
module attributes {stable_mosaic.version = 11 : i64} {
  func.func @_bottleneck_fused_kernel(%arg0: i32, %arg1: memref<1x4x256xf32, #tpu.memory_space<vmem>>, %arg2: memref<6x36xf32, #tpu.memory_space<vmem>>, %arg3: memref<6x1xf32, #tpu.memory_space<vmem>>, %arg4: memref<4x54xf32, #tpu.memory_space<vmem>>, %arg5: memref<4x1xf32, #tpu.memory_space<vmem>>, %arg6: memref<1x4x256xf32, #tpu.memory_space<vmem>>, %arg7: memref<4x18x18xf32, #tpu.memory_space<vmem>>, %arg8: memref<6x18x18xf32, #tpu.memory_space<vmem>>) attributes {dimension_semantics = [#tpu.dimension_semantics<parallel>], iteration_bounds = array<i64: 2>, scalar_prefetch = 0 : i64, scratch_operands = 2 : i64, tpu.core_type = #tpu.core_type<tc>, window_params = [{transform_indices = @transform_0, window_bounds = array<i64: 1, 4, 256>}, {pipeline_mode = #tpu.pipeline_mode<synchronous>, transform_indices = @transform_1, window_bounds = array<i64: 6, 36>}, {pipeline_mode = #tpu.pipeline_mode<synchronous>, transform_indices = @transform_2, window_bounds = array<i64: 6, 1>}, {pipeline_mode = #tpu.pipeline_mode<synchronous>, transform_indices = @transform_3, window_bounds = array<i64: 4, 54>}, {pipeline_mode = #tpu.pipeline_mode<synchronous>, transform_indices = @transform_4, window_bounds = array<i64: 4, 1>}, {transform_indices = @transform_5, window_bounds = array<i64: 1, 4, 256>}]} {
    %cst = arith.constant 0.000000e+00 : f32
    %0 = vector.broadcast %cst : f32 to vector<4x18x18xf32>
    %c0 = arith.constant 0 : index
    %c0_0 = arith.constant 0 : index
    %c0_1 = arith.constant 0 : index
    %1 = vector.load %arg7[%c0, %c0_0, %c0_1] : memref<4x18x18xf32, #tpu.memory_space<vmem>>, vector<4x18x18xf32>
    tpu.vector_store %arg7[%c0, %c0_0, %c0_1], %0 {strides = array<i32>} : memref<4x18x18xf32, #tpu.memory_space<vmem>>, vector<4x18x18xf32>,
    %c0_2 = arith.constant 0 : index
    %c0_3 = arith.constant 0 : index
    %c0_4 = arith.constant 0 : index
    %2 = vector.load %arg1[%c0_2, %c0_3, %c0_4] : memref<1x4x256xf32, #tpu.memory_space<vmem>>, vector<1x4x256xf32>
    %3 = vector.shape_cast %2 : vector<1x4x256xf32> to vector<4x256xf32>
    %4 = vector.shape_cast %3 : vector<4x256xf32> to vector<4x16x16xf32>
    %c0_5 = arith.constant 0 : index
    %c1 = arith.constant 1 : index
    %c1_6 = arith.constant 1 : index
    %5 = vector.load %arg7[%c0_5, %c1, %c1_6] : memref<4x18x18xf32, #tpu.memory_space<vmem>>, vector<4x16x16xf32>
    tpu.vector_store %arg7[%c0_5, %c1, %c1_6], %4 {strides = array<i32>} : memref<4x18x18xf32, #tpu.memory_space<vmem>>, vector<4x16x16xf32>,
    %c0_7 = arith.constant 0 : index
    %c0_8 = arith.constant 0 : index
    %c0_9 = arith.constant 0 : index
    %6 = vector.load %arg7[%c0_7, %c0_8, %c0_9] : memref<4x18x18xf32, #tpu.memory_space<vmem>>, vector<4x16x16xf32>
    %7 = vector.shape_cast %6 : vector<4x16x16xf32> to vector<4x256xf32>
    %c0_10 = arith.constant 0 : index
    %c0_11 = arith.constant 0 : index
    %c1_12 = arith.constant 1 : index
    %8 = vector.load %arg7[%c0_10, %c0_11, %c1_12] : memref<4x18x18xf32, #tpu.memory_space<vmem>>, vector<4x16x16xf32>
    %9 = vector.shape_cast %8 : vector<4x16x16xf32> to vector<4x256xf32>
    %c0_13 = arith.constant 0 : index
    %c0_14 = arith.constant 0 : index
    %c2 = arith.constant 2 : index
    %10 = vector.load %arg7[%c0_13, %c0_14, %c2] : memref<4x18x18xf32, #tpu.memory_space<vmem>>, vector<4x16x16xf32>
    %11 = vector.shape_cast %10 : vector<4x16x16xf32> to vector<4x256xf32>
    %c0_15 = arith.constant 0 : index
    %c1_16 = arith.constant 1 : index
    %c0_17 = arith.constant 0 : index
    %12 = vector.load %arg7[%c0_15, %c1_16, %c0_17] : memref<4x18x18xf32, #tpu.memory_space<vmem>>, vector<4x16x16xf32>
    %13 = vector.shape_cast %12 : vector<4x16x16xf32> to vector<4x256xf32>
    %c0_18 = arith.constant 0 : index
    %c1_19 = arith.constant 1 : index
    %c1_20 = arith.constant 1 : index
    %14 = vector.load %arg7[%c0_18, %c1_19, %c1_20] : memref<4x18x18xf32, #tpu.memory_space<vmem>>, vector<4x16x16xf32>
    %15 = vector.shape_cast %14 : vector<4x16x16xf32> to vector<4x256xf32>
    %c0_21 = arith.constant 0 : index
    %c1_22 = arith.constant 1 : index
    %c2_23 = arith.constant 2 : index
    %16 = vector.load %arg7[%c0_21, %c1_22, %c2_23] : memref<4x18x18xf32, #tpu.memory_space<vmem>>, vector<4x16x16xf32>
    %17 = vector.shape_cast %16 : vector<4x16x16xf32> to vector<4x256xf32>
    %c0_24 = arith.constant 0 : index
    %c2_25 = arith.constant 2 : index
    %c0_26 = arith.constant 0 : index
    %18 = vector.load %arg7[%c0_24, %c2_25, %c0_26] : memref<4x18x18xf32, #tpu.memory_space<vmem>>, vector<4x16x16xf32>
    %19 = vector.shape_cast %18 : vector<4x16x16xf32> to vector<4x256xf32>
    %c0_27 = arith.constant 0 : index
    %c2_28 = arith.constant 2 : index
    %c1_29 = arith.constant 1 : index
    %20 = vector.load %arg7[%c0_27, %c2_28, %c1_29] : memref<4x18x18xf32, #tpu.memory_space<vmem>>, vector<4x16x16xf32>
    %21 = vector.shape_cast %20 : vector<4x16x16xf32> to vector<4x256xf32>
    %c0_30 = arith.constant 0 : index
    %c2_31 = arith.constant 2 : index
    %c2_32 = arith.constant 2 : index
    %22 = vector.load %arg7[%c0_30, %c2_31, %c2_32] : memref<4x18x18xf32, #tpu.memory_space<vmem>>, vector<4x16x16xf32>
    %23 = vector.shape_cast %22 : vector<4x16x16xf32> to vector<4x256xf32>
    %24 = tpu.concatenate %7, %9, %11, %13, %15, %17, %19, %21, %23 in 0 : vector<4x256xf32>, vector<4x256xf32>, vector<4x256xf32>, vector<4x256xf32>, vector<4x256xf32>, vector<4x256xf32>, vector<4x256xf32>, vector<4x256xf32>, vector<4x256xf32> -> vector<36x256xf32>
    %c0_33 = arith.constant 0 : index
    %c0_34 = arith.constant 0 : index
    %25 = vector.load %arg2[%c0_33, %c0_34] : memref<6x36xf32, #tpu.memory_space<vmem>>, vector<6x36xf32>
    %cst_35 = arith.constant dense<0.000000e+00> : vector<6x256xf32>
    %26 = tpu.matmul %25, %24, %cst_35 {dimension_numbers = #tpu.dot_dimension_numbers<[1], [0], [0], [1], [0, 0, 1, 1], [], []>} : vector<6x36xf32>, vector<36x256xf32>, vector<6x256xf32> -> vector<6x256xf32>
    %c0_36 = arith.constant 0 : index
    %c0_37 = arith.constant 0 : index
    %27 = vector.load %arg3[%c0_36, %c0_37] : memref<6x1xf32, #tpu.memory_space<vmem>>, vector<6x1xf32>
    %28 = vector.broadcast %27 : vector<6x1xf32> to vector<6x256xf32>
    %29 = arith.addf %26, %28 : vector<6x256xf32>
    %30 = arith.negf %29 : vector<6x256xf32>
    %31 = math.exp %30 : vector<6x256xf32>
    %cst_38 = arith.constant 1.000000e+00 : f32
    %32 = vector.broadcast %cst_38 : f32 to vector<6x256xf32>
    %33 = arith.addf %32, %31 : vector<6x256xf32>
    %34 = arith.divf %32, %33 : vector<6x256xf32>
    %35 = arith.mulf %29, %34 : vector<6x256xf32>
    %cst_39 = arith.constant 0.000000e+00 : f32
    %36 = vector.broadcast %cst_39 : f32 to vector<6x18x18xf32>
    %c0_40 = arith.constant 0 : index
    %c0_41 = arith.constant 0 : index
    %c0_42 = arith.constant 0 : index
    %37 = vector.load %arg8[%c0_40, %c0_41, %c0_42] : memref<6x18x18xf32, #tpu.memory_space<vmem>>, vector<6x18x18xf32>
    tpu.vector_store %arg8[%c0_40, %c0_41, %c0_42], %36 {strides = array<i32>} : memref<6x18x18xf32, #tpu.memory_space<vmem>>, vector<6x18x18xf32>,
    %38 = vector.shape_cast %35 : vector<6x256xf32> to vector<6x16x16xf32>
    %c0_43 = arith.constant 0 : index
    %c1_44 = arith.constant 1 : index
    %c1_45 = arith.constant 1 : index
    %39 = vector.load %arg8[%c0_43, %c1_44, %c1_45] : memref<6x18x18xf32, #tpu.memory_space<vmem>>, vector<6x16x16xf32>
    tpu.vector_store %arg8[%c0_43, %c1_44, %c1_45], %38 {strides = array<i32>} : memref<6x18x18xf32, #tpu.memory_space<vmem>>, vector<6x16x16xf32>,
    %c0_46 = arith.constant 0 : index
    %c0_47 = arith.constant 0 : index
    %c0_48 = arith.constant 0 : index
    %40 = vector.load %arg8[%c0_46, %c0_47, %c0_48] : memref<6x18x18xf32, #tpu.memory_space<vmem>>, vector<6x16x16xf32>
    %41 = vector.shape_cast %40 : vector<6x16x16xf32> to vector<6x256xf32>
    %c0_49 = arith.constant 0 : index
    %c0_50 = arith.constant 0 : index
    %c1_51 = arith.constant 1 : index
    %42 = vector.load %arg8[%c0_49, %c0_50, %c1_51] : memref<6x18x18xf32, #tpu.memory_space<vmem>>, vector<6x16x16xf32>
    %43 = vector.shape_cast %42 : vector<6x16x16xf32> to vector<6x256xf32>
    %c0_52 = arith.constant 0 : index
    %c0_53 = arith.constant 0 : index
    %c2_54 = arith.constant 2 : index
    %44 = vector.load %arg8[%c0_52, %c0_53, %c2_54] : memref<6x18x18xf32, #tpu.memory_space<vmem>>, vector<6x16x16xf32>
    %45 = vector.shape_cast %44 : vector<6x16x16xf32> to vector<6x256xf32>
    %c0_55 = arith.constant 0 : index
    %c1_56 = arith.constant 1 : index
    %c0_57 = arith.constant 0 : index
    %46 = vector.load %arg8[%c0_55, %c1_56, %c0_57] : memref<6x18x18xf32, #tpu.memory_space<vmem>>, vector<6x16x16xf32>
    %47 = vector.shape_cast %46 : vector<6x16x16xf32> to vector<6x256xf32>
    %c0_58 = arith.constant 0 : index
    %c1_59 = arith.constant 1 : index
    %c1_60 = arith.constant 1 : index
    %48 = vector.load %arg8[%c0_58, %c1_59, %c1_60] : memref<6x18x18xf32, #tpu.memory_space<vmem>>, vector<6x16x16xf32>
    %49 = vector.shape_cast %48 : vector<6x16x16xf32> to vector<6x256xf32>
    %c0_61 = arith.constant 0 : index
    %c1_62 = arith.constant 1 : index
    %c2_63 = arith.constant 2 : index
    %50 = vector.load %arg8[%c0_61, %c1_62, %c2_63] : memref<6x18x18xf32, #tpu.memory_space<vmem>>, vector<6x16x16xf32>
    %51 = vector.shape_cast %50 : vector<6x16x16xf32> to vector<6x256xf32>
    %c0_64 = arith.constant 0 : index
    %c2_65 = arith.constant 2 : index
    %c0_66 = arith.constant 0 : index
    %52 = vector.load %arg8[%c0_64, %c2_65, %c0_66] : memref<6x18x18xf32, #tpu.memory_space<vmem>>, vector<6x16x16xf32>
    %53 = vector.shape_cast %52 : vector<6x16x16xf32> to vector<6x256xf32>
    %c0_67 = arith.constant 0 : index
    %c2_68 = arith.constant 2 : index
    %c1_69 = arith.constant 1 : index
    %54 = vector.load %arg8[%c0_67, %c2_68, %c1_69] : memref<6x18x18xf32, #tpu.memory_space<vmem>>, vector<6x16x16xf32>
    %55 = vector.shape_cast %54 : vector<6x16x16xf32> to vector<6x256xf32>
    %c0_70 = arith.constant 0 : index
    %c2_71 = arith.constant 2 : index
    %c2_72 = arith.constant 2 : index
    %56 = vector.load %arg8[%c0_70, %c2_71, %c2_72] : memref<6x18x18xf32, #tpu.memory_space<vmem>>, vector<6x16x16xf32>
    %57 = vector.shape_cast %56 : vector<6x16x16xf32> to vector<6x256xf32>
    %58 = tpu.concatenate %41, %43, %45, %47, %49, %51, %53, %55, %57 in 0 : vector<6x256xf32>, vector<6x256xf32>, vector<6x256xf32>, vector<6x256xf32>, vector<6x256xf32>, vector<6x256xf32>, vector<6x256xf32>, vector<6x256xf32>, vector<6x256xf32> -> vector<54x256xf32>
    %c0_73 = arith.constant 0 : index
    %c0_74 = arith.constant 0 : index
    %59 = vector.load %arg4[%c0_73, %c0_74] : memref<4x54xf32, #tpu.memory_space<vmem>>, vector<4x54xf32>
    %cst_75 = arith.constant dense<0.000000e+00> : vector<4x256xf32>
    %60 = tpu.matmul %59, %58, %cst_75 {dimension_numbers = #tpu.dot_dimension_numbers<[1], [0], [0], [1], [0, 0, 1, 1], [], []>} : vector<4x54xf32>, vector<54x256xf32>, vector<4x256xf32> -> vector<4x256xf32>
    %c0_76 = arith.constant 0 : index
    %c0_77 = arith.constant 0 : index
    %61 = vector.load %arg5[%c0_76, %c0_77] : memref<4x1xf32, #tpu.memory_space<vmem>>, vector<4x1xf32>
    %62 = vector.broadcast %61 : vector<4x1xf32> to vector<4x256xf32>
    %63 = arith.addf %60, %62 : vector<4x256xf32>
    %64 = arith.negf %63 : vector<4x256xf32>
    %65 = math.exp %64 : vector<4x256xf32>
    %cst_78 = arith.constant 1.000000e+00 : f32
    %66 = vector.broadcast %cst_78 : f32 to vector<4x256xf32>
    %67 = arith.addf %66, %65 : vector<4x256xf32>
    %68 = arith.divf %66, %67 : vector<4x256xf32>
    %69 = arith.mulf %63, %68 : vector<4x256xf32>
    %c0_79 = arith.constant 0 : index
    %c0_80 = arith.constant 0 : index
    %c0_81 = arith.constant 0 : index
    %70 = vector.load %arg1[%c0_79, %c0_80, %c0_81] : memref<1x4x256xf32, #tpu.memory_space<vmem>>, vector<1x4x256xf32>
    %71 = vector.shape_cast %70 : vector<1x4x256xf32> to vector<4x256xf32>
    %72 = arith.addf %69, %71 : vector<4x256xf32>
    %c0_82 = arith.constant 0 : index
    %c0_83 = arith.constant 0 : index
    %c0_84 = arith.constant 0 : index
    %73 = vector.load %arg6[%c0_82, %c0_83, %c0_84] : memref<1x4x256xf32, #tpu.memory_space<vmem>>, vector<1x4x256xf32>
    %74 = vector.shape_cast %73 : vector<1x4x256xf32> to vector<4x256xf32>
    %75 = vector.shape_cast %72 : vector<4x256xf32> to vector<1x4x256xf32>
    tpu.vector_store %arg6[%c0_82, %c0_83, %c0_84], %75 {strides = array<i32>} : memref<1x4x256xf32, #tpu.memory_space<vmem>>, vector<1x4x256xf32>,
    return
  }
  func.func @transform_0(%arg0: i32) -> (i32, i32, i32) {
    %c0_i32 = arith.constant 0 : i32
    %c0_i32_0 = arith.constant 0 : i32
    %c0_i32_1 = arith.constant 0 : i32
    return %arg0, %c0_i32, %c0_i32_0 : i32, i32, i32
  }
  func.func @transform_1(%arg0: i32) -> (i32, i32) {
    %c0_i32 = arith.constant 0 : i32
    %c0_i32_0 = arith.constant 0 : i32
    %c0_i32_1 = arith.constant 0 : i32
    return %c0_i32, %c0_i32_0 : i32, i32
  }
  func.func @transform_2(%arg0: i32) -> (i32, i32) {
    %c0_i32 = arith.constant 0 : i32
    %c0_i32_0 = arith.constant 0 : i32
    %c0_i32_1 = arith.constant 0 : i32
    return %c0_i32, %c0_i32_0 : i32, i32
  }
  func.func @transform_3(%arg0: i32) -> (i32, i32) {
    %c0_i32 = arith.constant 0 : i32
    %c0_i32_0 = arith.constant 0 : i32
    %c0_i32_1 = arith.constant 0 : i32
    return %c0_i32, %c0_i32_0 : i32, i32
  }
  func.func @transform_4(%arg0: i32) -> (i32, i32) {
    %c0_i32 = arith.constant 0 : i32
    %c0_i32_0 = arith.constant 0 : i32
    %c0_i32_1 = arith.constant 0 : i32
    return %c0_i32, %c0_i32_0 : i32, i32
  }
  func.func @transform_5(%arg0: i32) -> (i32, i32, i32) {
    %c0_i32 = arith.constant 0 : i32
    %c0_i32_0 = arith.constant 0 : i32
    %c0_i32_1 = arith.constant 0 : i32
    return %arg0, %c0_i32, %c0_i32_0 : i32, i32, i32
  }
}

</mosaic_0001>

<bundles_post_ra>
// kernel: tpu_custom_call.1
= control target key start
LH: loop header
LB: loop body
LE: loop exit
PB: predicated region body
PF: predicated region fallthrough
CT: control target
= control target key end

     0   :  { %10 = vsyncpa [#allocation5], 0  ;;  %s12175_s0 = inlined_call_operand.hbm [shape: f32[2,4,256], index: 0, kind: input, shape index: {}]   ;;  %s12176_s1 = inlined_call_operand.vmem [shape: f32[6,36], index: 1, kind: input, shape index: {}]   ;;  %s12177_s2 = inlined_call_operand.vmem [shape: f32[6,1], index: 2, kind: input, shape index: {}]   ;;  %s12178_s3 = inlined_call_operand.vmem [shape: f32[4,54], index: 3, kind: input, shape index: {}]   ;;  %s12179_s4 = inlined_call_operand.vmem [shape: f32[4,1], index: 4, kind: input, shape index: {}]   ;;  %s12180_s5 = inlined_call_operand.hbm [shape: f32[2,4,256], index: 5, kind: output, shape index: {}]  }
   0x1   :  { %12 = vsyncpa [#allocation5 + $0x1], 0 }
   0x2   :  { %13 = vsyncpa [#allocation6], 0 }
   0x3   :  { %15 = vsyncpa [#allocation6 + $0x1], 0  ;;  %s6944_s18 = smov 0   ;;  %s6946_s19 = smov 0  }
   0x4   :  { %s6948_s20 = smov 0   ;;  %s6950_s21 = smov 0  }
   0x5 LB: > { %s6965_s22 = sadd.s32 4294967295, %s6898_s21   ;;  %s5881_s23 = sadd.s32 4294967294, %s6898_s21   ;;  %s6898_s21 = sphi %s6950_s21, %s12881_s21   ;;  %s6894_s20 = sphi %s6948_s20, %s12880_s20   ;;  %s6890_s19 = sphi %s6946_s19, %s12879_s19   ;;  %s6886_s18 = sphi %s6944_s18, %s12878_s18  }
   0x6   : > { %s6969_s24 = sadd.s32 1, %s6898_s21   ;;  %s28_s25 = sadd.s32 1, %s6894_s20 }
   0x7   : > { %s25_s26 = ssub.s32 %s6898_s21, %s6969_s24  ;;  %p35_p0 = scmp.ne.s32.totalorder %s6894_s20, %s6890_s19 }
   0x8   : > { %p26_p1 = scmp.eq.s32.totalorder %s25_s26, 0  ;;  %p36_p2 = scmp.eq.s32.totalorder %s6898_s21, 0 }
   0x9   : > { %p41_p3 = scmp.ne.s32.totalorder %s6890_s19, %s6886_s18  ;;  %p42_p4 = scmp.eq.s32.totalorder %s6965_s22, 0 }
   0xa   : > { %s6981_s27 = scalar_select %p26_p1, %s6894_s20, %s28_s25  }
   0xb   : > { %p6983_p5 = por %p36_p2, %p35_p0  ;;  %p6987_p6 = por %p42_p4, %p41_p3 }
   0xc   : > { %p149_p7 = scmp.eq.s32.totalorder %s6965_s22, 1  ;;  %p155_p8 = scmp.eq.s32.totalorder %s5881_s23, 1 }
   0xd   : > { %p5925_p10 = scmp.lt.s32.totalorder %s6898_s21, 2  ;;  %s187_s7 = sand.u32 1, %s6894_s20  }
   0xe   : > { %p6994_p11 = por %p149_p7, %p35_p0  ;;  %p6998_p12 = por %p155_p8, %p41_p3 }
   0xf   : > { %s5911_s8 = sshll.u32 %s6898_s21, 3  ;;  %s5884_s9 = sshll.u32 %s187_s7, 3 }
  0x10   : > { %s196_s12 = scalar_lea.hbm %s12175_s0, %s5911_s8  ;;  %s191_s14 = scalar_lea.vmem [#allocation4], %s5884_s9 }
  0x11   : > { %s198_s13 = sshll.u32 %s196_s12, 4  ;;  %s200_s15 = sshll.u32 %s191_s14, 4  ;;  %s199_s13 = int_to_ptr.hbm [resolvable:$true] %s198_s13  ;;  %s201_s15 = int_to_ptr.vmem [resolvable:$true] %s200_s15 }
  0x12   : > { %p7009_p13 = pnand %p5925_p10, %p6983_p5  ;;  %p5887_p0 = scmp.ge.s32.totalorder %s6898_s21, 1 }
  0x13   : > { %p205_p1 = scmp.lt.s32.totalorder %s6898_s21, 3  ;;  %s188_s17 = scalar_lea.sflag [#allocation5], %s187_s7 }
  0x14   : > { %s6802_s23 = sshra.s32 %s199_s13, 4  ;;  %p6806_p3 = pneg %p7009_p13  ;;  %s6803_s23 = int_to_ptr.hbm [resolvable:$true] %s6802_s23 }
  0x15   : > { %s6804_s25 = scalar_lea.hbm %s6803_s23, 8  ;;  %s6809_s28 = scalar_lea.hbm %s12175_s0, 16 }
  0x16   : > { %p6805_p2 = scmp.ne.s32.totalorder %s6803_s23, %s6804_s25  ;;  %p6810_p5 = scmp.lt.s32.totalorder %s6803_s23, %s12175_s0 }
  0x17   : > { %p6811_p8 = scmp.lt.s32.totalorder %s6809_s28, %s6804_s25 }
  0x18   : > { %p6807_p4 = pnand %p6806_p3, %p6805_p2 }
  0x19   : > { %p6812_p10 = por %p6811_p8, %p6810_p5 }
  0x1a   : > { %p6808_p7 = pneg %p6807_p4 }
  0x1c   : > { %p6813_p9 = pnand %p6812_p10, %p6808_p7 }
  0x1e   : > { %6816 = shalt.err (!%p6813_p9)
}
  0x1f   : > { %5920 = dma.hbm_to_vmem [thread:$0]  (!%p7009_p13), %s199_s13, 128, %s201_s15, %s188_s17  }
  0x20   : > { %p206_p2 = pnand %p5887_p0, %p205_p1 }
  0x22   : > { %209 = sbr.rel (%p206_p2) target bundleno = 1923 (0x783), region = 40 }
  0x27   : > { %s7030_s7 = sand.u32 1, %s6890_s19  }
  0x28   : > { %s5888_s11 = sshll.u32 %s7030_s7, 3  ;;  %s212_s12 = scalar_lea.sflag [#allocation5], %s7030_s7 }
  0x29   : > { %s215_s14 = scalar_lea.vmem [#allocation4], %s5888_s11 }
  0x2a   : > { %6877 = dma.done.wait (%p6987_p6), %s212_s12, 128  }
  0x2b   : > { %6879 = vsyncadd (%p6987_p6), %s212_s12, 4294967168  ;;  %v7040_v0 = vld [vmem:[%s215_s14] sm:$0xff]  ;;  %s6900_s13 = smov 80   ;;  %s6901_s15 = smov 112   ;;  %v6907_v1 = vmov 1983009808  }
  0x2c   : > { %269 = vrot.lane.b32.xlu1 %v7040_v0, %s6900_s13  ;;  %261 = vrot.lane.b32.xlu0 %v7040_v0, %s6901_s15  ;;  %s6902_s16 = smov 48   ;;  %s6903_s17 = smov 96   ;;  %v300_v2 = vunpack.c.l.s4 %v6907_v1  ;;  %vm297_vm0 = vcmask 1047556   ;;  %v6908_v11 = vmov 1934713408   ;;  %v259_v13 = vrot.slane %v7040_v0, 4 }
  0x2d   : > { %277 = vrot.lane.b32.xlu2 %v7040_v0, %s6902_s16  ;;  %s6904_s29 = smov 64   ;;  %s6905_s23 = smov 32   ;;  %v314_v12 = vunpack.c.l.s4 %v6908_v11  ;;  %vm243_vm1 = vcmask 146432   ;;  %vm246_vm2 = vcmask 140288   ;;  %v6909_v53 = vmov 0.0  }
  0x2e   : > { %s6906_s25 = smov 16   ;;  %v7056_v8 = vunpack.c.0.s8 %v300_v2  ;;  %245 = vst.msk [vmem:[#allocation2 + $0x8] sm:$0xff] %vm243_vm1, %v6909_v53  ;;  %s6910_s26 = smov 1   ;;  %vm480_vm3 = vcmask 138248   ;;  %vm665_vm4 = vcmask 130048   ;;  %vm667_vm5 = vcmask 261120  }
  0x2f   : > { %v7063_v17 = vunpack.c.0.s8 %v314_v12  ;;  %247 = vst.msk [vmem:[#allocation2 + $0x10] sm:$0x3] %vm246_vm2, %v6909_v53  ;;  %s6911_s8 = smov 126   ;;  %s6912_s28 = smov 127   ;;  %vm669_vm6 = vcmask 392192   ;;  %vm671_vm7 = vcmask 523264  }
  0x30   : > { %12355 = vst [vmem:[#allocation10_spill] sm:$0xff] %v7056_v8  ;;  %vm673_vm8 = vcmask 654336   ;;  %vm675_vm9 = vcmask 785408   ;;  %vm677_vm10 = vcmask 916480   ;;  %vm2350_vm11 = vcmask 1043456   ;;  %s5795_s9 = scalar_lea.sflag [#allocation6], %s7030_s7 }
  0x31   : > { %12356 = vst [vmem:[#allocation11_spill] sm:$0xff] %v7063_v17  ;;  %vm2366_vm12 = vcmask 293888  }
  0x32   : > { %244 = vst.msk [vmem:[#allocation2] sm:$0xff] %vm243_vm1, %v6909_v53 }
  0x33   : > { %248 = vst.msk [vmem:[#allocation2 + $0x18] sm:$0xff] %vm243_vm1, %v6909_v53 }
  0x34   : > { %265 = vrot.lane.b32.xlu0 %v7040_v0, %s6903_s17  ;;  %273 = vrot.lane.b32.xlu1 %v7040_v0, %s6904_s29  ;;  %249 = vst.msk [vmem:[#allocation2 + $0x20] sm:$0xff] %vm243_vm1, %v6909_v53 }
  0x35   : > { %281 = vrot.lane.b32.xlu2 %v7040_v0, %s6905_s23  ;;  %250 = vst.msk [vmem:[#allocation2 + $0x28] sm:$0x3] %vm246_vm2, %v6909_v53 }
  0x36   : > { %251 = vst.msk [vmem:[#allocation2 + $0x30] sm:$0xff] %vm243_vm1, %v6909_v53 }
  0x37   : > { %252 = vst.msk [vmem:[#allocation2 + $0x38] sm:$0xff] %vm243_vm1, %v6909_v53 }
  0x38   : > { %253 = vst.msk [vmem:[#allocation2 + $0x40] sm:$0x3] %vm246_vm2, %v6909_v53 }
  0x39   : > { %254 = vst.msk [vmem:[#allocation2 + $0x48] sm:$0xff] %vm243_vm1, %v6909_v53 }
  0x3a   : > { %255 = vst.msk [vmem:[#allocation2 + $0x50] sm:$0xff] %vm243_vm1, %v6909_v53 }
  0x3b   : > { %256 = vst.msk [vmem:[#allocation2 + $0x58] sm:$0x3] %vm246_vm2, %v6909_v53 }
  0x3c   : > { %285 = vrot.lane.b32.xlu0 %v7040_v0, %s6906_s25  ;;  %2456 = vst.msk [vmem:[#allocation3] sm:$0xff] %vm243_vm1, %v6909_v53 }
  0x3d   : > { %2457 = vst.msk [vmem:[#allocation3 + $0x8] sm:$0xff] %vm243_vm1, %v6909_v53 }
  0x3e   : > { %2458 = vst.msk [vmem:[#allocation3 + $0x10] sm:$0x3] %vm246_vm2, %v6909_v53 }
  0x3f   : > { %2459 = vst.msk [vmem:[#allocation3 + $0x18] sm:$0xff] %vm243_vm1, %v6909_v53 }
  0x40   : > { %2460 = vst.msk [vmem:[#allocation3 + $0x20] sm:$0xff] %vm243_vm1, %v6909_v53 }
  0x41   : > { %2461 = vst.msk [vmem:[#allocation3 + $0x28] sm:$0x3] %vm246_vm2, %v6909_v53 }
  0x42   : > { %2462 = vst.msk [vmem:[#allocation3 + $0x30] sm:$0xff] %vm243_vm1, %v6909_v53 }
  0x43   : > { %2463 = vst.msk [vmem:[#allocation3 + $0x38] sm:$0xff] %vm243_vm1, %v6909_v53 }
  0x44   : > { %2464 = vst.msk [vmem:[#allocation3 + $0x40] sm:$0x3] %vm246_vm2, %v6909_v53 }
  0x45   : > { %2465 = vst.msk [vmem:[#allocation3 + $0x48] sm:$0xff] %vm243_vm1, %v6909_v53 }
  0x46   : > { %2466 = vst.msk [vmem:[#allocation3 + $0x50] sm:$0xff] %vm243_vm1, %v6909_v53 }
  0x47   : > { %2467 = vst.msk [vmem:[#allocation3 + $0x58] sm:$0x3] %vm246_vm2, %v6909_v53 }
  0x48   : > { %2468 = vst.msk [vmem:[#allocation3 + $0x60] sm:$0xff] %vm243_vm1, %v6909_v53 }
  0x49   : > { %2469 = vst.msk [vmem:[#allocation3 + $0x68] sm:$0xff] %vm243_vm1, %v6909_v53 }
  0x4a   : > { %2470 = vst.msk [vmem:[#allocation3 + $0x70] sm:$0x3] %vm246_vm2, %v6909_v53 }
  0x4b   : > { %2471 = vst.msk [vmem:[#allocation3 + $0x78] sm:$0xff] %vm243_vm1, %v6909_v53 }
  0x4c   : > { %2472 = vst.msk [vmem:[#allocation3 + $0x80] sm:$0xff] %vm243_vm1, %v6909_v53 }
  0x4d   : > { %2473 = vst.msk [vmem:[#allocation3 + $0x88] sm:$0x3] %vm246_vm2, %v6909_v53 }
  0x87   : > { %v278_v3 = vpop.permute.xlu2 %277 }
  0x88   : > { %v279_v32 = vrot.slane %v278_v3, 4 }
  0x8f   : > { %v282_v20 = vpop.permute.xlu2 %281 }
  0x90   : > { %v325_v28 = vrot.slane %v282_v20, 4 }
  0x9e   : > { %v270_v4 = vpop.permute.xlu1 %269  ;;  %v262_v5 = vpop.permute.xlu0 %261 }
  0x9f   : > { %v303_v6 = vrot.slane %v270_v4, 4  ;;  %v263_v7 = vrot.slane %v262_v5, 4 }
  0xa1   : > { %v360_v9 = vsel %vm297_vm0, %v270_v4, %v263_v7  ;;  %v304_v10 = vsel %vm297_vm0, %v303_v6, %v262_v5 }
  0xa2   : > { %v364_v14 = vperm.slane %v360_v9, %v7056_v8  ;;  %v308_v15 = vperm.slane %v304_v10, %v7056_v8 }
  0xa4   : > { %v365_v21 = vrot.slane %v364_v14, 4  ;;  %v309_v25 = vrot.slane %v308_v15, 4 }
  0xa6   : > { %v266_v16 = vpop.permute.xlu0 %265  ;;  %v274_v23 = vpop.permute.xlu1 %273 }
  0xa7   : > { %v296_v18 = vrot.slane %v266_v16, 4  ;;  %v354_v19 = vsel %vm297_vm0, %v266_v16, %v259_v13  ;;  %v275_v30 = vrot.slane %v274_v23, 4  ;;  %v326_v35 = vsel %vm297_vm0, %v325_v28, %v274_v23 }
  0xa8   : > { %v358_v22 = vperm.slane %v354_v19, %v7056_v8  ;;  %v330_v43 = vperm.slane %v326_v35, %v7056_v8 }
  0xa9   : > { %v298_v24 = vsel %vm297_vm0, %v296_v18, %v7040_v0  ;;  %v382_v37 = vsel %vm297_vm0, %v282_v20, %v275_v30 }
  0xaa   : > { %v302_v26 = vperm.slane %v298_v24, %v7056_v8  ;;  %v366_v27 = vsel %vm297_vm0, %v365_v21, %v358_v22  ;;  %v386_v46 = vperm.slane %v382_v37, %v7056_v8  ;;  %v367_v49 = vrot.slane %v358_v22, 4 }
  0xab   : > { %v372_v29 = vperm.slane %v366_v27, %v7063_v17  ;;  %v339_v54 = vrot.slane %v330_v43, 4 }
  0xac   : > { %v310_v31 = vsel %vm297_vm0, %v309_v25, %v302_v26  ;;  %v311_v50 = vrot.slane %v302_v26, 4  ;;  %v395_v56 = vrot.slane %v386_v46, 4  ;;  %v368_v58 = vsel %vm297_vm0, %v364_v14, %v367_v49 }
  0xad   : > { %v377_v33 = vrot.slane %v372_v29, 4  ;;  %429 = vst [vmem:[#allocation1 + $0x10] ss:$2 sm:$0xff] %v372_v29  ;;  %v316_v34 = vperm.slane %v310_v31, %v7063_v17  ;;  %v376_v2 = vperm.slane %v368_v58, %v7063_v17 }
  0xae   : > { %v286_v36 = vpop.permute.xlu0 %285  ;;  %v312_v61 = vsel %vm297_vm0, %v308_v15, %v311_v50 }
  0xaf   : > { %v331_v38 = vrot.slane %v286_v36, 4  ;;  %v388_v39 = vsel %vm297_vm0, %v286_v36, %v279_v32  ;;  %425 = vst [vmem:[#allocation1] ss:$2 sm:$0xff] %v316_v34  ;;  %v321_v40 = vrot.slane %v316_v34, 4  ;;  %v378_v42 = vsel %vm297_vm0, 0.0, %v377_v33 }
  0xb0   : > { %v392_v41 = vperm.slane %v388_v39, %v7056_v8  ;;  %439 = vst [vmem:[#allocation1 + $0x30] ss:$2 sm:$0xff] %v378_v42  ;;  %v320_v4 = vperm.slane %v312_v61, %v7063_v17  ;;  %v379_v10 = vrot.slane %v376_v2, 4 }
  0xb1   : > { %v332_v44 = vsel %vm297_vm0, %v331_v38, %v278_v3  ;;  %v322_v45 = vsel %vm297_vm0, 0.0, %v321_v40 }
  0xb2   : > { %v336_v47 = vperm.slane %v332_v44, %v7056_v8  ;;  %v393_v48 = vrot.slane %v392_v41, 4  ;;  %435 = vst [vmem:[#allocation1 + $0x20] ss:$2 sm:$0xff] %v322_v45  ;;  %v396_v3 = vsel %vm297_vm0, %v392_v41, %v395_v56  ;;  %v323_v11 = vrot.slane %v320_v4, 4 }
  0xb3   : > { %v404_v7 = vperm.slane %v396_v3, %v7063_v17  ;;  %v380_v16 = vsel %vm297_vm0, 0.0, %v379_v10 }
  0xb4   : > { %v337_v51 = vrot.slane %v336_v47, 4  ;;  %v394_v52 = vsel %vm297_vm0, %v393_v48, %v386_v46  ;;  %v340_v62 = vsel %vm297_vm0, %v336_v47, %v339_v54  ;;  %v324_v18 = vsel %vm297_vm0, 0.0, %v323_v11 }
  0xb5   : > { %v400_v55 = vperm.slane %v394_v52, %v7063_v17  ;;  %v348_v6 = vperm.slane %v340_v62, %v7063_v17  ;;  %v407_v14 = vrot.slane %v404_v7, 4 }
  0xb6   : > { %v338_v57 = vsel %vm297_vm0, %v337_v51, %v330_v43 }
  0xb7   : > { %431 = vst [vmem:[#allocation1 + $0x11] ss:$2 sm:$0xff] %v400_v55  ;;  %v344_v59 = vperm.slane %v338_v57, %v7063_v17  ;;  %v405_v60 = vrot.slane %v400_v55, 4  ;;  %v351_v13 = vrot.slane %v348_v6, 4  ;;  %v408_v21 = vsel %vm297_vm0, 0.0, %v407_v14 }
  0xb9   : > { %427 = vst [vmem:[#allocation1 + $0x1] ss:$2 sm:$0xff] %v344_v59  ;;  %v349_v63 = vrot.slane %v344_v59, 4  ;;  %v406_v1 = vsel %vm297_vm0, 0.0, %v405_v60  ;;  %v352_v20 = vsel %vm297_vm0, 0.0, %v351_v13 }
  0xba   : > { %441 = vst [vmem:[#allocation1 + $0x31] ss:$2 sm:$0xff] %v406_v1 }
  0xbb   : > { %v350_v5 = vsel %vm297_vm0, 0.0, %v349_v63 }
  0xbc   : > { %437 = vst [vmem:[#allocation1 + $0x21] ss:$2 sm:$0xff] %v350_v5 }
  0xbe   : > { %v433_v9 = vld.sshfl [vmem:[#allocation1 + $0x10] sm:$0xff pattern:$0x75316420] }
  0xbf   : > { %458 = vrot.lane.b32.xlu2 %v433_v9, %s6910_s26  ;;  %446 = vst [vmem:[#allocation1 + $0x10] ss:$2 sm:$0xff] %v376_v2 }
  0xc0   : > { %447 = vst [vmem:[#allocation1 + $0x11] ss:$2 sm:$0xff] %v404_v7  ;;  %v432_v12 = vld.sshfl [vmem:[#allocation1] sm:$0xff pattern:$0x75316420] }
  0xc1   : > { %456 = vrot.lane.b32.xlu1 %v432_v12, %s6910_s26  ;;  %444 = vst [vmem:[#allocation1] ss:$2 sm:$0xff] %v320_v4  ;;  %v443_v15 = vld.sshfl [vmem:[#allocation1 + $0x30] sm:$0xff pattern:$0x75316420] }
  0xc2   : > { %445 = vst [vmem:[#allocation1 + $0x1] ss:$2 sm:$0xff] %v348_v6 }
  0xc3   : > { %v442_v19 = vld.sshfl [vmem:[#allocation1 + $0x20] sm:$0xff pattern:$0x75316420]  ;;  %452 = vst [vmem:[#allocation1 + $0x30] ss:$2 sm:$0xff] %v380_v16 }
  0xc4   : > { %460 = vrot.lane.b32.xlu0 %v442_v19, %s6910_s26  ;;  %450 = vst [vmem:[#allocation1 + $0x20] ss:$2 sm:$0xff] %v324_v18 }
  0xc5   : > { %451 = vst [vmem:[#allocation1 + $0x21] ss:$2 sm:$0xff] %v352_v20 }
  0xc6   : > { %453 = vst [vmem:[#allocation1 + $0x31] ss:$2 sm:$0xff] %v408_v21 }
  0xc7   : > { %v449_v23 = vld.sshfl [vmem:[#allocation1 + $0x10] sm:$0xff pattern:$0x75316420] }
  0xc9   : > { %v448_v22 = vld.sshfl [vmem:[#allocation1] sm:$0xff pattern:$0x75316420]  ;;  %462 = vrot.lane.b32.xlu1 %v443_v15, %s6910_s26 }
  0xca   : > { %5781 = vst [vmem:[#allocation1] ss:$2 sm:$0xff] %v7040_v0  ;;  %464 = vrot.lane.b32.xlu2 %v448_v22, %s6910_s26 }
  0xcc   : > { %466 = vrot.lane.b32.xlu0 %v449_v23, %s6910_s26  ;;  %v454_v0 = vld.sshfl [vmem:[#allocation1 + $0x20] sm:$0xff pattern:$0x75316420] }
  0xcd   : > { %v455_v24 = vld.sshfl [vmem:[#allocation1 + $0x30] sm:$0xff pattern:$0x75316420] }
  0xd1   : > { %468 = vrot.lane.b32.xlu1 %v454_v0, %s6910_s26 }
  0xd2   : > { %470 = vrot.lane.b32.xlu2 %v455_v24, %s6910_s26 }
 0x119   : > { %v459_v25 = vpop.permute.xlu2 %458 }
 0x11a   : > { %482 = vst.msk [vmem:[#allocation2 + $0x9] sm:$0xff] %vm480_vm3, %v459_v25 }
 0x121   : > { %v7176_v30 = vld [vmem:[#allocation2 + $0x9] sm:$0xff] }
 0x122   : > { %v7192_v40 = vld [vmem:[#allocation2 + $0xa] sm:$0xff] }
 0x124   : > { %v465_v26 = vpop.permute.xlu2 %464 }
 0x125   : > { %485 = vst.msk [vmem:[#allocation2 + $0x31] sm:$0xff] %vm480_vm3, %v465_v26 }
 0x12c   : > { %v471_v27 = vpop.permute.xlu2 %470  ;;  %v7199_v43 = vld [vmem:[#allocation2 + $0x30] sm:$0xff] }
 0x12d   : > { %488 = vst.msk [vmem:[#allocation2 + $0x51] sm:$0xff] %vm480_vm3, %v471_v27  ;;  %v7205_v45 = vld [vmem:[#allocation2 + $0x31] sm:$0xff]  ;;  %v497_v49 = vrot.slane %v7199_v43, 4 }
 0x12e   : > { %v1114_v54 = vrot.slane %v7205_v45, 4 }
 0x133   : > { %v457_v28 = vpop.permute.xlu1 %456 }
 0x134   : > { %481 = vst.msk [vmem:[#allocation2 + $0x1] sm:$0xff] %vm480_vm3, %v457_v28  ;;  %v7236_v2 = vld [vmem:[#allocation2 + $0x51] sm:$0xff] }
 0x135   : > { %v1182_v11 = vrot.slane %v7236_v2, 4 }
 0x136   : > { %v461_v29 = vpop.permute.xlu0 %460 }
 0x137   : > { %483 = vst.msk [vmem:[#allocation2 + $0x19] sm:$0xff] %vm480_vm3, %v461_v29 }
 0x13b   : > { %v463_v31 = vpop.permute.xlu1 %462  ;;  %v7178_v32 = vld [vmem:[#allocation2 + $0x1] sm:$0xff] }
 0x13c   : > { %v489_v33 = vld [vmem:[#allocation2] sm:$0xff]  ;;  %v7180_v34 = vld [vmem:[#allocation2 + $0x8] sm:$0xff]  ;;  %484 = vst.msk [vmem:[#allocation2 + $0x21] sm:$0xff] %vm480_vm3, %v463_v31  ;;  %v5988_v35 = vpack.i.bf16 %v7176_v30, %v7178_v32  ;;  %v1115_v63 = vsel %vm297_vm0, %v1114_v54, %v7178_v32 }
 0x13d   : > { %v5978_v36 = vpack.i.bf16 %v7180_v34, %v489_v33  ;;  %v7190_v38 = vld [vmem:[#allocation2 + $0x2] sm:$0xff]  ;;  %v499_v42 = vrot.slane %v489_v33, 4  ;;  %v555_v46 = vrot.slane %v7180_v34, 4  ;;  %v498_v56 = vsel %vm297_vm0, %v497_v49, %v489_v33 }
 0x13e   : > { %v467_v37 = vpop.permute.xlu0 %466  ;;  %5989 = vrot.lane.b32.xlu2 %v5988_v35, %s6911_s8  ;;  %v5993_v41 = vpack.i.bf16 %v7192_v40, %v7190_v38  ;;  %v491_v48 = vld [vmem:[#allocation2 + $0x18] sm:$0xff]  ;;  %v7241_v4 = vperm.slane %v498_v56, %v7056_v8  ;;  %v7257_v14 = vperm.slane %v1115_v63, %v7056_v8 }
 0x13f   : > { %5979 = vrot.lane.b32.xlu0 %v5978_v36, %s6911_s8  ;;  %486 = vst.msk [vmem:[#allocation2 + $0x39] sm:$0xff] %vm480_vm3, %v467_v37  ;;  %5974 = vrot.lane.b32.xlu1 %v5978_v36, %s6912_s28  ;;  %v500_v51 = vsel %vm297_vm0, %v7199_v43, %v499_v42  ;;  %v7215_v52 = vld [vmem:[#allocation2 + $0x19] sm:$0xff]  ;;  %v511_v58 = vrot.slane %v491_v48, 4 }
 0x140   : > { %v508_v62 = vperm.slane %v500_v51, %v7056_v8  ;;  %v523_v18 = vrot.slane %v7241_v4, 4 }
 0x142   : > { %v535_v15 = vrot.slane %v508_v62, 4 }
 0x143   : > { %v469_v39 = vpop.permute.xlu1 %468  ;;  %v7208_v47 = vld [vmem:[#allocation2 + $0x21] sm:$0xff] }
 0x144   : > { %487 = vst.msk [vmem:[#allocation2 + $0x49] sm:$0xff] %vm480_vm3, %v469_v39  ;;  %v7211_v50 = vld [vmem:[#allocation2 + $0x20] sm:$0xff]  ;;  %v6013_v57 = vpack.i.bf16 %v7208_v47, %v7215_v52 }
 0x145   : > { %v567_v60 = vrot.slane %v7211_v50, 4  ;;  %v6003_v61 = vpack.i.bf16 %v7211_v50, %v491_v48  ;;  %v7247_v7 = vld [vmem:[#allocation2 + $0x1a] sm:$0xff]  ;;  %v7249_v9 = vld [vmem:[#allocation2 + $0x22] sm:$0xff] }
 0x146   : > { %5994 = vrot.lane.b32.xlu2 %v5993_v41, %s6912_s28  ;;  %v7203_v44 = vld [vmem:[#allocation2 + $0x38] sm:$0xff]  ;;  %v6018_v19 = vpack.i.bf16 %v7249_v9, %v7247_v7 }
 0x147   : > { %5984 = vrot.lane.b32.xlu0 %v5988_v35, %s6912_s28  ;;  %2120 = vrot.lane.b32.xlu1 %v7190_v38, %s6911_s8  ;;  %v556_v53 = vsel %vm297_vm0, %v7203_v44, %v555_v46  ;;  %v7251_v10 = vld [vmem:[#allocation2 + $0x39] sm:$0xff]  ;;  %v553_v20 = vrot.slane %v7203_v44, 4 }
 0x148   : > { %v564_v1 = vperm.slane %v556_v53, %v7056_v8  ;;  %v7263_v21 = vld [vmem:[#allocation2 + $0x32] sm:$0xff]  ;;  %v7265_v22 = vld [vmem:[#allocation2 + $0x3a] sm:$0xff]  ;;  %v1170_v24 = vrot.slane %v7251_v10, 4  ;;  %v1140_v53 = vrot.slane %v7257_v14, 4 }
 0x149   : > { %v1724_v35 = vrot.slane %v7263_v21, 4  ;;  %v1780_v36 = vrot.slane %v7265_v22, 4 }
 0x14a   : > { %v591_v16 = vrot.slane %v564_v1, 4 }
 0x14b   : > { %v7220_v55 = vld [vmem:[#allocation2 + $0x48] sm:$0xff]  ;;  %v7225_v59 = vld [vmem:[#allocation2 + $0x50] sm:$0xff] }
 0x14c   : > { %v512_v3 = vsel %vm297_vm0, %v7220_v55, %v511_v58  ;;  %v509_v5 = vrot.slane %v7220_v55, 4  ;;  %v568_v6 = vsel %vm297_vm0, %v7225_v59, %v567_v60  ;;  %v7267_v23 = vld [vmem:[#allocation2 + $0x49] sm:$0xff]  ;;  %v565_v25 = vrot.slane %v7225_v59, 4 }
 0x14d   : > { %v520_v12 = vperm.slane %v512_v3, %v7056_v8  ;;  %v576_v13 = vperm.slane %v568_v6, %v7056_v8  ;;  %v1126_v37 = vrot.slane %v7267_v23, 4  ;;  %v7302_v54 = vld [vmem:[#allocation2 + $0x4a] sm:$0xff]  ;;  %v1725_v60 = vsel %vm297_vm0, %v1724_v35, %v7190_v38 }
 0x14e   : > { %2122 = vrot.lane.b32.xlu2 %v7192_v40, %s6911_s8  ;;  %v510_v0 = vsel %vm297_vm0, %v509_v5, %v491_v48  ;;  %v554_v48 = vsel %vm297_vm0, %v553_v20, %v7180_v34  ;;  %v566_v58 = vsel %vm297_vm0, %v565_v25, %v7211_v50  ;;  %v1183_v34 = vsel %vm297_vm0, %v1182_v11, %v7208_v47 }
 0x14f   : > { %6014 = vrot.lane.b32.xlu0 %v6013_v57, %s6911_s8  ;;  %6004 = vrot.lane.b32.xlu1 %v6003_v61, %s6911_s8  ;;  %v536_v26 = vsel %vm297_vm0, %v520_v12, %v535_v15  ;;  %v592_v27 = vsel %vm297_vm0, %v576_v13, %v591_v16  ;;  %v533_v31 = vrot.slane %v520_v12, 4  ;;  %v589_v33 = vrot.slane %v576_v13, 4  ;;  %v7343_v15 = vld [vmem:[#allocation2 + $0x52] sm:$0xff] }
 0x150   : > { %v7275_v28 = vperm.slane %v536_v26, %v7063_v17  ;;  %v7278_v29 = vperm.slane %v592_v27, %v7063_v17  ;;  %v7286_v39 = vperm.slane %v510_v0, %v7056_v8  ;;  %v7320_v63 = vperm.slane %v566_v58, %v7056_v8 }
 0x151   : > { %v534_v42 = vsel %vm297_vm0, %v533_v31, %v508_v62  ;;  %v590_v46 = vsel %vm297_vm0, %v589_v33, %v564_v1  ;;  %v6028_v1 = vpack.i.bf16 %v7203_v44, %v7199_v43  ;;  %v1127_v3 = vsel %vm297_vm0, %v1126_v37, %v7215_v52 }
 0x152   : > { %v6073_v41 = vpack.i.bf16 %v7278_v29, %v7275_v28  ;;  %v7296_v49 = vperm.slane %v534_v42, %v7063_v17  ;;  %v7299_v51 = vperm.slane %v590_v46, %v7063_v17  ;;  %v524_v56 = vsel %vm297_vm0, %v7286_v39, %v523_v18 }
 0x153   : > { %v1171_v5 = vsel %vm297_vm0, %v1170_v24, %v7176_v30  ;;  %v1736_v6 = vrot.slane %v7302_v54, 4  ;;  %v7331_v11 = vperm.slane %v524_v56, %v7063_v17  ;;  %v7334_v12 = vperm.slane %v1127_v3, %v7056_v8 }
 0x154   : > { %v6093_v62 = vpack.i.bf16 %v7299_v51, %v7296_v49  ;;  %v7337_v13 = vperm.slane %v1171_v5, %v7056_v8  ;;  %v1731_v43 = vperm.slane %v1725_v60, %v7056_v8  ;;  %v7356_v20 = vperm.slane %v1183_v34, %v7056_v8 }
 0x155   : > { %v1792_v25 = vrot.slane %v7343_v15, 4  ;;  %v1737_v31 = vsel %vm297_vm0, %v1736_v6, %v7247_v7  ;;  %v551_v46 = vrot.slane %v7275_v28, 4 }
 0x156   : > { %5999 = vrot.lane.b32.xlu2 %v6003_v61, %s6912_s28  ;;  %v1781_v61 = vsel %vm297_vm0, %v1780_v36, %v7192_v40  ;;  %v1196_v0 = vrot.slane %v7337_v13, 4  ;;  %v1743_v35 = vperm.slane %v1737_v31, %v7056_v8  ;;  %v1750_v36 = vrot.slane %v1731_v43, 4 }
 0x157   : > { %6019 = vrot.lane.b32.xlu0 %v6018_v19, %s6912_s28  ;;  %6009 = vrot.lane.b32.xlu1 %v6013_v57, %s6912_s28  ;;  %v7307_v57 = vperm.slane %v554_v48, %v7056_v8  ;;  %v7341_v44 = vperm.slane %v1781_v61, %v7056_v8  ;;  %v1141_v19 = vsel %vm297_vm0, %v7334_v12, %v1140_v53  ;;  %v7389_v60 = vsel %vm297_vm0, 0.0, %v551_v46 }
 0x158   : > { %v7362_v24 = vperm.slane %v1141_v19, %v7063_v17  ;;  %v1197_v27 = vsel %vm297_vm0, %v7356_v20, %v1196_v0  ;;  %v1793_v37 = vsel %vm297_vm0, %v1792_v25, %v7249_v9  ;;  %v6033_v48 = vpack.i.bf16 %v7251_v10, %v7205_v45 }
 0x159   : > { %v579_v50 = vrot.slane %v7307_v57, 4  ;;  %v7372_v33 = vperm.slane %v1197_v27, %v7063_v17  ;;  %v1806_v42 = vrot.slane %v7341_v44, 4  ;;  %v1751_v56 = vsel %vm297_vm0, %v1743_v35, %v1750_v36 }
 0x15a   : > { %v1799_v58 = vperm.slane %v1793_v37, %v7056_v8  ;;  %v7386_v34 = vperm.slane %v1751_v56, %v7063_v17  ;;  %v607_v61 = vrot.slane %v7278_v29, 4  ;;  %v1748_v19 = vrot.slane %v1743_v35, 4 }
 0x15b   : > { %v580_v16 = vsel %vm297_vm0, %v7320_v63, %v579_v50  ;;  %v6098_v53 = vpack.i.bf16 %v7372_v33, %v7362_v24  ;;  %v549_v0 = vrot.slane %v7296_v49, 4  ;;  %v605_v25 = vrot.slane %v7299_v51, 4 }
 0x15c   : > { %v7351_v18 = vperm.slane %v580_v16, %v7063_v17  ;;  %v1807_v50 = vsel %vm297_vm0, %v1799_v58, %v1806_v42  ;;  %v7399_v5 = vsel %vm297_vm0, 0.0, %v607_v61  ;;  %v1164_v31 = vrot.slane %v7362_v24, 4 }
 0x15d   : > { %v7396_v3 = vperm.slane %v1807_v50, %v7063_v17  ;;  %v6043_v36 = vpack.i.bf16 %v7265_v22, %v7263_v21  ;;  %v7414_v37 = vsel %vm297_vm0, 0.0, %v549_v0  ;;  %v1220_v42 = vrot.slane %v7372_v33, 4 }
 0x15e   : > { %6029 = vrot.lane.b32.xlu2 %v6028_v1, %s6911_s8  ;;  %v6088_v26 = vpack.i.bf16 %v7351_v18, %v7331_v11  ;;  %v547_v35 = vrot.slane %v7331_v11, 4  ;;  %v1804_v46 = vrot.slane %v1799_v58, 4  ;;  %v7432_v6 = vsel %vm297_vm0, 0.0, %v1164_v31 }
 0x15f   : > { %2124 = vrot.lane.b32.xlu0 %v7247_v7, %s6911_s8  ;;  %2126 = vrot.lane.b32.xlu1 %v7249_v9, %s6911_s8  ;;  %v1830_v27 = vrot.slane %v7396_v3, 4  ;;  %v7435_v58 = vsel %vm297_vm0, 0.0, %v1220_v42  ;;  %v7448_v31 = vsel %vm297_vm0, %v1748_v19, %v1731_v43  ;;  %v1138_v42 = vrot.slane %v7334_v12, 4 }
 0x160   : > { %v7454_v0 = vsel %vm297_vm0, %v1804_v46, %v7341_v44  ;;  %v1726_v43 = vrot.slane %v7190_v38, 4  ;;  %v1782_v19 = vrot.slane %v7192_v40, 4  ;;  %v1172_v12 = vrot.slane %v7176_v30, 4 }
 0x161   : > { %v7425_v61 = vsel %vm297_vm0, 0.0, %v1830_v27  ;;  %v603_v27 = vrot.slane %v7351_v18, 4  ;;  %v7469_v44 = vsel %vm297_vm0, %v1138_v42, %v7257_v14  ;;  %v6063_v40 = vpack.i.bf16 %v7236_v2, %v7267_v23 }
 0x162   : > { %v1783_v38 = vsel %vm297_vm0, %v7265_v22, %v1782_v19  ;;  %v6053_v30 = vpack.i.bf16 %v7225_v59, %v7220_v55  ;;  %v1173_v14 = vsel %vm297_vm0, %v7251_v10, %v1172_v12  ;;  %v1794_v46 = vrot.slane %v7249_v9, 4 }
 0x163   : > { %v7457_v50 = vsel %vm297_vm0, 0.0, %v603_v27  ;;  %v12358_v24 = vpack.i.bf16 %v7399_v5, %v7389_v60 }
 0x166   : > { %6034 = vrot.lane.b32.xlu2 %v6033_v48, %s6912_s28 }
 0x167   : > { %6024 = vrot.lane.b32.xlu0 %v6028_v1, %s6912_s28  ;;  %6039 = vrot.lane.b32.xlu1 %v6033_v48, %s6911_s8  ;;  %v1774_v1 = vrot.slane %v7386_v34, 4  ;;  %v7419_v48 = vsel %vm297_vm0, 0.0, %v605_v25  ;;  %v1116_v25 = vrot.slane %v7178_v32, 4 }
 0x169   : > { %v7422_v56 = vsel %vm297_vm0, 0.0, %v1774_v1  ;;  %v7444_v1 = vsel %vm297_vm0, 0.0, %v547_v35  ;;  %v1194_v35 = vrot.slane %v7356_v20, 4  ;;  %v1727_v20 = vsel %vm297_vm0, %v7263_v21, %v1726_v43 }
 0x16a   : > { %v6133_v16 = vpack.i.bf16 %v7457_v50, %v7444_v1  ;;  %v1735_v55 = vperm.slane %v1727_v20, %v7056_v8  ;;  %v7625_v50 = vperm.slane %v7469_v44, %v7063_v17 }
 0x16b   : > { %v7473_v32 = vsel %vm297_vm0, %v1194_v35, %v7337_v13  ;;  %v1117_v13 = vsel %vm297_vm0, %v7205_v45, %v1116_v25  ;;  %v1181_v45 = vperm.slane %v1173_v14, %v7056_v8  ;;  %v1795_v25 = vsel %vm297_vm0, %v7343_v15, %v1794_v46 }
 0x16c   : > { %v1125_v9 = vperm.slane %v1117_v13, %v7056_v8  ;;  %v1762_v27 = vrot.slane %v1735_v55, 4  ;;  %12366 = vst [vmem:[#allocation16_spill] sm:$0xff] %v7625_v50 }
 0x16d   : > { %v1208_v19 = vrot.slane %v1181_v45, 4 }
 0x16e   : > { %2128 = vrot.lane.b32.xlu2 %v7263_v21, %s6911_s8  ;;  %v1152_v43 = vrot.slane %v1125_v9, 4 }
 0x16f   : > { %2130 = vrot.lane.b32.xlu0 %v7265_v22, %s6911_s8  ;;  %6044 = vrot.lane.b32.xlu1 %v6043_v36, %s6912_s28  ;;  %v1738_v36 = vrot.slane %v7247_v7, 4  ;;  %v1128_v7 = vrot.slane %v7215_v52, 4  ;;  %v1184_v22 = vrot.slane %v7208_v47, 4  ;;  %v1791_v52 = vperm.slane %v1783_v38, %v7056_v8 }
 0x171   : > { %v1739_v21 = vsel %vm297_vm0, %v7302_v54, %v1738_v36  ;;  %v1129_v59 = vsel %vm297_vm0, %v7267_v23, %v1128_v7  ;;  %v1818_v42 = vrot.slane %v1791_v52, 4  ;;  %v1185_v35 = vsel %vm297_vm0, %v7236_v2, %v1184_v22 }
 0x172   : > { %v1747_v10 = vperm.slane %v1739_v21, %v7056_v8  ;;  %v1137_v47 = vperm.slane %v1129_v59, %v7056_v8  ;;  %v6068_v23 = vpack.i.bf16 %v7343_v15, %v7302_v54  ;;  %v1803_v36 = vperm.slane %v1795_v25, %v7056_v8 }
 0x173   : > { %v1193_v38 = vperm.slane %v1185_v35, %v7056_v8  ;;  %v12357_v35 = vpack.i.bf16 %v7396_v3, %v7386_v34  ;;  %v577_v34 = vrot.slane %v7320_v63, 4 }
 0x174   : > { %v1763_v12 = vsel %vm297_vm0, %v1747_v10, %v1762_v27  ;;  %v1153_v20 = vsel %vm297_vm0, %v1137_v47, %v1152_v43  ;;  %v1819_v2 = vsel %vm297_vm0, %v1803_v36, %v1818_v42  ;;  %v1760_v22 = vrot.slane %v1747_v10, 4 }
 0x175   : > { %v1209_v7 = vsel %vm297_vm0, %v1193_v38, %v1208_v19  ;;  %v1161_v14 = vperm.slane %v1153_v20, %v7063_v17  ;;  %v1827_v13 = vperm.slane %v1819_v2, %v7063_v17  ;;  %v1206_v59 = vrot.slane %v1193_v38, 4 }
 0x176   : > { %6064 = vrot.lane.b32.xlu2 %v6063_v40, %s6911_s8  ;;  %v1217_v46 = vperm.slane %v1209_v7, %v7063_v17  ;;  %v1816_v25 = vrot.slane %v1803_v36, 4  ;;  %v578_v38 = vsel %vm297_vm0, %v577_v34, %v7307_v57  ;;  %v7594_v7 = vperm.slane %v7448_v31, %v7063_v17 }
 0x177   : > { %6054 = vrot.lane.b32.xlu0 %v6053_v30, %s6911_s8  ;;  %6049 = vrot.lane.b32.xlu1 %v6053_v30, %s6912_s28  ;;  %v1771_v30 = vperm.slane %v1763_v12, %v7063_v17  ;;  %v1207_v10 = vsel %vm297_vm0, %v1206_v59, %v1181_v45  ;;  %v1834_v18 = vrot.slane %v1827_v13, 4  ;;  %v1168_v45 = vrot.slane %v1161_v14, 4 }
 0x178   : > { %v6078_v21 = vpack.i.bf16 %v1217_v46, %v1161_v14  ;;  %v1213_v29 = vperm.slane %v1207_v10, %v7063_v17  ;;  %v1224_v33 = vrot.slane %v1217_v46, 4  ;;  %v521_v12 = vrot.slane %v7286_v39, 4  ;;  %12362 = vst [vmem:[#allocation14_spill] sm:$0xff] %v7594_v7 }
 0x179   : > { %v1169_v43 = vsel %vm297_vm0, 0.0, %v1168_v45  ;;  %v12359_v39 = vpack.i.bf16 %v7419_v48, %v7414_v37  ;;  %v12364_v14 = vpack.i.bf16 %v7425_v61, %v7422_v56  ;;  %v1772_v31 = vrot.slane %v7594_v7, 4 }
 0x17a   : > { %v1225_v3 = vsel %vm297_vm0, 0.0, %v1224_v33  ;;  %v522_v20 = vsel %vm297_vm0, %v521_v12, %v7241_v4  ;;  %v7598_v4 = vperm.slane %v7454_v0, %v7063_v17  ;;  %v12365_v0 = vpack.i.bf16 %v7435_v58, %v7432_v6 }
 0x17b   : > { %v6123_v60 = vpack.i.bf16 %v1225_v3, %v1169_v43  ;;  %v7587_v2 = vperm.slane %v522_v20, %v7063_v17  ;;  %v1773_v6 = vsel %vm297_vm0, 0.0, %v1772_v31 }
 0x17c   : > { %12363 = vst [vmem:[#allocation15_spill] sm:$0xff] %v7598_v4 }
 0x17d   : > { %12360 = vst [vmem:[#allocation12_spill] sm:$0xff] %v7587_v2  ;;  %v545_v37 = vrot.slane %v7587_v2, 4 }
 0x17e   : > { %6069 = vrot.lane.b32.xlu2 %v6068_v23, %s6912_s28 }
 0x17f   : > { %6059 = vrot.lane.b32.xlu0 %v6063_v40, %s6912_s28  ;;  %2132 = vrot.lane.b32.xlu1 %v7302_v54, %s6911_s8  ;;  %v6083_v40 = vpack.i.bf16 %v1827_v13, %v1771_v30  ;;  %v1150_v54 = vrot.slane %v1137_v47, 4  ;;  %v1817_v47 = vsel %vm297_vm0, %v1816_v25, %v1791_v52  ;;  %v546_v61 = vsel %vm297_vm0, 0.0, %v545_v37 }
 0x181   : > { %v1151_v27 = vsel %vm297_vm0, %v1150_v54, %v1125_v9  ;;  %v7633_v54 = vperm.slane %v7473_v32, %v7063_v17 }
 0x182   : > { %v1157_v9 = vperm.slane %v1151_v27, %v7063_v17 }
 0x183   : > { %12367 = vst [vmem:[#allocation17_spill] sm:$0xff] %v7633_v54  ;;  %v1218_v44 = vrot.slane %v7633_v54, 4 }
 0x184   : > { %v6103_v49 = vpack.i.bf16 %v1213_v29, %v1157_v9  ;;  %v1166_v42 = vrot.slane %v1157_v9, 4 }
 0x186   : > { %2134 = vrot.lane.b32.xlu2 %v7343_v15, %s6911_s8  ;;  %v1761_v15 = vsel %vm297_vm0, %v1760_v22, %v1735_v55  ;;  %v1835_v55 = vsel %vm297_vm0, 0.0, %v1834_v18  ;;  %v1167_v19 = vsel %vm297_vm0, 0.0, %v1166_v42 }
 0x187   : > { %6084 = vrot.lane.b32.xlu0 %v6083_v40, %s6903_s17  ;;  %6079 = vrot.lane.b32.xlu1 %v6078_v21, %s6903_s17  ;;  %v1767_v28 = vperm.slane %v1761_v15, %v7063_v17  ;;  %v1828_v40 = vrot.slane %v7598_v4, 4  ;;  %v1162_v15 = vrot.slane %v7625_v50, 4 }
 0x189   : > { %v1776_v57 = vrot.slane %v1767_v28, 4  ;;  %v1829_v22 = vsel %vm297_vm0, 0.0, %v1828_v40  ;;  %v1163_v32 = vsel %vm297_vm0, 0.0, %v1162_v15 }
 0x18a   : > { %v6173_v27 = vpack.i.bf16 %v1829_v22, %v1773_v6 }
 0x18b   : > { %v1777_v56 = vsel %vm297_vm0, 0.0, %v1776_v57 }
 0x18e   : > { %6074 = vrot.lane.b32.xlu2 %v6073_v41, %s6903_s17  ;;  %v1823_v41 = vperm.slane %v1817_v47, %v7063_v17  ;;  %v1219_v47 = vsel %vm297_vm0, 0.0, %v1218_v44 }
 0x18f   : > { %6094 = vrot.lane.b32.xlu0 %v6093_v62, %s6904_s29  ;;  %6089 = vrot.lane.b32.xlu1 %v6088_v26, %s6905_s23  ;;  %v1778_v62 = vrot.slane %v1771_v30, 4  ;;  %v7590_v30 = vperm.slane %v578_v38, %v7063_v17 }
 0x190   : > { %v6113_v51 = vpack.i.bf16 %v1823_v41, %v1767_v28  ;;  %v1832_v13 = vrot.slane %v1823_v41, 4 }
 0x191   : > { %v1779_v26 = vsel %vm297_vm0, 0.0, %v1778_v62  ;;  %12361 = vst [vmem:[#allocation13_spill] sm:$0xff] %v7590_v30  ;;  %v601_v48 = vrot.slane %v7590_v30, 4 }
 0x192   : > { %v6128_v52 = vpack.i.bf16 %v1835_v55, %v1779_v26  ;;  %v1833_v58 = vsel %vm297_vm0, 0.0, %v1832_v13 }
 0x193   : > { %v6158_v59 = vpack.i.bf16 %v1833_v58, %v1777_v56 }
 0x196   : > { %6104 = vrot.lane.b32.xlu2 %v6103_v49, %s6904_s29 }
 0x197   : > { %6099 = vrot.lane.b32.xlu0 %v6098_v53, %s6905_s23  ;;  %6114 = vrot.lane.b32.xlu1 %v6113_v51, %s6904_s29  ;;  %v1222_v53 = vrot.slane %v1213_v29, 4  ;;  %v6168_v29 = vpack.i.bf16 %v1219_v47, %v1163_v32 }
 0x198   : > { %v7553_v11 = vpop.permute.xlu2 %5989 }
 0x199   : > { %v1223_v36 = vsel %vm297_vm0, 0.0, %v1222_v53  ;;  %v12185_v33 = vunpack.i.l.bf16 %v7553_v11 }
 0x19a   : > { %v6148_v5 = vpack.i.bf16 %v1223_v36, %v1167_v19 }
 0x19b   : > { %v1536_v37 = vrot.slane %v12185_v33, 4 }
 0x19e   : > { %6109 = vrot.lane.b32.xlu2 %v12357_v35, %s6905_s23 }
 0x19f   : > { %6119 = vrot.lane.b32.xlu0 %v12358_v24, %s6901_s15  ;;  %6129 = vrot.lane.b32.xlu1 %v6128_v52, %s6901_s15  ;;  %v12189_v24 = vunpack.i.h.bf16 %v7553_v11 }
 0x1a0   : > { %v7566_v23 = vpop.permute.xlu2 %5994 }
 0x1a1   : > { %v12182_v43 = vunpack.i.h.bf16 %v7566_v23  ;;  %v12181_v19 = vunpack.i.l.bf16 %v7566_v23  ;;  %v1592_v57 = vrot.slane %v12189_v24, 4 }
 0x1a6   : > { %6124 = vrot.lane.b32.xlu2 %v6123_v60, %s6901_s15 }
 0x1a7   : > { %6149 = vrot.lane.b32.xlu0 %v6148_v5, %s6900_s13  ;;  %6139 = vrot.lane.b32.xlu1 %v12359_v39, %s6900_s13 }
 0x1a8   : > { %v7584_v63 = vpop.permute.xlu2 %2122 }
 0x1ae   : > { %6134 = vrot.lane.b32.xlu2 %v6133_v16, %s6902_s16  ;;  %v602_v16 = vsel %vm297_vm0, 0.0, %v601_v48 }
 0x1af   : > { %6154 = vrot.lane.b32.xlu0 %v12364_v14, %s6902_s16  ;;  %6144 = vrot.lane.b32.xlu1 %v12365_v0, %s6902_s16  ;;  %v6163_v25 = vpack.i.bf16 %v602_v16, %v546_v61  ;;  %v7683_v0 = vrot.slane %v12182_v43, 4  ;;  %v7690_v61 = vrot.slane %v12181_v19, 4 }
 0x1b0   : > { %v7627_v1 = vpop.permute.xlu2 %5999 }
 0x1b1   : > { %v7615_v46 = vpop.permute.xlu0 %5979  ;;  %v7618_v21 = vpop.permute.xlu1 %5974  ;;  %v12184_v34 = vunpack.i.h.bf16 %v7627_v1  ;;  %v12183_v3 = vunpack.i.l.bf16 %v7627_v1 }
 0x1b2   : > { %v5981_v52 = vunpack.i.l.bf16 %v7615_v46  ;;  %v5982_v42 = vunpack.i.h.bf16 %v7615_v46  ;;  %v12191_v36 = vunpack.i.h.bf16 %v7618_v21  ;;  %v12192_v60 = vunpack.i.l.bf16 %v7618_v21 }
 0x1b3   : > { %v7694_v16 = vrot.slane %v12184_v34, 4  ;;  %v7698_v6 = vrot.slane %v12183_v3, 4 }
 0x1b4   : > { %v926_v12 = vrot.slane %v5981_v52, 4  ;;  %v982_v5 = vrot.slane %v5982_v42, 4 }
 0x1b6   : > { %6159 = vrot.lane.b32.xlu2 %v6158_v59, %s6900_s13  ;;  %v7707_v59 = vrot.slane %v12191_v36, 4 }
 0x1b7   : > { %6164 = vrot.lane.b32.xlu0 %v6163_v25, %s6906_s25  ;;  %6174 = vrot.lane.b32.xlu1 %v6173_v27, %s6906_s25  ;;  %v7711_v25 = vrot.slane %v12192_v60, 4 }
 0x1b8   : > { %v6030_v28 = vpop.permute.xlu2 %6029 }
 0x1b9   : > { %v7641_v10 = vpop.permute.xlu0 %5984  ;;  %v7643_v9 = vpop.permute.xlu1 %2120  ;;  %v6031_v35 = vunpack.i.l.bf16 %v6030_v28  ;;  %v6032_v53 = vunpack.i.h.bf16 %v6030_v28 }
 0x1ba   : > { %12368 = vst [vmem:[#allocation18_spill] sm:$0xff] %v7643_v9  ;;  %v5986_v39 = vunpack.i.l.bf16 %v7641_v10  ;;  %v5987_v14 = vunpack.i.h.bf16 %v7641_v10  ;;  %v2146_v47 = vrot.slane %v7643_v9, 4 }
 0x1bb   : > { %v924_v20 = vrot.slane %v6031_v35, 4  ;;  %v927_v38 = vsel %vm297_vm0, %v6031_v35, %v926_v12  ;;  %v980_v48 = vrot.slane %v6032_v53, 4  ;;  %v983_v13 = vsel %vm297_vm0, %v6032_v53, %v982_v5 }
 0x1bc   : > { %v7701_v58 = vperm.slane %v927_v38, %v7056_v8  ;;  %v1330_v15 = vrot.slane %v5986_v39, 4  ;;  %v7716_v10 = vperm.slane %v983_v13, %v7056_v8  ;;  %v1386_v32 = vrot.slane %v5987_v14, 4 }
 0x1bd   : > { %v925_v27 = vsel %vm297_vm0, %v924_v20, %v5981_v52  ;;  %v981_v44 = vsel %vm297_vm0, %v980_v48, %v5982_v42 }
 0x1be   : > { %6169 = vrot.lane.b32.xlu2 %v6168_v29, %s6906_s25  ;;  %v7722_v53 = vperm.slane %v925_v27, %v7056_v8  ;;  %v7732_v13 = vperm.slane %v981_v44, %v7056_v8 }
 0x1c0   : > { %v6035_v51 = vpop.permute.xlu2 %6034  ;;  %12371 = vst [vmem:[#allocation21_spill] sm:$0xff] %v7722_v53 }
 0x1c1   : > { %v7648_v41 = vpop.permute.xlu0 %6014  ;;  %v7650_v49 = vpop.permute.xlu1 %6004  ;;  %v6037_v46 = vunpack.i.h.bf16 %v6035_v51  ;;  %v6036_v40 = vunpack.i.l.bf16 %v6035_v51  ;;  %12372 = vst [vmem:[#allocation22_spill] sm:$0xff] %v7732_v13 }
 0x1c2   : > { %v12194_v12 = vunpack.i.l.bf16 %v7648_v41  ;;  %v12193_v20 = vunpack.i.h.bf16 %v7648_v41  ;;  %v12186_v38 = vunpack.i.h.bf16 %v7650_v49  ;;  %v12187_v48 = vunpack.i.l.bf16 %v7650_v49 }
 0x1c3   : > { %v1384_v28 = vrot.slane %v6037_v46, 4  ;;  %v1328_v29 = vrot.slane %v6036_v40, 4  ;;  %v1331_v51 = vsel %vm297_vm0, %v6036_v40, %v1330_v15  ;;  %v1387_v5 = vsel %vm297_vm0, %v6037_v46, %v1386_v32 }
 0x1c4   : > { %v7736_v27 = vperm.slane %v1331_v51, %v7056_v8  ;;  %v7750_v34 = vperm.slane %v1387_v5, %v7056_v8  ;;  %v1548_v51 = vrot.slane %v12194_v12, 4 }
 0x1c5   : > { %v1329_v46 = vsel %vm297_vm0, %v1328_v29, %v5986_v39  ;;  %v1385_v32 = vsel %vm297_vm0, %v1384_v28, %v5987_v14  ;;  %v1604_v14 = vrot.slane %v12193_v20, 4 }
 0x1c6   : > { %v7774_v29 = vperm.slane %v1329_v46, %v7056_v8 }
 0x1c8   : > { %v7656_v26 = vpop.permute.xlu2 %2128  ;;  %12373 = vst [vmem:[#allocation23_spill] sm:$0xff] %v7774_v29 }
 0x1c9   : > { %v7652_v62 = vpop.permute.xlu0 %6019  ;;  %v7654_v18 = vpop.permute.xlu1 %6009  ;;  %v2147_v52 = vsel %vm297_vm0, %v7656_v26, %v2146_v47 }
 0x1ca   : > { %v12383_v50 = vunpack.i.l.bf16 %v7654_v18 }
 0x1d0   : > { %v7703_v22 = vpop.permute.xlu2 %6064 }
 0x1d1   : > { %v7658_v55 = vpop.permute.xlu0 %2124  ;;  %v7661_v45 = vpop.permute.xlu1 %2126  ;;  %v6066_v15 = vunpack.i.l.bf16 %v7703_v22  ;;  %v6067_v43 = vunpack.i.h.bf16 %v7703_v22  ;;  %v7768_v22 = vrot.slane %v12187_v48, 4 }
 0x1d2   : > { %12369 = vst [vmem:[#allocation19_spill] sm:$0xff] %v7658_v55 }
 0x1d3   : > { %12370 = vst [vmem:[#allocation20_spill] sm:$0xff] %v7661_v45  ;;  %v1546_v20 = vrot.slane %v6066_v15, 4 }
 0x1d8   : > { %v7781_v40 = vpop.permute.xlu2 %6069 }
 0x1d9   : > { %v7679_v31 = vpop.permute.xlu0 %6024  ;;  %v7686_v56 = vpop.permute.xlu1 %6039  ;;  %v12200_v47 = vunpack.i.l.bf16 %v7781_v40 }
 0x1da   : > { %v12190_v35 = vunpack.i.h.bf16 %v7686_v56  ;;  %v12188_v42 = vunpack.i.l.bf16 %v7686_v56 }
 0x1dc   : > { %v1593_v44 = vsel %vm297_vm0, %v12190_v35, %v1592_v57  ;;  %v1537_v39 = vsel %vm297_vm0, %v12188_v42, %v1536_v37  ;;  %v7764_v57 = vrot.slane %v12186_v38, 4  ;;  %v7778_v37 = vperm.slane %v1385_v32, %v7056_v8 }
 0x1dd   : > { %v7755_v33 = vperm.slane %v1593_v44, %v7056_v8  ;;  %v7771_v28 = vperm.slane %v1537_v39, %v7056_v8  ;;  %v1549_v44 = vsel %vm297_vm0, %v6066_v15, %v1548_v51  ;;  %v12196_v38 = vunpack.i.l.bf16 %v7652_v62 }
 0x1de   : > { %12374 = vst [vmem:[#allocation24_spill] sm:$0xff] %v7778_v37  ;;  %v1605_v39 = vsel %vm297_vm0, %v6067_v43, %v1604_v14  ;;  %v7794_v24 = vperm.slane %v1549_v44, %v7056_v8  ;;  %v7799_v14 = vperm.slane %v2147_v52, %v7056_v8 }
 0x1df   : > { %v1572_v48 = vrot.slane %v7771_v28, 4  ;;  %v1628_v5 = vrot.slane %v7755_v33, 4  ;;  %v7802_v46 = vperm.slane %v1605_v39, %v7056_v8  ;;  %v1952_v35 = vrot.slane %v12196_v38, 4 }
 0x1e0   : > { %v7952_v45 = vpop.permute.xlu2 %2134 }
 0x1e1   : > { %v7739_v19 = vpop.permute.xlu0 %2130  ;;  %v7747_v3 = vpop.permute.xlu1 %6044  ;;  %v1573_v39 = vsel %vm297_vm0, %v7794_v24, %v1572_v48  ;;  %v1953_v15 = vsel %vm297_vm0, %v12200_v47, %v1952_v35 }
 0x1e2   : > { %v12195_v32 = vunpack.i.h.bf16 %v7747_v3  ;;  %v12197_v42 = vunpack.i.l.bf16 %v7747_v3  ;;  %v7824_v51 = vperm.slane %v1573_v39, %v7063_v17  ;;  %v7849_v38 = vperm.slane %v1953_v15, %v7056_v8 }
 0x1e4   : > { %v1997_v36 = vsel %vm297_vm0, %v12195_v32, %v7683_v0  ;;  %v1941_v44 = vsel %vm297_vm0, %v12197_v42, %v7690_v61  ;;  %v6026_v32 = vunpack.i.l.bf16 %v7679_v31  ;;  %12376 = vst [vmem:[#allocation26_spill] sm:$0xff] %v7824_v51  ;;  %v1629_v61 = vsel %vm297_vm0, %v7802_v46, %v1628_v5 }
 0x1e5   : > { %v7815_v52 = vperm.slane %v1941_v44, %v7056_v8  ;;  %v6027_v44 = vunpack.i.h.bf16 %v7679_v31  ;;  %v7833_v48 = vperm.slane %v1997_v36, %v7056_v8  ;;  %v12378_v42 = vunpack.i.h.bf16 %v7652_v62 }
 0x1e6   : > { %v7841_v5 = vperm.slane %v1629_v61, %v7063_v17  ;;  %v1602_v31 = vrot.slane %v6067_v43, 4  ;;  %v12380_v36 = vunpack.i.l.bf16 %v7648_v41  ;;  %v718_v7 = vrot.slane %v6026_v32, 4 }
 0x1e7   : > { %12375 = vst [vmem:[#allocation25_spill] sm:$0xff] %v7815_v52  ;;  %v2008_v0 = vrot.slane %v12378_v42, 4  ;;  %v1976_v30 = vrot.slane %v7815_v52, 4  ;;  %v12381_v42 = vunpack.i.h.bf16 %v7781_v40  ;;  %v774_v4 = vrot.slane %v6027_v44, 4 }
 0x1e8   : > { %12377 = vst [vmem:[#allocation27_spill] sm:$0xff] %v7833_v48  ;;  %v1547_v47 = vsel %vm297_vm0, %v1546_v20, %v12380_v36  ;;  %v6193_v61 = vpack.i.bf16 %v7841_v5, %v7824_v51  ;;  %v721_v2 = vsel %vm297_vm0, %v6026_v32, %v7711_v25  ;;  %v777_v43 = vsel %vm297_vm0, %v6027_v44, %v7707_v59 }
 0x1e9   : > { %v6055_v60 = vpop.permute.xlu0 %6054  ;;  %v7819_v12 = vpop.permute.xlu1 %6049  ;;  %12379 = vst [vmem:[#allocation28_spill] sm:$0xff] %v7841_v5  ;;  %v2009_v39 = vsel %vm297_vm0, %v12381_v42, %v2008_v0  ;;  %v2032_v20 = vrot.slane %v7833_v48, 4  ;;  %v1977_v0 = vsel %vm297_vm0, %v7849_v38, %v1976_v30  ;;  %v12382_v42 = vunpack.i.h.bf16 %v7654_v18 }
 0x1ea   : > { %6194 = vrot.lane.b32.xlu2 %v6193_v61, %s6903_s17  ;;  %v6057_v15 = vunpack.i.h.bf16 %v6055_v60  ;;  %v6056_v36 = vunpack.i.l.bf16 %v6055_v60  ;;  %v6051_v35 = vunpack.i.l.bf16 %v7819_v12  ;;  %v1342_v25 = vrot.slane %v12383_v50, 4 }
 0x1eb   : > { %v1398_v54 = vrot.slane %v12382_v42, 4  ;;  %v12384_v32 = vunpack.i.h.bf16 %v7648_v41  ;;  %v2158_v44 = vrot.slane %v7658_v55, 4  ;;  %v7876_v60 = vperm.slane %v1547_v47, %v7056_v8 }
 0x1ec   : > { %v7879_v61 = vperm.slane %v2009_v39, %v7056_v8  ;;  %v12386_v30 = vunpack.i.l.bf16 %v7618_v21  ;;  %v6052_v5 = vunpack.i.h.bf16 %v7819_v12  ;;  %v7888_v41 = vperm.slane %v721_v2, %v7056_v8 }
 0x1ed   : > { %v7872_v59 = vsel %vm297_vm0, %v1602_v31, %v12384_v32  ;;  %v12387_v31 = vunpack.i.h.bf16 %v7618_v21  ;;  %v7894_v47 = vperm.slane %v777_v43, %v7056_v8  ;;  %v7897_v39 = vperm.slane %v1977_v0, %v7063_v17 }
 0x1ee   : > { %12385 = vst [vmem:[#allocation29_spill] sm:$0xff] %v7879_v61  ;;  %v719_v42 = vsel %vm297_vm0, %v718_v7, %v12386_v30  ;;  %v939_v7 = vsel %vm297_vm0, %v6056_v36, %v7768_v22  ;;  %v995_v12 = vsel %vm297_vm0, %v6057_v15, %v7764_v57  ;;  %v733_v2 = vsel %vm297_vm0, %v6051_v35, %v7698_v6 }
 0x1ef   : > { %v775_v32 = vsel %vm297_vm0, %v774_v4, %v12387_v31  ;;  %12388 = vst [vmem:[#allocation30_spill] sm:$0xff] %v7897_v39  ;;  %v2033_v4 = vsel %vm297_vm0, %v7879_v61, %v2032_v20  ;;  %v12390_v21 = vunpack.i.h.bf16 %v7686_v56  ;;  %v992_v22 = vrot.slane %v6057_v15, 4 }
 0x1f0   : > { %v7912_v0 = vperm.slane %v2033_v4, %v7063_v17  ;;  %v936_v51 = vrot.slane %v6056_v36, 4  ;;  %v789_v57 = vsel %vm297_vm0, %v6052_v5, %v7694_v16  ;;  %v947_v20 = vperm.slane %v939_v7, %v7056_v8 }
 0x1f1   : > { %v7885_v50 = vpop.permute.xlu0 %6059  ;;  %v7899_v55 = vpop.permute.xlu1 %2132  ;;  %v1590_v43 = vrot.slane %v12390_v21, 4  ;;  %v1003_v9 = vperm.slane %v995_v12, %v7056_v8  ;;  %v741_v21 = vperm.slane %v733_v2, %v7056_v8  ;;  %v7926_v48 = vperm.slane %v719_v42, %v7056_v8 }
 0x1f2   : > { %12389 = vst [vmem:[#allocation31_spill] sm:$0xff] %v7899_v55  ;;  %v6062_v30 = vunpack.i.h.bf16 %v7885_v50  ;;  %v6061_v31 = vunpack.i.l.bf16 %v7885_v50  ;;  %v2159_v6 = vsel %vm297_vm0, %v7899_v55, %v2158_v44  ;;  %v6198_v4 = vpack.i.bf16 %v7912_v0, %v7897_v39 }
 0x1f3   : > { %12391 = vst [vmem:[#allocation32_spill] sm:$0xff] %v7912_v0  ;;  %v756_v15 = vrot.slane %v7888_v41, 4  ;;  %v7930_v36 = vperm.slane %v775_v32, %v7056_v8  ;;  %v812_v16 = vrot.slane %v7894_v47, 4  ;;  %v797_v44 = vperm.slane %v789_v57, %v7056_v8 }
 0x1f4   : > { %6199 = vrot.lane.b32.xlu2 %v6198_v4, %s6903_s17  ;;  %v1343_v50 = vsel %vm297_vm0, %v6061_v31, %v1342_v25  ;;  %v1399_v7 = vsel %vm297_vm0, %v6062_v30, %v1398_v54  ;;  %v7938_v12 = vperm.slane %v2159_v6, %v7056_v8  ;;  %v12392_v42 = vunpack.i.h.bf16 %v7553_v11 }
 0x1f5   : > { %v12393_v32 = vunpack.i.l.bf16 %v7686_v56  ;;  %v12394_v39 = vunpack.i.l.bf16 %v7650_v49  ;;  %v786_v55 = vrot.slane %v6052_v5, 4  ;;  %v960_v4 = vrot.slane %v947_v20, 4 }
 0x1f6   : > { %v1591_v2 = vsel %vm297_vm0, %v1590_v43, %v12392_v42  ;;  %v12395_v25 = vunpack.i.h.bf16 %v7650_v49  ;;  %v1016_v52 = vrot.slane %v1003_v9, 4  ;;  %v757_v6 = vsel %vm297_vm0, %v741_v21, %v756_v15 }
 0x1f7   : > { %v1534_v0 = vrot.slane %v12393_v32, 4  ;;  %v937_v57 = vsel %vm297_vm0, %v936_v51, %v12394_v39  ;;  %v730_v61 = vrot.slane %v6051_v35, 4  ;;  %v1351_v43 = vperm.slane %v1343_v50, %v7056_v8 }
 0x1f8   : > { %v993_v54 = vsel %vm297_vm0, %v992_v22, %v12395_v25  ;;  %v1407_v56 = vperm.slane %v1399_v7, %v7056_v8  ;;  %v7957_v42 = vperm.slane %v757_v6, %v7063_v17  ;;  %v813_v51 = vsel %vm297_vm0, %v797_v44, %v812_v16 }
 0x1f9   : > { %v12396_v5 = vrot.slane %v7701_v58, 4  ;;  %v12397_v39 = vrot.slane %v7716_v10, 4  ;;  %v12398_v15 = vrot.slane %v7799_v14, 4  ;;  %v7971_v50 = vperm.slane %v813_v51, %v7063_v17 }
 0x1fa   : > { %v7983_v32 = vperm.slane %v1591_v2, %v7056_v8  ;;  %v810_v6 = vrot.slane %v797_v44, 4  ;;  %v7989_v51 = vperm.slane %v937_v57, %v7056_v8  ;;  %v12403_v2 = vrot.slane %v7750_v34, 4 }
 0x1fb   : > { %v963_v49 = vsel %vm297_vm0, %v947_v20, %v12396_v5  ;;  %v1019_v22 = vsel %vm297_vm0, %v1003_v9, %v12397_v39  ;;  %v2183_v35 = vsel %vm297_vm0, %v7938_v12, %v12398_v15  ;;  %v12399_v9 = vunpack.i.l.bf16 %v7553_v11 }
 0x1fc   : > { %v7974_v7 = vperm.slane %v963_v49, %v7063_v17  ;;  %v7977_v16 = vperm.slane %v1019_v22, %v7063_v17  ;;  %v7980_v20 = vperm.slane %v2183_v35, %v7063_v17  ;;  %v754_v5 = vrot.slane %v741_v21, 4  ;;  %12400 = vst [vmem:[#allocation33_spill] sm:$0xff] %v7989_v51 }
 0x1fd   : > { %v1535_v25 = vsel %vm297_vm0, %v1534_v0, %v12399_v9  ;;  %v7992_v49 = vperm.slane %v993_v54, %v7056_v8  ;;  %v6178_v39 = vpack.i.bf16 %v7971_v50, %v7957_v42  ;;  %v961_v11 = vsel %vm297_vm0, %v960_v4, %v7701_v58 }
 0x1fe   : > { %v6183_v22 = vpack.i.bf16 %v7977_v16, %v7974_v7  ;;  %2277 = vrot.lane.b32.xlu2 %v7980_v20, %s6903_s17  ;;  %v1017_v0 = vsel %vm297_vm0, %v1016_v52, %v7716_v10  ;;  %v12402_v21 = vrot.slane %v7736_v27, 4  ;;  %v1423_v57 = vsel %vm297_vm0, %v1407_v56, %v12403_v2  ;;  %v8053_v2 = vpop.permute.xlu2 %6074 }
 0x1ff   : > { %12401 = vst [vmem:[#allocation34_spill] sm:$0xff] %v7992_v49  ;;  %v12404_v54 = vunpack.i.h.bf16 %v7627_v1  ;;  %v12405_v35 = vunpack.i.l.bf16 %v7627_v1  ;;  %v1396_v58 = vrot.slane %v6062_v30, 4  ;;  %6179 = vrot.lane.b32.xlu1 %v6178_v39, %s6903_s17  ;;  %v1340_v52 = vrot.slane %v6061_v31, 4 }
 0x200   : > { %v1367_v44 = vsel %vm297_vm0, %v1351_v43, %v12402_v21  ;;  %6184 = vrot.lane.b32.xlu0 %v6183_v22, %s6903_s17  ;;  %v8022_v4 = vperm.slane %v1423_v57, %v7063_v17  ;;  %v755_v21 = vsel %vm297_vm0, %v754_v5, %v7888_v41  ;;  %v811_v1 = vsel %vm297_vm0, %v810_v6, %v7894_v47 }
 0x201   : > { %v787_v15 = vsel %vm297_vm0, %v786_v55, %v12404_v54  ;;  %v731_v9 = vsel %vm297_vm0, %v730_v61, %v12405_v35  ;;  %v8019_v10 = vperm.slane %v1367_v44, %v7063_v17  ;;  %v8029_v55 = vperm.slane %v961_v11, %v7063_v17  ;;  %12408 = vst [vmem:[#allocation35_spill] sm:$0xff] %v8053_v2 }
 0x202   : > { %v8032_v61 = vperm.slane %v1017_v0, %v7063_v17  ;;  %v8035_v30 = vperm.slane %v755_v21, %v7063_v17  ;;  %v8038_v31 = vperm.slane %v811_v1, %v7063_v17  ;;  %v8041_v39 = vperm.slane %v787_v15, %v7056_v8 }
 0x203   : > { %v8044_v41 = vperm.slane %v731_v9, %v7056_v8  ;;  %v1364_v5 = vrot.slane %v1351_v43, 4  ;;  %v1420_v47 = vrot.slane %v1407_v56, 4  ;;  %v8047_v6 = vperm.slane %v1535_v25, %v7056_v8 }
 0x204   : > { %v12406_v22 = vunpack.i.h.bf16 %v7747_v3  ;;  %v12407_v0 = vunpack.i.l.bf16 %v7747_v3  ;;  %v6188_v57 = vpack.i.bf16 %v8022_v4, %v8019_v10  ;;  %v12409_v54 = vunpack.i.l.bf16 %v7654_v18 }
 0x205   : > { %v6208_v43 = vpack.i.bf16 %v8038_v31, %v8035_v30  ;;  %v744_v56 = vrot.slane %v7926_v48, 4  ;;  %v800_v25 = vrot.slane %v7930_v36, 4  ;;  %v12410_v35 = vunpack.i.h.bf16 %v7654_v18 }
 0x206   : > { %v1994_v11 = vrot.slane %v12406_v22, 4  ;;  %v1938_v44 = vrot.slane %v12407_v0, 4  ;;  %v1341_v15 = vsel %vm297_vm0, %v1340_v52, %v12409_v54  ;;  %v6218_v9 = vpack.i.bf16 %v8032_v61, %v8029_v55 }
 0x207   : > { %v1397_v3 = vsel %vm297_vm0, %v1396_v58, %v12410_v35  ;;  %v12411_v21 = vrot.slane %v7722_v53, 4  ;;  %v12412_v52 = vrot.slane %v7732_v13, 4  ;;  %6209 = vrot.lane.b32.xlu2 %v6208_v43, %s6904_s29  ;;  %v1365_v18 = vsel %vm297_vm0, %v1364_v5, %v7736_v27  ;;  %v12426_v53 = vld [vmem:[#allocation31_spill] sm:$0xff] }
 0x208   : > { %v1421_v58 = vsel %vm297_vm0, %v1420_v47, %v7750_v34  ;;  %v745_v0 = vsel %vm297_vm0, %v8044_v41, %v744_v56  ;;  %v801_v54 = vsel %vm297_vm0, %v8041_v39, %v800_v25  ;;  %v1570_v35 = vrot.slane %v7794_v24, 4  ;;  %6219 = vrot.lane.b32.xlu1 %v6218_v9, %s6904_s29  ;;  %6189 = vrot.lane.b32.xlu0 %v6188_v57, %s6903_s17 }
 0x209   : > { %v951_v1 = vsel %vm297_vm0, %v7989_v51, %v12411_v21  ;;  %v1007_v22 = vsel %vm297_vm0, %v7992_v49, %v12412_v52  ;;  %v2200_v21 = vrot.slane %v7739_v19, 4  ;;  %v12413_v52 = vunpack.i.h.bf16 %v7566_v23 }
 0x20a   : > { %v12414_v2 = vunpack.i.l.bf16 %v7566_v23  ;;  %v8097_v34 = vperm.slane %v1341_v15, %v7056_v8  ;;  %v8100_v5 = vperm.slane %v1397_v3, %v7056_v8  ;;  %v8103_v24 = vperm.slane %v951_v1, %v7063_v17 }
 0x20b   : > { %v1995_v43 = vsel %vm297_vm0, %v1994_v11, %v12413_v52  ;;  %v8106_v47 = vperm.slane %v1007_v22, %v7063_v17  ;;  %v8109_v23 = vperm.slane %v1365_v18, %v7063_v17  ;;  %v8112_v11 = vperm.slane %v1421_v58, %v7063_v17  ;;  %v8143_v52 = vpop.permute.xlu2 %6104 }
 0x20c   : > { %v1939_v27 = vsel %vm297_vm0, %v1938_v44, %v12414_v2  ;;  %12415 = vst [vmem:[#allocation36_spill] sm:$0xff] %v8097_v34  ;;  %v8115_v44 = vperm.slane %v745_v0, %v7063_v17  ;;  %v8118_v2 = vperm.slane %v801_v54, %v7063_v17  ;;  %v8122_v57 = vperm.slane %v7872_v59, %v7056_v8 }
 0x20d   : > { %12416 = vst [vmem:[#allocation37_spill] sm:$0xff] %v8100_v5  ;;  %v1626_v15 = vrot.slane %v7802_v46, 4  ;;  %v1560_v56 = vrot.slane %v8047_v6, 4  ;;  %v1616_v25 = vrot.slane %v7983_v32, 4  ;;  %v12417_v3 = vunpack.i.h.bf16 %v7781_v40 }
 0x20e   : > { %v12418_v1 = vunpack.i.l.bf16 %v7781_v40  ;;  %v1354_v18 = vrot.slane %v7774_v29, 4  ;;  %v1410_v58 = vrot.slane %v7778_v37, 4  ;;  %v2201_v59 = vsel %vm297_vm0, %v2200_v21, %v7584_v63  ;;  %12419 = vst [vmem:[#allocation38_spill] sm:$0xff] %v8143_v52 }
 0x20f   : > { %v2006_v9 = vrot.slane %v12417_v3, 4  ;;  %v8136_v0 = vperm.slane %v1995_v43, %v7056_v8  ;;  %v8139_v46 = vperm.slane %v1939_v27, %v7056_v8  ;;  %v6213_v54 = vpack.i.bf16 %v8106_v47, %v8103_v24 }
 0x210   : > { %v1950_v22 = vrot.slane %v12418_v1, 4  ;;  %v6228_v40 = vpack.i.bf16 %v8112_v11, %v8109_v23  ;;  %v6203_v3 = vpack.i.bf16 %v8118_v2, %v8115_v44  ;;  %v1355_v21 = vsel %vm297_vm0, %v8097_v34, %v1354_v18 }
 0x211   : > { %v1411_v43 = vsel %vm297_vm0, %v8100_v5, %v1410_v58  ;;  %6214 = vrot.lane.b32.xlu2 %v6213_v54, %s6905_s23  ;;  %v1561_v27 = vsel %vm297_vm0, %v7876_v60, %v1560_v56  ;;  %v1617_v1 = vsel %vm297_vm0, %v8122_v57, %v1616_v25  ;;  %v1571_v52 = vsel %vm297_vm0, %v1570_v35, %v7771_v28  ;;  %v12425_v5 = vld [vmem:[#allocation27_spill] sm:$0xff] }
 0x212   : > { %v1627_v37 = vsel %vm297_vm0, %v1626_v15, %v7755_v33  ;;  %v12420_v29 = vunpack.i.l.bf16 %v7652_v62  ;;  %v12421_v58 = vunpack.i.h.bf16 %v7652_v62  ;;  %6229 = vrot.lane.b32.xlu1 %v6228_v40, %s6904_s29  ;;  %6204 = vrot.lane.b32.xlu0 %v6203_v3, %s6905_s23  ;;  %v2212_v56 = vrot.slane %v7952_v45, 4 }
 0x213   : > { %v8172_v25 = vperm.slane %v2201_v59, %v7056_v8  ;;  %v8175_v28 = vperm.slane %v1355_v21, %v7063_v17  ;;  %v8178_v33 = vperm.slane %v1411_v43, %v7063_v17  ;;  %v8184_v62 = vperm.slane %v1617_v1, %v7063_v17  ;;  %v12422_v43 = vld [vmem:[#allocation29_spill] sm:$0xff]  ;;  %v8225_v51 = vpop.permute.xlu2 %6109 }
 0x214   : > { %v1951_v18 = vsel %vm297_vm0, %v1950_v22, %v12420_v29  ;;  %v2007_v54 = vsel %vm297_vm0, %v2006_v9, %v12421_v58  ;;  %v8181_v29 = vperm.slane %v1561_v27, %v7063_v17  ;;  %v8187_v35 = vperm.slane %v1571_v52, %v7063_v17  ;;  %v12423_v27 = vld [vmem:[#allocation20_spill] sm:$0xff]  ;;  %12427 = vst [vmem:[#allocation29_spill] sm:$0xff] %v8225_v51 }
 0x215   : > { %v8190_v15 = vperm.slane %v1627_v37, %v7063_v17  ;;  %v1964_v9 = vrot.slane %v8139_v46, 4  ;;  %v2020_v22 = vrot.slane %v8136_v0, 4  ;;  %v2144_v59 = vrot.slane %v7656_v26, 4 }
 0x216   : > { %v8196_v40 = vperm.slane %v1951_v18, %v7056_v8  ;;  %v1974_v3 = vrot.slane %v7849_v38, 4  ;;  %v8200_v21 = vperm.slane %v2007_v54, %v7056_v8  ;;  %v2030_v52 = vrot.slane %v12422_v43, 4  ;;  %v12424_v18 = vld [vmem:[#allocation25_spill] sm:$0xff] }
 0x217   : > { %v2213_v37 = vsel %vm297_vm0, %v2212_v56, %v12423_v27  ;;  %v6223_v1 = vpack.i.bf16 %v8178_v33, %v8175_v28  ;;  %v6233_v58 = vpack.i.bf16 %v8184_v62, %v8181_v29  ;;  %v6238_v26 = vpack.i.bf16 %v8190_v15, %v8187_v35 }
 0x218   : > { %v1975_v38 = vsel %vm297_vm0, %v1974_v3, %v12424_v18  ;;  %v2226_v54 = vrot.slane %v8172_v25, 4  ;;  %v1965_v43 = vsel %vm297_vm0, %v8196_v40, %v1964_v9  ;;  %v2021_v56 = vsel %vm297_vm0, %v8200_v21, %v2020_v22  ;;  %v12428_v3 = vld [vmem:[#allocation18_spill] sm:$0xff] }
 0x219   : > { %6224 = vrot.lane.b32.xlu2 %v6223_v1, %s6905_s23  ;;  %v2031_v34 = vsel %vm297_vm0, %v2030_v52, %v12425_v5  ;;  %v8222_v13 = vperm.slane %v2213_v37, %v7056_v8  ;;  %v2156_v49 = vrot.slane %v12426_v53, 4  ;;  %v2145_v9 = vsel %vm297_vm0, %v2144_v59, %v12428_v3  ;;  %v12429_v22 = vld [vmem:[#allocation26_spill] sm:$0xff]  ;;  %v12430_v5 = vld [vmem:[#allocation28_spill] sm:$0xff]  ;;  %v12431_v3 = vld [vmem:[#allocation19_spill] sm:$0xff] }
 0x21a   : > { %6234 = vrot.lane.b32.xlu1 %v6233_v58, %s6905_s23  ;;  %6239 = vrot.lane.b32.xlu0 %v6238_v26, %s6904_s29  ;;  %v8232_v1 = vperm.slane %v1975_v38, %v7063_v17  ;;  %v1588_v18 = vrot.slane %v12429_v22, 4  ;;  %v1644_v52 = vrot.slane %v12430_v5, 4  ;;  %v8237_v37 = vperm.slane %v1965_v43, %v7063_v17 }
 0x21b   : > { %v8240_v53 = vperm.slane %v2021_v56, %v7063_v17  ;;  %v8243_v58 = vperm.slane %v2031_v34, %v7063_v17  ;;  %v2227_v26 = vsel %vm297_vm0, %v8222_v13, %v2226_v54  ;;  %v2157_v22 = vsel %vm297_vm0, %v2156_v49, %v12431_v3 }
 0x21c   : > { %v1589_v59 = vsel %vm297_vm0, 0.0, %v1588_v18  ;;  %v1645_v38 = vsel %vm297_vm0, 0.0, %v1644_v52  ;;  %v8252_v43 = vperm.slane %v2145_v9, %v7056_v8  ;;  %v2214_v56 = vrot.slane %v12423_v27, 4 }
 0x21d   : > { %v6268_v5 = vpack.i.bf16 %v1645_v38, %v1589_v59  ;;  %v8256_v51 = vperm.slane %v2227_v26, %v7063_v17  ;;  %v6243_v34 = vpack.i.bf16 %v8240_v53, %v8237_v37  ;;  %v6248_v54 = vpack.i.bf16 %v8243_v58, %v8232_v1 }
 0x21e   : > { %v772_v18 = vrot.slane %v7957_v42, 4  ;;  %v828_v52 = vrot.slane %v7971_v50, 4  ;;  %v8265_v49 = vperm.slane %v2157_v22, %v7056_v8  ;;  %v2180_v9 = vrot.slane %v7938_v12, 4  ;;  %v8275_v42 = vpop.permute.xlu2 %6124 }
 0x21f   : > { %v2215_v27 = vsel %vm297_vm0, %v7952_v45, %v2214_v56  ;;  %v2170_v26 = vrot.slane %v8252_v43, 4  ;;  %v2202_v12 = vrot.slane %v7584_v63, 4  ;;  %v976_v63 = vrot.slane %v8029_v55, 4 }
 0x220   : > { %v773_v50 = vsel %vm297_vm0, 0.0, %v772_v18  ;;  %v829_v59 = vsel %vm297_vm0, 0.0, %v828_v52  ;;  %v8281_v38 = vperm.slane %v2215_v27, %v7056_v8  ;;  %v2181_v3 = vsel %vm297_vm0, %v2180_v9, %v7799_v14 }
 0x221   : > { %2289 = vrot.lane.b32.xlu2 %v8256_v51, %s6905_s23  ;;  %v2171_v45 = vsel %vm297_vm0, %v8265_v49, %v2170_v26  ;;  %v2203_v22 = vsel %vm297_vm0, %v7739_v19, %v2202_v12  ;;  %v6253_v56 = vpack.i.bf16 %v829_v59, %v773_v50  ;;  %v1032_v18 = vrot.slane %v8032_v61, 4 }
 0x222   : > { %6244 = vrot.lane.b32.xlu1 %v6243_v34, %s6905_s23  ;;  %6249 = vrot.lane.b32.xlu0 %v6248_v54, %s6904_s29  ;;  %v8290_v34 = vperm.slane %v2171_v45, %v7063_v17  ;;  %v8293_v54 = vperm.slane %v2181_v3, %v7063_v17  ;;  %v2236_v52 = vrot.slane %v8281_v38, 4  ;;  %v8304_v19 = vperm.slane %v2203_v22, %v7056_v8  ;;  %v8316_v45 = vpop.permute.xlu0 %6084  ;;  %v8318_v3 = vpop.permute.xlu1 %6079  ;;  %v12462_v8 = vld [vmem:[#allocation35_spill] sm:$0xff] }
 0x223   : > { %v977_v14 = vsel %vm297_vm0, 0.0, %v976_v63  ;;  %v1033_v9 = vsel %vm297_vm0, 0.0, %v1032_v18  ;;  %v798_v27 = vrot.slane %v8041_v39, 4  ;;  %v978_v50 = vrot.slane %v7974_v7, 4  ;;  %v12432_v39 = vld [vmem:[#allocation30_spill] sm:$0xff]  ;;  %v12433_v7 = vld [vmem:[#allocation32_spill] sm:$0xff] }
 0x224   : > { %v2237_v55 = vsel %vm297_vm0, %v2236_v52, %v8304_v19  ;;  %v6293_v26 = vpack.i.bf16 %v1033_v9, %v977_v14  ;;  %v1034_v59 = vrot.slane %v7977_v16, 4  ;;  %v742_v12 = vrot.slane %v8044_v41, 4 }
 0x225   : > { %v8321_v22 = vperm.slane %v2237_v55, %v7063_v17  ;;  %v1436_v63 = vrot.slane %v8112_v11, 4  ;;  %v1992_v18 = vrot.slane %v12432_v39, 4  ;;  %v2048_v52 = vrot.slane %v12433_v7, 4 }
 0x226   : > { %v8310_v61 = vpop.permute.xlu2 %6134  ;;  %v1558_v16 = vrot.slane %v7876_v60, 4  ;;  %v979_v41 = vsel %vm297_vm0, 0.0, %v978_v50  ;;  %v1035_v14 = vsel %vm297_vm0, 0.0, %v1034_v59  ;;  %v8338_v9 = vsel %vm297_vm0, %v742_v12, %v7926_v48 }
 0x227   : > { %v1437_v11 = vsel %vm297_vm0, 0.0, %v1436_v63  ;;  %v8342_v55 = vsel %vm297_vm0, %v798_v27, %v7930_v36  ;;  %v2049_v60 = vsel %vm297_vm0, 0.0, %v2048_v52  ;;  %v6258_v59 = vpack.i.bf16 %v1035_v14, %v979_v41 }
 0x228   : > { %v8349_v50 = vsel %vm297_vm0, %v1558_v16, %v8047_v6  ;;  %v1382_v63 = vrot.slane %v8019_v10, 4  ;;  %v1584_v36 = vrot.slane %v8181_v29, 4  ;;  %v1640_v27 = vrot.slane %v8184_v62, 4 }
 0x229   : > { %6254 = vrot.lane.b32.xlu2 %v6253_v56, %s6901_s15  ;;  %v1380_v56 = vrot.slane %v8109_v23, 4  ;;  %v2224_v6 = vrot.slane %v8222_v13, 4  ;;  %v1438_v10 = vrot.slane %v8022_v4, 4  ;;  %v2198_v62 = vrot.slane %v7980_v20, 4 }
 0x22a   : > { %2261 = vrot.lane.b32.xlu1 %v8290_v34, %s6905_s23  ;;  %2269 = vrot.lane.b32.xlu0 %v8293_v54, %s6904_s29  ;;  %v8365_v7 = vpop.permute.xlu0 %6094  ;;  %v8367_v52 = vpop.permute.xlu1 %6089  ;;  %v1383_v13 = vsel %vm297_vm0, 0.0, %v1382_v63  ;;  %v1585_v4 = vsel %vm297_vm0, 0.0, %v1584_v36  ;;  %v1586_v36 = vrot.slane %v8187_v35, 4 }
 0x22b   : > { %v1381_v23 = vsel %vm297_vm0, 0.0, %v1380_v56  ;;  %v2199_v14 = vsel %vm297_vm0, 0.0, %v2198_v62 }
 0x22c   : > { %v6303_v56 = vpack.i.bf16 %v1437_v11, %v1381_v23  ;;  %v1988_v23 = vrot.slane %v8237_v37, 4  ;;  %v2044_v11 = vrot.slane %v8240_v53, 4 }
 0x22e   : > { %v8352_v48 = vpop.permute.xlu2 %6159  ;;  %v1989_v53 = vsel %vm297_vm0, 0.0, %v1988_v23 }
 0x231   : > { %6294 = vrot.lane.b32.xlu2 %v6293_v26, %s6900_s13  ;;  %v1614_v26 = vrot.slane %v8122_v57, 4  ;;  %v1962_v57 = vrot.slane %v8196_v40, 4  ;;  %v1641_v40 = vsel %vm297_vm0, 0.0, %v1640_v27  ;;  %v1642_v27 = vrot.slane %v8190_v15, 4 }
 0x232   : > { %2297 = vrot.lane.b32.xlu1 %v8321_v22, %s6904_s29  ;;  %6269 = vrot.lane.b32.xlu0 %v6268_v5, %s6901_s15  ;;  %v1993_v5 = vsel %vm297_vm0, 0.0, %v1992_v18  ;;  %v2168_v18 = vrot.slane %v8265_v49, 4  ;;  %v1439_v49 = vsel %vm297_vm0, 0.0, %v1438_v10  ;;  %v6308_v41 = vpack.i.bf16 %v1641_v40, %v1585_v4  ;;  %v8407_v37 = vpop.permute.xlu1 %6114 }
 0x233   : > { %v6273_v12 = vpack.i.bf16 %v2049_v60, %v1993_v5  ;;  %v8358_v39 = vsel %vm297_vm0, %v1614_v26, %v7983_v32  ;;  %v2018_v32 = vrot.slane %v8200_v21, 4  ;;  %v8374_v29 = vsel %vm297_vm0, %v1962_v57, %v8139_v46  ;;  %v8405_v26 = vpop.permute.xlu0 %6099 }
 0x234   : > { %v8387_v21 = vsel %vm297_vm0, %v2224_v6, %v8172_v25  ;;  %v8391_v46 = vsel %vm297_vm0, %v2168_v18, %v8252_v43  ;;  %v6263_v20 = vpack.i.bf16 %v1439_v49, %v1383_v13  ;;  %v824_v5 = vrot.slane %v8118_v2, 4 }
 0x235   : > { %v8383_v16 = vsel %vm297_vm0, %v2018_v32, %v8136_v0  ;;  %v768_v0 = vrot.slane %v8115_v44, 4  ;;  %v770_v25 = vrot.slane %v8035_v30, 4  ;;  %v826_v60 = vrot.slane %v8038_v31, 4 }
 0x236   : > { %v8401_v43 = vpop.permute.xlu2 %6169  ;;  %v2045_v44 = vsel %vm297_vm0, 0.0, %v2044_v11  ;;  %v825_v30 = vsel %vm297_vm0, 0.0, %v824_v5  ;;  %v974_v57 = vrot.slane %v8103_v24, 4  ;;  %v1030_v6 = vrot.slane %v8106_v47, 4 }
 0x237   : > { %v769_v2 = vsel %vm297_vm0, 0.0, %v768_v0  ;;  %v771_v31 = vsel %vm297_vm0, 0.0, %v770_v25  ;;  %v2194_v10 = vrot.slane %v8290_v34, 4  ;;  %v1587_v32 = vsel %vm297_vm0, 0.0, %v1586_v36 }
 0x238   : > { %v6278_v63 = vpack.i.bf16 %v825_v30, %v769_v2  ;;  %v1643_v13 = vsel %vm297_vm0, 0.0, %v1642_v27  ;;  %v975_v35 = vsel %vm297_vm0, 0.0, %v974_v57  ;;  %v1031_v15 = vsel %vm297_vm0, 0.0, %v1030_v6 }
 0x239   : > { %6304 = vrot.lane.b32.xlu2 %v6303_v56, %s6900_s13  ;;  %v6318_v56 = vpack.i.bf16 %v2045_v44, %v1989_v53  ;;  %v1990_v47 = vrot.slane %v8232_v1, 4  ;;  %v2046_v4 = vrot.slane %v8243_v58, 4  ;;  %v1378_v40 = vrot.slane %v8175_v28, 4 }
 0x23a   : > { %6259 = vrot.lane.b32.xlu1 %v6258_v59, %s6901_s15  ;;  %6274 = vrot.lane.b32.xlu0 %v6273_v12, %s6901_s15  ;;  %v827_v59 = vsel %vm297_vm0, 0.0, %v826_v60  ;;  %v8431_v24 = vpop.permute.xlu1 %6129  ;;  %v6313_v49 = vpack.i.bf16 %v1643_v13, %v1587_v32  ;;  %v6288_v34 = vpack.i.bf16 %v1031_v15, %v975_v35  ;;  %v8451_v5 = vperm.slane %v8338_v9, %v7063_v17  ;;  %v12435_v60 = vld [vmem:[#allocation34_spill] sm:$0xff]  ;;  %v12436_v9 = vld [vmem:[#allocation21_spill] sm:$0xff]  ;;  %v12442_v13 = vld [vmem:[#allocation36_spill] sm:$0xff] }
 0x23b   : > { %v6283_v12 = vpack.i.bf16 %v827_v59, %v771_v31  ;;  %v8429_v62 = vpop.permute.xlu0 %6119  ;;  %v1991_v1 = vsel %vm297_vm0, 0.0, %v1990_v47  ;;  %v2047_v28 = vsel %vm297_vm0, 0.0, %v2046_v4  ;;  %v1379_v58 = vsel %vm297_vm0, 0.0, %v1378_v40  ;;  %v12444_v40 = vld [vmem:[#allocation37_spill] sm:$0xff] }
 0x23c   : > { %v8455_v25 = vperm.slane %v8342_v55, %v7063_v17  ;;  %v1004_v53 = vrot.slane %v12435_v60, 4  ;;  %v6323_v44 = vpack.i.bf16 %v2047_v28, %v1991_v1  ;;  %v12437_v55 = vld [vmem:[#allocation22_spill] sm:$0xff]  ;;  %v8484_v32 = vperm.slane %v8349_v50, %v7063_v17 }
 0x23d   : > { %v1352_v35 = vrot.slane %v12442_v13, 4  ;;  %v2196_v15 = vrot.slane %v8293_v54, 4  ;;  %v2250_v47 = vrot.slane %v8256_v51, 4  ;;  %v8491_v4 = vperm.slane %v8358_v39, %v7063_v17  ;;  %v12445_v54 = vld [vmem:[#allocation23_spill] sm:$0xff] }
 0x23e   : > { %12441 = vst [vmem:[#allocation31_spill] sm:$0xff] %v8484_v32  ;;  %v1582_v50 = vrot.slane %v8484_v32, 4 }
 0x23f   : > { %12443 = vst [vmem:[#allocation18_spill] sm:$0xff] %v8491_v4  ;;  %v1638_v51 = vrot.slane %v8491_v4, 4  ;;  %v1353_v39 = vsel %vm297_vm0, %v1352_v35, %v12445_v54 }
 0x241   : > { %6309 = vrot.lane.b32.xlu2 %v6308_v41, %s6902_s16  ;;  %v2195_v41 = vsel %vm297_vm0, 0.0, %v2194_v10 }
 0x242   : > { %6264 = vrot.lane.b32.xlu1 %v6263_v20, %s6901_s15  ;;  %2281 = vrot.lane.b32.xlu0 %v2199_v14, %s6901_s15  ;;  %v1434_v20 = vrot.slane %v8178_v33, 4  ;;  %v12434_v14 = vld [vmem:[#allocation33_spill] sm:$0xff]  ;;  %v2252_v33 = vrot.slane %v8321_v22, 4  ;;  %v8460_v31 = vpop.permute.xlu1 %6139  ;;  %v766_v22 = vrot.slane %v8451_v5, 4 }
 0x243   : > { %v948_v23 = vrot.slane %v12434_v14, 4  ;;  %v8458_v30 = vpop.permute.xlu0 %6149  ;;  %v2197_v14 = vsel %vm297_vm0, 0.0, %v2196_v15 }
 0x244   : > { %v8422_v18 = vpop.permute.xlu2 %6194  ;;  %v1435_v0 = vsel %vm297_vm0, 0.0, %v1434_v20  ;;  %v2253_v59 = vsel %vm297_vm0, 0.0, %v2252_v33  ;;  %v767_v57 = vsel %vm297_vm0, 0.0, %v766_v22 }
 0x245   : > { %v6298_v2 = vpack.i.bf16 %v1435_v0, %v1379_v58  ;;  %v12446_v58 = vld [vmem:[#allocation24_spill] sm:$0xff] }
 0x249   : > { %6319 = vrot.lane.b32.xlu2 %v6318_v56, %s6902_s16  ;;  %v822_v56 = vrot.slane %v8455_v25, 4 }
 0x24a   : > { %6279 = vrot.lane.b32.xlu1 %v6278_v63, %s6902_s16  ;;  %6284 = vrot.lane.b32.xlu0 %v6283_v12, %s6900_s13  ;;  %v949_v63 = vsel %vm297_vm0, %v948_v23, %v12436_v9  ;;  %v1005_v12 = vsel %vm297_vm0, %v1004_v53, %v12437_v55  ;;  %v2251_v23 = vsel %vm297_vm0, 0.0, %v2250_v47  ;;  %v8505_v28 = vpop.permute.xlu1 %6144  ;;  %v8529_v9 = vperm.slane %v8383_v16, %v7063_v17 }
 0x24b   : > { %v8475_v27 = vperm.slane %v949_v63, %v7063_v17  ;;  %v823_v6 = vsel %vm297_vm0, 0.0, %v822_v56  ;;  %v8480_v10 = vperm.slane %v1005_v12, %v7063_v17  ;;  %v8503_v1 = vpop.permute.xlu0 %6154  ;;  %v8525_v56 = vperm.slane %v8374_v29, %v7063_v17 }
 0x24c   : > { %12450 = vst [vmem:[#allocation30_spill] sm:$0xff] %v8529_v9  ;;  %v2042_v13 = vrot.slane %v8529_v9, 4  ;;  %v6147_v4 = vunpack.i.h.bf16 %v8505_v28 }
 0x24d   : > { %12439 = vst [vmem:[#allocation25_spill] sm:$0xff] %v8475_v27  ;;  %v1028_v20 = vrot.slane %v8480_v10, 4 }
 0x24e   : > { %v8442_v11 = vpop.permute.xlu2 %6199  ;;  %12440 = vst [vmem:[#allocation27_spill] sm:$0xff] %v8480_v10 }
 0x24f   : > { %v1029_v53 = vsel %vm297_vm0, 0.0, %v1028_v20  ;;  %12449 = vst [vmem:[#allocation19_spill] sm:$0xff] %v8525_v56  ;;  %v8549_v20 = vperm.slane %v8387_v21, %v7063_v17 }
 0x251   : > { %2265 = vrot.lane.b32.xlu2 %v2195_v41, %s6902_s16  ;;  %v972_v41 = vrot.slane %v8475_v27, 4  ;;  %12451 = vst [vmem:[#allocation32_spill] sm:$0xff] %v8549_v20  ;;  %v12468_v27 = vld [vmem:[#allocation15_spill] sm:$0xff] }
 0x252   : > { %6314 = vrot.lane.b32.xlu1 %v6313_v49, %s6900_s13  ;;  %6289 = vrot.lane.b32.xlu0 %v6288_v34, %s6902_s16  ;;  %v1408_v49 = vrot.slane %v12444_v40, 4  ;;  %v6328_v34 = vpack.i.bf16 %v823_v6, %v767_v57  ;;  %v1986_v6 = vrot.slane %v8525_v56, 4  ;;  %v8539_v35 = vpop.permute.xlu1 %6174  ;;  %v6146_v56 = vunpack.i.l.bf16 %v8505_v28 }
 0x253   : > { %v973_v60 = vsel %vm297_vm0, 0.0, %v972_v41  ;;  %v8541_v16 = vpop.permute.xlu0 %6164  ;;  %v6091_v28 = vunpack.i.l.bf16 %v8367_v52 }
 0x254   : > { %v1409_v0 = vsel %vm297_vm0, %v1408_v49, %v12446_v58  ;;  %v6333_v63 = vpack.i.bf16 %v1029_v53, %v973_v60  ;;  %v1987_v40 = vsel %vm297_vm0, 0.0, %v1986_v6  ;;  %v2043_v49 = vsel %vm297_vm0, 0.0, %v2042_v13 }
 0x255   : > { %v8521_v22 = vperm.slane %v1409_v0, %v7063_v17  ;;  %v6348_v41 = vpack.i.bf16 %v2043_v49, %v1987_v40 }
 0x257   : > { %12448 = vst [vmem:[#allocation28_spill] sm:$0xff] %v8521_v22  ;;  %v1432_v57 = vrot.slane %v8521_v22, 4 }
 0x258   : > { %v8472_v36 = vpop.permute.xlu2 %2277 }
 0x259   : > { %2301 = vrot.lane.b32.xlu2 %v2253_v59, %s6900_s13  ;;  %12438 = vst [vmem:[#allocation20_spill] sm:$0xff] %v8472_v36  ;;  %v1639_v59 = vsel %vm297_vm0, 0.0, %v1638_v51  ;;  %v1433_v47 = vsel %vm297_vm0, 0.0, %v1432_v57  ;;  %v6101_v36 = vunpack.i.l.bf16 %v8405_v26 }
 0x25a   : > { %6324 = vrot.lane.b32.xlu1 %v6323_v44, %s6900_s13  ;;  %6299 = vrot.lane.b32.xlu0 %v6298_v2, %s6902_s16  ;;  %v1583_v44 = vsel %vm297_vm0, 0.0, %v1582_v50  ;;  %v8517_v2 = vperm.slane %v1353_v39, %v7063_v17  ;;  %v8553_v50 = vperm.slane %v8391_v46, %v7063_v17  ;;  %v2248_v39 = vrot.slane %v8549_v20, 4  ;;  %v12464_v20 = vld [vmem:[#allocation16_spill] sm:$0xff] }
 0x25b   : > { %v6343_v55 = vpack.i.bf16 %v1639_v59, %v1583_v44 }
 0x25c   : > { %12447 = vst [vmem:[#allocation26_spill] sm:$0xff] %v8517_v2  ;;  %v1376_v12 = vrot.slane %v8517_v2, 4  ;;  %v2192_v21 = vrot.slane %v8553_v50, 4  ;;  %v2249_v58 = vsel %vm297_vm0, 0.0, %v2248_v39  ;;  %v6166_v2 = vunpack.i.l.bf16 %v8541_v16 }
 0x25d   : > { %12452 = vst [vmem:[#allocation33_spill] sm:$0xff] %v8553_v50 }
 0x25e   : > { %v1377_v15 = vsel %vm297_vm0, 0.0, %v1376_v12 }
 0x261   : > { %6329 = vrot.lane.b32.xlu2 %v6328_v34, %s6906_s25  ;;  %v8511_v33 = vpop.permute.xlu2 %6209  ;;  %v6338_v34 = vpack.i.bf16 %v1433_v47, %v1377_v15 }
 0x262   : > { %2273 = vrot.lane.b32.xlu1 %v2197_v14, %s6900_s13  ;;  %2293 = vrot.lane.b32.xlu0 %v2251_v23, %s6902_s16  ;;  %v2238_v14 = vrot.slane %v8304_v19, 4  ;;  %v2193_v19 = vsel %vm297_vm0, 0.0, %v2192_v21 }
 0x264   : > { %v2239_v46 = vsel %vm297_vm0, %v8281_v38, %v2238_v14 }
 0x265   : > { %v2247_v0 = vperm.slane %v2239_v46, %v7063_v17  ;;  %v6172_v17 = vunpack.i.h.bf16 %v8401_v43 }
 0x267   : > { %v2254_v59 = vrot.slane %v2247_v0, 4 }
 0x26a   : > { %6334 = vrot.lane.b32.xlu1 %v6333_v63, %s6906_s25  ;;  %6344 = vrot.lane.b32.xlu0 %v6343_v55, %s6906_s25  ;;  %v2255_v63 = vsel %vm297_vm0, 0.0, %v2254_v59  ;;  %v6171_v59 = vunpack.i.l.bf16 %v8401_v43 }
 0x26b   : > { %v8537_v29 = vpop.permute.xlu2 %6214 }
 0x271   : > { %v8560_v51 = vpop.permute.xlu1 %6179 }
 0x272   : > { %6339 = vrot.lane.b32.xlu1 %v6338_v34, %s6906_s25  ;;  %6349 = vrot.lane.b32.xlu0 %v6348_v41, %s6906_s25  ;;  %v8562_v54 = vpop.permute.xlu0 %6184 }
 0x273   : > { %v8558_v23 = vpop.permute.xlu2 %6224 }
 0x27a   : > { %2285 = vrot.lane.b32.xlu1 %v2249_v58, %s6906_s25  ;;  %2257 = vrot.lane.b32.xlu0 %v2193_v19, %s6906_s25  ;;  %v8573_v60 = vpop.permute.xlu1 %6219  ;;  %v8575_v53 = vpop.permute.xlu0 %6189 }
 0x27b   : > { %v8577_v44 = vpop.permute.xlu2 %2289 }
 0x27c   : > { %12453 = vst [vmem:[#allocation34_spill] sm:$0xff] %v8577_v44  ;;  %v6176_v44 = vunpack.i.l.bf16 %v8539_v35 }
 0x282   : > { %2309 = vrot.lane.b32.xlu1 %v2255_v63, %s6901_s15  ;;  %2305 = vrot.lane.b32.xlu0 %v2247_v0, %s6903_s17 }
 0x283   : > { %v8586_v12 = vpop.permute.xlu2 %6254 }
 0x284   : > { %v8582_v38 = vpop.permute.xlu1 %6229  ;;  %v8584_v55 = vpop.permute.xlu0 %6204 }
 0x28b   : > { %v8592_v13 = vpop.permute.xlu2 %6294 }
 0x28c   : > { %v8588_v57 = vpop.permute.xlu1 %6234  ;;  %v8590_v6 = vpop.permute.xlu0 %6239 }
 0x293   : > { %v8598_v40 = vpop.permute.xlu2 %6304 }
 0x294   : > { %v8594_v15 = vpop.permute.xlu1 %6244  ;;  %v8596_v47 = vpop.permute.xlu0 %6249 }
 0x29b   : > { %v8608_v39 = vpop.permute.xlu2 %6309 }
 0x29c   : > { %v8600_v49 = vpop.permute.xlu1 %2261  ;;  %v8602_v34 = vpop.permute.xlu0 %2269 }
 0x29d   : > { %12454 = vst [vmem:[#allocation21_spill] sm:$0xff] %v8600_v49  ;;  %v6177_v49 = vunpack.i.h.bf16 %v8539_v35 }
 0x29e   : > { %12455 = vst [vmem:[#allocation22_spill] sm:$0xff] %v8602_v34 }
 0x29f   : > { %v1899_v43 = vsel %vm665_vm4, %v12468_v27, %v6177_v49  ;;  %v6157_v27 = vunpack.i.h.bf16 %v8503_v1 }
 0x2a3   : > { %v8614_v58 = vpop.permute.xlu2 %6319 }
 0x2a4   : > { %v8604_v41 = vpop.permute.xlu1 %2297  ;;  %v8606_v14 = vpop.permute.xlu0 %6269 }
 0x2a5   : > { %12456 = vst [vmem:[#allocation36_spill] sm:$0xff] %v8604_v41  ;;  %v12463_v41 = vld [vmem:[#allocation38_spill] sm:$0xff] }
 0x2a6   : > { %v6107_v34 = vunpack.i.h.bf16 %v12463_v41  ;;  %v6106_v50 = vunpack.i.l.bf16 %v12463_v41  ;;  %v12466_v41 = vld [vmem:[#allocation29_spill] sm:$0xff] }
 0x2a7   : > { %v6112_v22 = vunpack.i.h.bf16 %v12466_v41 }
 0x2ab   : > { %v8621_v63 = vpop.permute.xlu2 %2265 }
 0x2ac   : > { %v8610_v21 = vpop.permute.xlu1 %6259  ;;  %v8612_v46 = vpop.permute.xlu0 %6274  ;;  %12461 = vst [vmem:[#allocation40_spill] sm:$0xff] %v8621_v63 }
 0x2ad   : > { %12457 = vst [vmem:[#allocation37_spill] sm:$0xff] %v8610_v21  ;;  %v6082_v21 = vunpack.i.h.bf16 %v8318_v3 }
 0x2ae   : > { %12458 = vst [vmem:[#allocation23_spill] sm:$0xff] %v8612_v46  ;;  %v6102_v46 = vunpack.i.h.bf16 %v8405_v26  ;;  %v1900_v26 = vsel %vm667_vm5, %v1899_v43, %v6112_v22 }
 0x2af   : > { %v1901_v43 = vsel %vm669_vm6, %v1900_v26, %v6157_v27 }
 0x2b4   : > { %v8616_v19 = vpop.permute.xlu1 %6264  ;;  %v8618_v0 = vpop.permute.xlu0 %2281 }
 0x2b5   : > { %12459 = vst [vmem:[#allocation24_spill] sm:$0xff] %v8616_v19 }
 0x2b6   : > { %12460 = vst [vmem:[#allocation39_spill] sm:$0xff] %v8618_v0  ;;  %v1282_v0 = vsel %vm665_vm4, %v12464_v20, %v6171_v59  ;;  %v6111_v20 = vunpack.i.l.bf16 %v12466_v41  ;;  %v12467_v59 = vld [vmem:[#allocation17_spill] sm:$0xff]  ;;  %v6167_v41 = vunpack.i.h.bf16 %v8541_v16 }
 0x2b7   : > { %v1289_v10 = vsel %vm665_vm4, %v12467_v59, %v6172_v17  ;;  %v1283_v32 = vsel %vm667_vm5, %v1282_v0, %v6101_v36  ;;  %v6081_v17 = vunpack.i.l.bf16 %v8318_v3  ;;  %v12470_v36 = vld [vmem:[#allocation12_spill] sm:$0xff]  ;;  %v8665_v3 = vpop.permute.xlu2 %2301  ;;  %v12471_v59 = vld [vmem:[#allocation13_spill] sm:$0xff] }
 0x2b8   : > { %v1284_v35 = vsel %vm669_vm6, %v1283_v32, %v6146_v56  ;;  %v666_v0 = vsel %vm665_vm4, %v12470_v36, %v6166_v2  ;;  %v6156_v32 = vunpack.i.l.bf16 %v8503_v1  ;;  %v6151_v2 = vunpack.i.l.bf16 %v8458_v30 }
 0x2b9   : > { %v1285_v56 = vsel %vm671_vm7, %v1284_v35, %v6106_v50  ;;  %v668_v22 = vsel %vm667_vm5, %v666_v0, %v6091_v28  ;;  %v6117_v1 = vunpack.i.h.bf16 %v8407_v37  ;;  %v6152_v28 = vunpack.i.h.bf16 %v8458_v30 }
 0x2ba   : > { %v6127_v30 = vunpack.i.h.bf16 %v8275_v42 }
 0x2bc   : > { %v8632_v9 = vpop.permute.xlu1 %6279  ;;  %v8634_v63 = vpop.permute.xlu0 %6284 }
 0x2bd   : > { %12465 = vst [vmem:[#allocation35_spill] sm:$0xff] %v8634_v63  ;;  %v12469_v63 = vld [vmem:[#allocation14_spill] sm:$0xff] }
 0x2be   : > { %v1892_v19 = vsel %vm665_vm4, %v12469_v63, %v6176_v44  ;;  %v1290_v44 = vsel %vm667_vm5, %v1289_v10, %v6102_v46  ;;  %v6092_v63 = vunpack.i.h.bf16 %v8367_v52  ;;  %v679_v10 = vsel %vm665_vm4, %v12471_v59, %v6167_v41 }
 0x2bf   : > { %v1893_v49 = vsel %vm667_vm5, %v1892_v19, %v6111_v20  ;;  %v1291_v16 = vsel %vm669_vm6, %v1290_v44, %v6147_v4  ;;  %v6136_v4 = vunpack.i.l.bf16 %v8310_v61  ;;  %v6116_v52 = vunpack.i.l.bf16 %v8407_v37 }
 0x2c0   : > { %v1894_v50 = vsel %vm669_vm6, %v1893_v49, %v6156_v32  ;;  %v1292_v35 = vsel %vm671_vm7, %v1291_v16, %v6107_v34  ;;  %v1286_v20 = vsel %vm673_vm8, %v1285_v56, %v6151_v2  ;;  %v6096_v41 = vunpack.i.l.bf16 %v8365_v7 }
 0x2c1   : > { %v680_v36 = vsel %vm667_vm5, %v679_v10, %v6092_v63  ;;  %v670_v0 = vsel %vm669_vm6, %v668_v22, %v6136_v4  ;;  %v6137_v44 = vunpack.i.h.bf16 %v8310_v61  ;;  %v6162_v49 = vunpack.i.h.bf16 %v8352_v48 }
 0x2c2   : > { %v1895_v27 = vsel %vm671_vm7, %v1894_v50, %v6116_v52  ;;  %v1902_v37 = vsel %vm671_vm7, %v1901_v43, %v6117_v1  ;;  %v6161_v34 = vunpack.i.l.bf16 %v8352_v48  ;;  %v1287_v26 = vsel %vm675_vm9, %v1286_v20, %v6081_v17 }
 0x2c3   : > { %v1293_v32 = vsel %vm673_vm8, %v1292_v35, %v6152_v28  ;;  %v6126_v56 = vunpack.i.l.bf16 %v8275_v42  ;;  %v672_v16 = vsel %vm671_vm7, %v670_v0, %v6096_v41  ;;  %v681_v61 = vsel %vm669_vm6, %v680_v36, %v6137_v44  ;;  %v6330_v41 = vpop.permute.xlu2 %6329 }
 0x2c4   : > { %v8672_v46 = vpop.permute.xlu1 %6314  ;;  %v8674_v19 = vpop.permute.xlu0 %6289  ;;  %v6097_v63 = vunpack.i.h.bf16 %v8365_v7  ;;  %v6141_v2 = vunpack.i.l.bf16 %v8460_v31  ;;  %v1896_v59 = vsel %vm673_vm8, %v1895_v27, %v6161_v34  ;;  %v1903_v48 = vsel %vm673_vm8, %v1902_v37, %v6162_v49 }
 0x2c5   : > { %v6132_v10 = vunpack.i.h.bf16 %v8431_v24  ;;  %v8709_v42 = vsel %vm677_vm10, %v1287_v26, %v6126_v56  ;;  %v1294_v4 = vsel %vm675_vm9, %v1293_v32, %v6082_v21  ;;  %v6131_v7 = vunpack.i.l.bf16 %v8431_v24 }
 0x2c6   : > { %v6142_v50 = vunpack.i.h.bf16 %v8460_v31  ;;  %v674_v43 = vsel %vm673_vm8, %v672_v16, %v6141_v2  ;;  %v682_v52 = vsel %vm671_vm7, %v681_v61, %v6097_v63  ;;  %v12472_v28 = vunpack.i.l.bf16 %v8316_v45 }
 0x2c7   : > { %v12473_v0 = vunpack.i.h.bf16 %v8316_v45  ;;  %v8728_v49 = vsel %vm677_vm10, %v1294_v4, %v6127_v30  ;;  %v6211_v37 = vunpack.i.l.bf16 %v8511_v33  ;;  %v12474_v34 = vunpack.i.l.bf16 %v12462_v8 }
 0x2c8   : > { %v1897_v36 = vsel %vm675_vm9, %v1896_v59, %v12472_v28  ;;  %v8738_v45 = vsel %vm673_vm8, %v682_v52, %v6142_v50  ;;  %v6331_v56 = vunpack.i.l.bf16 %v6330_v41  ;;  %v6216_v61 = vunpack.i.l.bf16 %v8537_v29  ;;  %v12480_v59 = vld [vmem:[#allocation31_spill] sm:$0xff] }
 0x2c9   : > { %v1904_v21 = vsel %vm675_vm9, %v1903_v48, %v12473_v0  ;;  %v8735_v26 = vsel %vm675_vm9, %v674_v43, %v12474_v34  ;;  %v8742_v16 = vsel %vm677_vm10, %v1897_v36, %v6131_v7  ;;  %v6181_v48 = vunpack.i.l.bf16 %v8560_v51  ;;  %v12475_v34 = vld [vmem:[#allocation37_spill] sm:$0xff] }
 0x2ca   : > { %v8745_v30 = vsel %vm677_vm10, %v1904_v21, %v6132_v10  ;;  %v886_v44 = vsel %vm665_vm4, %v8451_v5, %v6331_v56  ;;  %v6207_v4 = vunpack.i.h.bf16 %v8584_v55  ;;  %v6206_v63 = vunpack.i.l.bf16 %v8584_v55  ;;  %v12477_v21 = vld [vmem:[#allocation24_spill] sm:$0xff]  ;;  %v12479_v10 = vld [vmem:[#allocation25_spill] sm:$0xff] }
 0x2cb   : > { %v6237_v35 = vunpack.i.h.bf16 %v8588_v57  ;;  %v6236_v7 = vunpack.i.l.bf16 %v8588_v57  ;;  %v6332_v20 = vunpack.i.h.bf16 %v6330_v41  ;;  %v6281_v28 = vunpack.i.l.bf16 %v8632_v9  ;;  %v12476_v57 = vld [vmem:[#allocation23_spill] sm:$0xff] }
 0x2cc   : > { %v8704_v22 = vpop.permute.xlu1 %6324  ;;  %v8706_v1 = vpop.permute.xlu0 %6299  ;;  %v887_v56 = vsel %vm667_vm5, %v886_v44, %v6206_v63  ;;  %v6312_v41 = vunpack.i.h.bf16 %v8608_v39  ;;  %v6311_v31 = vunpack.i.l.bf16 %v8608_v39  ;;  %v6321_v44 = vunpack.i.l.bf16 %v8614_v58 }
 0x2cd   : > { %v893_v63 = vsel %vm665_vm4, %v8455_v25, %v6332_v20  ;;  %v888_v17 = vsel %vm669_vm6, %v887_v56, %v6281_v28  ;;  %v6282_v25 = vunpack.i.h.bf16 %v8632_v9  ;;  %v12478_v56 = vld [vmem:[#allocation35_spill] sm:$0xff]  ;;  %v12481_v9 = vld [vmem:[#allocation18_spill] sm:$0xff] }
 0x2ce   : > { %v894_v20 = vsel %vm667_vm5, %v893_v63, %v6207_v4  ;;  %v889_v28 = vsel %vm671_vm7, %v888_v17, %v6211_v37  ;;  %v6286_v50 = vunpack.i.l.bf16 %v12478_v56  ;;  %v6317_v37 = vunpack.i.h.bf16 %v8672_v46 }
 0x2cf   : > { %v895_v17 = vsel %vm669_vm6, %v894_v20, %v6282_v25  ;;  %v6302_v20 = vunpack.i.h.bf16 %v8706_v1 }
 0x2d4   : > { %v8759_v36 = vpop.permute.xlu1 %2273  ;;  %v8761_v0 = vpop.permute.xlu0 %2293 }
 0x2dc   : > { %v6335_v39 = vpop.permute.xlu1 %6334  ;;  %v6345_v2 = vpop.permute.xlu0 %6344 }
 0x2dd   : > { %v6336_v5 = vunpack.i.l.bf16 %v6335_v39  ;;  %v6347_v43 = vunpack.i.h.bf16 %v6345_v2  ;;  %v6346_v52 = vunpack.i.l.bf16 %v6345_v2  ;;  %v6337_v24 = vunpack.i.h.bf16 %v6335_v39 }
 0x2de   : > { %v6287_v2 = vunpack.i.h.bf16 %v12478_v56  ;;  %v6291_v39 = vunpack.i.l.bf16 %v8674_v19  ;;  %v12527_v56 = vunpack.i.h.bf16 %v8560_v51 }
 0x2df   : > { %v1092_v55 = vsel %vm665_vm4, %v12479_v10, %v6336_v5  ;;  %v1702_v27 = vsel %vm665_vm4, %v12480_v59, %v6346_v52  ;;  %v1709_v4 = vsel %vm665_vm4, %v12481_v9, %v6347_v43  ;;  %v890_v10 = vsel %vm673_vm8, %v889_v28, %v6286_v50 }
 0x2e0   : > { %v1093_v32 = vsel %vm667_vm5, %v1092_v55, %v6216_v61  ;;  %v1703_v63 = vsel %vm667_vm5, %v1702_v27, %v6236_v7  ;;  %v6316_v5 = vunpack.i.l.bf16 %v8672_v46  ;;  %v6292_v59 = vunpack.i.h.bf16 %v8674_v19  ;;  %v12482_v55 = vld [vmem:[#allocation27_spill] sm:$0xff] }
 0x2e1   : > { %v6327_v52 = vunpack.i.h.bf16 %v8704_v22  ;;  %v6326_v61 = vunpack.i.l.bf16 %v8704_v22  ;;  %v1099_v43 = vsel %vm665_vm4, %v12482_v55, %v6337_v24  ;;  %v1710_v27 = vsel %vm667_vm5, %v1709_v4, %v6237_v35 }
 0x2e2   : > { %v1704_v7 = vsel %vm669_vm6, %v1703_v63, %v6311_v31  ;;  %v1094_v25 = vsel %vm669_vm6, %v1093_v32, %v6291_v39  ;;  %v6301_v50 = vunpack.i.l.bf16 %v8706_v1  ;;  %v891_v19 = vsel %vm675_vm9, %v890_v10, %v6181_v48 }
 0x2e3   : > { %v12483_v22 = vunpack.i.h.bf16 %v8511_v33  ;;  %v12484_v32 = vunpack.i.h.bf16 %v8537_v29  ;;  %v1711_v1 = vsel %vm669_vm6, %v1710_v27, %v6312_v41  ;;  %v12485_v39 = vunpack.i.l.bf16 %v8590_v6 }
 0x2e4   : > { %v6340_v46 = vpop.permute.xlu1 %6339  ;;  %v6350_v28 = vpop.permute.xlu0 %6349  ;;  %v12486_v48 = vunpack.i.l.bf16 %v8573_v60  ;;  %v12491_v27 = vunpack.i.l.bf16 %v8558_v23 }
 0x2e5   : > { %v8834_v24 = vsel %vm671_vm7, %v895_v17, %v12483_v22  ;;  %v6342_v35 = vunpack.i.h.bf16 %v6340_v46  ;;  %v6341_v9 = vunpack.i.l.bf16 %v6340_v46  ;;  %v6352_v31 = vunpack.i.h.bf16 %v6350_v28  ;;  %v12487_v17 = vld [vmem:[#allocation28_spill] sm:$0xff]  ;;  %v12488_v46 = vld [vmem:[#allocation26_spill] sm:$0xff] }
 0x2e6   : > { %v6351_v4 = vunpack.i.l.bf16 %v6350_v28  ;;  %v1100_v63 = vsel %vm667_vm5, %v1099_v43, %v12484_v32  ;;  %v1705_v55 = vsel %vm671_vm7, %v1704_v7, %v12485_v39  ;;  %v1095_v33 = vsel %vm671_vm7, %v1094_v25, %v12486_v48  ;;  %v12489_v22 = vld [vmem:[#allocation30_spill] sm:$0xff]  ;;  %v12490_v43 = vld [vmem:[#allocation19_spill] sm:$0xff] }
 0x2e7   : > { %v1503_v10 = vsel %vm665_vm4, %v12487_v17, %v6342_v35  ;;  %v1496_v28 = vsel %vm665_vm4, %v12488_v46, %v6341_v9  ;;  %v2113_v29 = vsel %vm665_vm4, %v12489_v22, %v6352_v31  ;;  %v12492_v32 = vunpack.i.h.bf16 %v8558_v23 }
 0x2e8   : > { %v2106_v41 = vsel %vm665_vm4, %v12490_v43, %v6351_v4  ;;  %v1497_v7 = vsel %vm667_vm5, %v1496_v28, %v12491_v27  ;;  %v12493_v39 = vunpack.i.h.bf16 %v8594_v15  ;;  %v12494_v9 = vunpack.i.l.bf16 %v8594_v15 }
 0x2e9   : > { %v1504_v25 = vsel %vm667_vm5, %v1503_v10, %v12492_v32  ;;  %v1498_v31 = vsel %vm669_vm6, %v1497_v7, %v6301_v50  ;;  %v12495_v4 = vunpack.i.h.bf16 %v8614_v58  ;;  %v12496_v23 = vunpack.i.h.bf16 %v8590_v6 }
 0x2ea   : > { %v2114_v35 = vsel %vm667_vm5, %v2113_v29, %v12493_v39  ;;  %v2107_v48 = vsel %vm667_vm5, %v2106_v41, %v12494_v9  ;;  %v12497_v28 = vunpack.i.l.bf16 %v8596_v47  ;;  %v12498_v15 = vunpack.i.l.bf16 %v8582_v38 }
 0x2eb   : > { %v2115_v17 = vsel %vm669_vm6, %v2114_v35, %v12495_v4  ;;  %v2108_v46 = vsel %vm669_vm6, %v2107_v48, %v6321_v44  ;;  %v1712_v10 = vsel %vm671_vm7, %v1711_v1, %v12496_v23  ;;  %v12499_v50 = vunpack.i.h.bf16 %v8596_v47  ;;  %v12508_v23 = vld [vmem:[#allocation21_spill] sm:$0xff] }
 0x2ec   : > { %v2109_v22 = vsel %vm671_vm7, %v2108_v46, %v12497_v28  ;;  %v1499_v29 = vsel %vm671_vm7, %v1498_v31, %v12498_v15  ;;  %v12500_v43 = vunpack.i.l.bf16 %v8586_v12  ;;  %v1505_v6 = vsel %vm669_vm6, %v1504_v25, %v6302_v20  ;;  %v2286_v7 = vpop.permute.xlu1 %2285  ;;  %v2258_v32 = vpop.permute.xlu0 %2257  ;;  %v12504_v25 = vld [vmem:[#allocation32_spill] sm:$0xff] }
 0x2ed   : > { %v2116_v58 = vsel %vm671_vm7, %v2115_v17, %v12499_v50  ;;  %v2110_v1 = vsel %vm673_vm8, %v2109_v22, %v6326_v61  ;;  %v1706_v41 = vsel %vm673_vm8, %v1705_v55, %v6316_v5  ;;  %v12501_v47 = vunpack.i.l.bf16 %v8442_v11  ;;  %v12507_v17 = vld [vmem:[#allocation34_spill] sm:$0xff]  ;;  %v12511_v15 = vld [vmem:[#allocation40_spill] sm:$0xff] }
 0x2ee   : > { %v8886_v44 = vsel %vm677_vm10, %v891_v19, %v12500_v43  ;;  %v2117_v27 = vsel %vm673_vm8, %v2116_v58, %v6327_v52  ;;  %v12502_v35 = vunpack.i.l.bf16 %v8598_v40  ;;  %v12503_v9 = vunpack.i.l.bf16 %v8592_v13  ;;  %v12505_v52 = vld [vmem:[#allocation33_spill] sm:$0xff]  ;;  %v12514_v43 = vld [vmem:[#allocation22_spill] sm:$0xff] }
 0x2ef   : > { %v2111_v39 = vsel %vm675_vm9, %v2110_v1, %v12501_v47  ;;  %v1713_v61 = vsel %vm673_vm8, %v1712_v10, %v6317_v37  ;;  %v2319_v5 = vsel %vm665_vm4, %v12504_v25, %v2286_v7  ;;  %v2312_v55 = vsel %vm665_vm4, %v12505_v52, %v2258_v32 }
 0x2f0   : > { %v1500_v19 = vsel %vm673_vm8, %v1499_v29, %v12502_v35  ;;  %v1096_v20 = vsel %vm673_vm8, %v1095_v33, %v12503_v9  ;;  %v12506_v48 = vunpack.i.h.bf16 %v8442_v11  ;;  %v1101_v4 = vsel %vm669_vm6, %v1100_v63, %v6292_v59  ;;  %v12520_v9 = vld [vmem:[#allocation20_spill] sm:$0xff] }
 0x2f1   : > { %v2320_v46 = vsel %vm667_vm5, %v2319_v5, %v12507_v17  ;;  %v2313_v33 = vsel %vm667_vm5, %v2312_v55, %v12508_v23  ;;  %v12509_v37 = vunpack.i.l.bf16 %v12476_v57  ;;  %v12510_v28 = vunpack.i.h.bf16 %v8582_v38  ;;  %v2360_v23 = vld [vmem:[%s12177_s2] sm:$0x3f] }
 0x2f2   : > { %v2118_v31 = vsel %vm675_vm9, %v2117_v27, %v12506_v48  ;;  %v2321_v11 = vsel %vm669_vm6, %v2320_v46, %v8761_v0  ;;  %v2314_v59 = vsel %vm669_vm6, %v2313_v33, %v12511_v15  ;;  %v12512_v63 = vunpack.i.l.bf16 %v8575_v53  ;;  %v12524_v48 = vld [vmem:[#allocation39_spill] sm:$0xff] }
 0x2f3   : > { %v2112_v10 = vsel %vm677_vm10, %v2111_v39, %v12509_v37  ;;  %v1506_v22 = vsel %vm671_vm7, %v1505_v6, %v12510_v28  ;;  %v12513_v50 = vunpack.i.l.bf16 %v8422_v18  ;;  %v2315_v1 = vsel %vm671_vm7, %v2314_v59, %v12514_v43  ;;  %v12518_v39 = vld [vmem:[#allocation36_spill] sm:$0xff] }
 0x2f4   : > { %v1501_v29 = vsel %vm675_vm9, %v1500_v19, %v12512_v63  ;;  %v12515_v38 = vunpack.i.h.bf16 %v12476_v57  ;;  %v12516_v0 = vunpack.i.l.bf16 %v8562_v54  ;;  %v12517_v7 = vunpack.i.h.bf16 %v8573_v60  ;;  %v2306_v33 = vpop.permute.xlu0 %2305 }
 0x2f5   : > { %v1707_v58 = vsel %vm675_vm9, %v1706_v41, %v12513_v50  ;;  %v2316_v47 = vsel %vm673_vm8, %v2315_v1, %v8759_v36  ;;  %v2322_v41 = vsel %vm671_vm7, %v2321_v11, %v12518_v39  ;;  %v2346_v35 = vrot.slane %v2112_v10, 4 }
 0x2f6   : > { %v2119_v6 = vsel %vm677_vm10, %v2118_v31, %v12515_v38  ;;  %v1097_v27 = vsel %vm675_vm9, %v1096_v20, %v12516_v0  ;;  %v1102_v32 = vsel %vm671_vm7, %v1101_v4, %v12517_v7  ;;  %v12519_v19 = vunpack.i.h.bf16 %v8598_v40 }
 0x2f7   : > { %v2317_v25 = vsel %vm675_vm9, %v2316_v47, %v12520_v9  ;;  %v12521_v20 = vunpack.i.l.bf16 %v12477_v21  ;;  %v12522_v5 = vunpack.i.l.bf16 %v8606_v14  ;;  %v12523_v36 = vunpack.i.h.bf16 %v8422_v18  ;;  %v2310_v18 = vpop.permute.xlu1 %2309 }
 0x2f8   : > { %v1507_v57 = vsel %vm673_vm8, %v1506_v22, %v12519_v19  ;;  %v2318_v40 = vsel %vm677_vm10, %v2317_v25, %v12524_v48  ;;  %v2347_v31 = vrot.slane %v2119_v6, 4  ;;  %v12525_v4 = vunpack.i.h.bf16 %v8592_v13 }
 0x2f9   : > { %v1502_v60 = vsel %vm677_vm10, %v1501_v29, %v12521_v20  ;;  %v1708_v52 = vsel %vm677_vm10, %v1707_v58, %v12522_v5  ;;  %v1714_v55 = vsel %vm675_vm9, %v1713_v61, %v12523_v36  ;;  %v897_v46 = vsel %vm673_vm8, %v8834_v24, %v6287_v2  ;;  %5894 = vmatpush.msk.msra.mxu0 %vm2350_vm11, %v2318_v40 }
 0x2fa   : > { %v1103_v17 = vsel %vm673_vm8, %v1102_v32, %v12525_v4  ;;  %v2323_v61 = vsel %vm673_vm8, %v2322_v41, %v8665_v3  ;;  %v12526_v13 = vunpack.i.h.bf16 %v8575_v53  ;;  %v898_v10 = vsel %vm675_vm9, %v897_v46, %v12527_v56 }
 0x2fb   : > { %v2324_v2 = vsel %vm675_vm9, %v2323_v61, %v2306_v33  ;;  %v2357_v24 = vsel %vm2350_vm11, %v8742_v16, %v2346_v35  ;;  %v2340_v28 = vrot.slane %v1708_v52, 4  ;;  %v12528_v22 = vunpack.i.h.bf16 %v8606_v14 }
 0x2fc   : > { %v1508_v37 = vsel %vm675_vm9, %v1507_v57, %v12526_v13  ;;  %v6913_v3 = vmov 0   ;;  %v6262_v53 = vunpack.i.h.bf16 %v12475_v34  ;;  %2388 = vmatpush.msra.mxu0 %v2357_v24  ;;  %v2325_v51 = vsel %vm677_vm10, %v2324_v2, %v2310_v18 }
 0x2fd   : > { %v1715_v11 = vsel %vm677_vm10, %v1714_v55, %v12528_v22  ;;  %6353 = vset.pattern.permute.xlu2 %v6913_v3  ;;  %6784 = vset.pattern.permute.xlu0 %v6913_v3  ;;  %v12529_v15 = vunpack.i.l.bf16 %v12475_v34  ;;  %v12530_v63 = vunpack.i.h.bf16 %v8562_v54  ;;  %v2355_v14 = vsel %vm2350_vm11, %v1502_v60, %v2340_v28 }
 0x2fe   : > { %2363 = vperm.xlu2 %6353, %v2360_v23   ;;  %5896 = vmatpush.msk.msra.mxu1 %vm2350_vm11, %v2325_v51  ;;  %v12531_v29 = vunpack.i.h.bf16 %v12477_v21  ;;  %v2328_v58 = vrot.slane %v8886_v44, 4  ;;  %v12532_v43 = vunpack.i.h.bf16 %v8586_v12  ;;  %v6077_v1 = vunpack.i.h.bf16 %v12462_v8 }
 0x2ff   : > { %v1098_v59 = vsel %vm677_vm10, %v1097_v27, %v12529_v15  ;;  %v1104_v16 = vsel %vm675_vm9, %v1103_v17, %v12530_v63  ;;  %2389 = vmatpush.msra.mxu0 %v2355_v14  ;;  %v2358_v54 = vsel %vm2350_vm11, %v8745_v30, %v2347_v31  ;;  %v2341_v38 = vrot.slane %v1715_v11, 4  ;;  %v2359_v30 = vld [vmem:[%s12176_s1] sm:$0x3f] }
 0x300   : > { %v1509_v50 = vsel %vm677_vm10, %v1508_v37, %v12531_v29  ;;  %v899_v34 = vsel %vm677_vm10, %v898_v10, %v12532_v43  ;;  %2408 = vmatpush.msra.mxu1 %v2358_v54  ;;  %v12533_v6 = vrot.slane %v8709_v42, 4  ;;  %v12534_v0 = vunpack.i.l.bf16 %v8429_v62  ;;  %v12535_v29 = vld [vmem:[#allocation10_spill] sm:$0xff] }
 0x301   : > { %v1105_v12 = vsel %vm677_vm10, %v1104_v16, %v6262_v53  ;;  %v2335_v27 = vrot.slane %v8728_v49, 4  ;;  %v2356_v8 = vsel %vm2350_vm11, %v1509_v50, %v2341_v38  ;;  %v684_v42 = vsel %vm675_vm9, %v8738_v45, %v6077_v1 }
 0x302   : > { %v2353_v21 = vsel %vm2350_vm11, %v1098_v59, %v12533_v6  ;;  %v678_v44 = vsel %vm677_vm10, %v8735_v26, %v12534_v0  ;;  %v2329_v7 = vrot.slane %v899_v34, 4  ;;  %v6122_v32 = vunpack.i.h.bf16 %v8429_v62  ;;  %2409 = vmatpush.msra.mxu1 %v2356_v8 }
 0x303   : > { %2390 = vmatpush.msra.mxu0 %v2353_v21  ;;  %v2351_v26 = vsel %vm2350_vm11, %v678_v44, %v2328_v58  ;;  %v2354_v49 = vsel %vm2350_vm11, %v1105_v12, %v2335_v27 }
 0x304   : > { %2410 = vmatpush.msra.mxu1 %v2354_v49  ;;  %v685_v47 = vsel %vm677_vm10, %v684_v42, %v6122_v32 }
 0x305   : > { %2391 = vmatpush.msra.mxu0 %v2351_v26  ;;  %v2352_v39 = vsel %vm2350_vm11, %v685_v47, %v2329_v7 }
 0x306   : > { %5895 = vmatmul.msk.f32.vlgmr.msra.gmra.mxu0 %vm2366_vm12, %v2359_v30  ;;  %2411 = vmatpush.msra.mxu1 %v2352_v39 }
 0x307   : > { %5897 = vmatmul.msk.f32.vlgmr.msra.gmra.mxu1 %vm2366_vm12, %v2359_v30  ;;  %v12536_v30 = vld [vmem:[#allocation11_spill] sm:$0xff] }
 0x358   : > { %v2364_v41 = vpop.permute.xlu2 %2363 }
 0x383   : > { %v2393_v35 = vpop.f32.mrf.mxu0 }
 0x384   : > { %v2394_v45 = vadd.f32 %v2393_v35, %v2364_v41  ;;  %v2413_v57 = vpop.f32.mrf.mxu1 }
 0x385   : > { %v2414_v62 = vadd.f32 %v2413_v57, %v2364_v41 }
 0x386   : > { %v5898_v19 = vmul.f32 -1.442695, %v2394_v45 }
 0x387   : > { %v5899_v9 = vmul.f32 -1.442695, %v2414_v62 }
 0x388   : > { %6785 = vpow2.f32 %v5898_v19 }
 0x389   : > { %6787 = vpow2.f32 %v5899_v9 }
 0x38e   : > { %v6786_v25 = vpop.eup %6785 }
 0x38f   : > { %v2422_v20 = vadd.f32 1.0, %v6786_v25  ;;  %v6788_v60 = vpop.eup %6787 }
 0x390   : > { %v2423_v5 = vadd.f32 1.0, %v6788_v60 }
 0x391   : > { %6789 = vrcp.f32 %v2422_v20  ;;  %v2435_v40 = vand.u32 2147483648, %v2422_v20  ;;  %v2433_v4 = vand.u32 2147483647, %v2422_v20  ;;  %vm2429_vm14 = vweird.f32 %v2422_v20 }
 0x392   : > { %6791 = vrcp.f32 %v2423_v5  ;;  %v2450_v10 = vand.u32 2147483648, %v2423_v5  ;;  %vm2444_vm12 = vweird.f32 %v2423_v5  ;;  %v2448_v2 = vand.u32 2147483647, %v2423_v5 }
 0x393   : > { %v2436_v23 = vor.u32 1.1754944e-38, %v2435_v40  ;;  %vm2434_vm1 = vcmp.eq.f32.partialorder %v2433_v4, 8.507059e+37 }
 0x394   : > { %v2451_v28 = vor.u32 1.1754944e-38, %v2450_v10 }
 0x397   : > { %v6790_v52 = vpop.eup %6789 }
 0x398   : > { %v2425_v36 = vmul.f32 %v6790_v52, %v2422_v20  ;;  %v6792_v55 = vpop.eup %6791  ;;  %vm2430_vm13 = vweird.f32 %v6790_v52 }
 0x399   : > { %v2440_v17 = vmul.f32 %v6792_v55, %v2423_v5  ;;  %vm2431_vm15 = vmor %vm2429_vm14, %vm2430_vm13  ;;  %vm2445_vm2 = vweird.f32 %v6792_v55  ;;  %vm2449_vm14 = vcmp.eq.f32.partialorder %v2448_v2, 8.507059e+37 }
 0x39a   : > { %v2426_v48 = vsub.f32 1.0, %v2425_v36  ;;  %vm2446_vm13 = vmor %vm2444_vm12, %vm2445_vm2 }
 0x39b   : > { %v2441_v61 = vsub.f32 1.0, %v2440_v17 }
 0x39c   : > { %v2427_v31 = vmul.f32 %v6790_v52, %v2426_v48 }
 0x39d   : > { %v2442_v37 = vmul.f32 %v6792_v55, %v2441_v61 }
 0x39e   : > { %v2428_v46 = vadd.f32 %v6790_v52, %v2427_v31 }
 0x39f   : > { %v2443_v56 = vadd.f32 %v6792_v55, %v2442_v37 }
 0x3a0   : > { %v2432_v18 = vsel %vm2431_vm15, %v6790_v52, %v2428_v46  ;;  %vm5668_vm15 = vcmask 1045504  }
 0x3a1   : > { %v2437_v33 = vsel %vm2434_vm1, %v2436_v23, %v2432_v18  ;;  %v2447_v24 = vsel %vm2446_vm13, %v6792_v55, %v2443_v56 }
 0x3a2   : > { %v9026_v13 = vmul.f32 %v2437_v33, %v2394_v45  ;;  %v2452_v22 = vsel %vm2449_vm14, %v2451_v28, %v2447_v24 }
 0x3a3   : > { %v9040_v11 = vmul.f32 %v2452_v22, %v2414_v62 }
 0x3a4   : > { %2481 = vrot.lane.b32.xlu2 %v9026_v13, %s6900_s13  ;;  %2478 = vrot.lane.b32.xlu1 %v9026_v13, %s6903_s17  ;;  %v2520_v56 = vrot.slane %v9026_v13, 4 }
 0x3a5   : > { %2475 = vrot.lane.b32.xlu0 %v9026_v13, %s6901_s15 }
 0x3ac   : > { %2490 = vrot.lane.b32.xlu2 %v9026_v13, %s6905_s23  ;;  %2487 = vrot.lane.b32.xlu1 %v9026_v13, %s6902_s16 }
 0x3ad   : > { %2484 = vrot.lane.b32.xlu0 %v9026_v13, %s6904_s29 }
 0x3b4   : > { %2500 = vrot.lane.b32.xlu2 %v9040_v11, %s6903_s17  ;;  %2497 = vrot.lane.b32.xlu1 %v9040_v11, %s6901_s15 }
 0x3b5   : > { %2493 = vrot.lane.b32.xlu0 %v9026_v13, %s6906_s25 }
 0x3bc   : > { %2509 = vrot.lane.b32.xlu2 %v9040_v11, %s6902_s16  ;;  %2506 = vrot.lane.b32.xlu1 %v9040_v11, %s6904_s29 }
 0x3bd   : > { %2503 = vrot.lane.b32.xlu0 %v9040_v11, %s6900_s13 }
 0x3c4   : > { %2515 = vrot.lane.b32.xlu1 %v9040_v11, %s6906_s25 }
 0x3c5   : > { %2512 = vrot.lane.b32.xlu0 %v9040_v11, %s6905_s23 }
 0x3fe   : > { %v2482_v51 = vpop.permute.xlu2 %2481 }
 0x3ff   : > { %v2530_v15 = vrot.slane %v2482_v51, 4 }
 0x406   : > { %v2491_v58 = vpop.permute.xlu2 %2490 }
 0x407   : > { %v2542_v6 = vrot.slane %v2491_v58, 4 }
 0x40e   : > { %v9080_v8 = vpop.permute.xlu2 %2500 }
 0x40f   : > { %v2614_v49 = vrot.slane %v9080_v8, 4 }
 0x411   : > { %v2615_v9 = vsel %vm297_vm0, %v2614_v49, %v9040_v11 }
 0x412   : > { %v2621_v36 = vperm.slane %v2615_v9, %v12535_v29 }
 0x414   : > { %v2664_v28 = vrot.slane %v2621_v36, 4 }
 0x416   : > { %v9058_v3 = vpop.permute.xlu1 %2478  ;;  %v2510_v55 = vpop.permute.xlu2 %2509 }
 0x417   : > { %v2476_v53 = vpop.permute.xlu0 %2475  ;;  %v2518_v59 = vrot.slane %v9058_v3, 4  ;;  %v2652_v18 = vrot.slane %v2510_v55, 4 }
 0x418   : > { %v2531_v63 = vsel %vm297_vm0, %v2530_v15, %v2476_v53  ;;  %v2532_v5 = vrot.slane %v2476_v53, 4 }
 0x419   : > { %v9063_v50 = vperm.slane %v2531_v63, %v12535_v29  ;;  %v2519_v43 = vsel %vm297_vm0, %v2518_v59, %v9026_v13 }
 0x41a   : > { %v9068_v34 = vperm.slane %v2519_v43, %v12535_v29  ;;  %v2533_v61 = vsel %vm297_vm0, %v2482_v51, %v2532_v5  ;;  %v2521_v51 = vsel %vm297_vm0, %v9058_v3, %v2520_v56 }
 0x41b   : > { %v2566_v1 = vrot.slane %v9063_v50, 4  ;;  %v2541_v13 = vperm.slane %v2533_v61, %v12535_v29 }
 0x41c   : > { %v2568_v59 = vrot.slane %v9068_v34, 4 }
 0x41d   : > { %v2567_v0 = vsel %vm297_vm0, %v2566_v1, %v9068_v34 }
 0x41e   : > { %v2488_v16 = vpop.permute.xlu1 %2487  ;;  %v2573_v42 = vperm.slane %v2567_v0, %v12536_v30 }
 0x41f   : > { %v2485_v14 = vpop.permute.xlu0 %2484  ;;  %v2556_v20 = vrot.slane %v2488_v16, 4 }
 0x420   : > { %v2543_v44 = vsel %vm297_vm0, %v2542_v6, %v2485_v14  ;;  %v2604_v45 = vrot.slane %v2573_v42, 4  ;;  %v2544_v48 = vrot.slane %v2485_v14, 4 }
 0x421   : > { %v2549_v7 = vperm.slane %v2543_v44, %v12535_v29 }
 0x422   : > { %v2545_v10 = vsel %vm297_vm0, %v2491_v58, %v2544_v48 }
 0x423   : > { %v2586_v14 = vrot.slane %v2549_v7, 4 }
 0x426   : > { %v9071_v54 = vpop.permute.xlu1 %2497 }
 0x427   : > { %v2494_v38 = vpop.permute.xlu0 %2493  ;;  %v2628_v1 = vrot.slane %v9071_v54, 4 }
 0x428   : > { %v2554_v21 = vrot.slane %v2494_v38, 4  ;;  %v2557_v40 = vsel %vm297_vm0, %v2494_v38, %v2556_v20 }
 0x429   : > { %v2565_v33 = vperm.slane %v2557_v40, %v12535_v29 }
 0x42a   : > { %v2555_v12 = vsel %vm297_vm0, %v2554_v21, %v2488_v16  ;;  %v2553_v16 = vperm.slane %v2545_v10, %v12535_v29 }
 0x42b   : > { %v9078_v27 = vperm.slane %v2555_v12, %v12535_v29  ;;  %v2596_v58 = vrot.slane %v2565_v33, 4  ;;  %v2569_v12 = vsel %vm297_vm0, %v9063_v50, %v2568_v59 }
 0x42d   : > { %v2584_v32 = vrot.slane %v9078_v27, 4 }
 0x42e   : > { %v2507_v26 = vpop.permute.xlu1 %2506 }
 0x42f   : > { %v2504_v47 = vpop.permute.xlu0 %2503  ;;  %v2585_v39 = vsel %vm297_vm0, %v2584_v32, %v2549_v7  ;;  %v2640_v38 = vrot.slane %v2507_v26, 4  ;;  %v2597_v32 = vsel %vm297_vm0, %v2596_v58, %v2553_v16 }
 0x430   : > { %v2626_v41 = vrot.slane %v2504_v47, 4  ;;  %v2591_v35 = vperm.slane %v2585_v39, %v12536_v30  ;;  %v2601_v20 = vperm.slane %v2597_v32, %v12536_v30 }
 0x432   : > { %v2627_v19 = vsel %vm297_vm0, %v2626_v41, %v9071_v54  ;;  %v2605_v57 = vsel %vm297_vm0, %v2591_v35, %v2604_v45  ;;  %v2602_v62 = vrot.slane %v2591_v35, 4  ;;  %v2587_v54 = vsel %vm297_vm0, %v9078_v27, %v2586_v14 }
 0x433   : > { %v2633_v25 = vperm.slane %v2627_v19, %v12535_v29  ;;  %2726 = vrot.lane.b32.xlu1 %v2605_v57, %s6910_s26  ;;  %v2578_v41 = vrot.slane %v2541_v13, 4  ;;  %v2577_v27 = vperm.slane %v2569_v12, %v12536_v30  ;;  %v2595_v57 = vperm.slane %v2587_v54, %v12536_v30 }
 0x434   : > { %v2603_v60 = vsel %vm297_vm0, %v2602_v62, %v2573_v42  ;;  %v2629_v42 = vsel %vm297_vm0, %v2504_v47, %v2628_v1  ;;  %v2616_v62 = vrot.slane %v9040_v11, 4  ;;  %v2610_v40 = vrot.slane %v2601_v20, 4 }
 0x435   : > { %v2662_v52 = vrot.slane %v2633_v25, 4  ;;  %2722 = vrot.lane.b32.xlu2 %v2603_v60, %s6910_s26  ;;  %v2665_v34 = vsel %vm297_vm0, %v2633_v25, %v2664_v28  ;;  %v2637_v47 = vperm.slane %v2629_v42, %v12535_v29  ;;  %v2529_v60 = vperm.slane %v2521_v51, %v12535_v29 }
 0x436   : > { %v2516_v31 = vpop.permute.xlu1 %2515  ;;  %v2673_v50 = vperm.slane %v2665_v34, %v12536_v30  ;;  %v2617_v5 = vsel %vm297_vm0, %v9080_v8, %v2616_v62  ;;  %v2606_v11 = vrot.slane %v2595_v57, 4 }
 0x437   : > { %v2650_v4 = vrot.slane %v2516_v31, 4  ;;  %v2513_v17 = vpop.permute.xlu0 %2512  ;;  %v2663_v23 = vsel %vm297_vm0, %v2662_v52, %v2621_v36  ;;  %v2653_v22 = vsel %vm297_vm0, %v2516_v31, %v2652_v18  ;;  %v2674_v36 = vrot.slane %v2637_v47, 4 }
 0x438   : > { %v2638_v46 = vrot.slane %v2513_v17, 4  ;;  %v2669_v15 = vperm.slane %v2663_v23, %v12536_v30  ;;  %v2661_v6 = vperm.slane %v2653_v22, %v12535_v29  ;;  %v2579_v48 = vsel %vm297_vm0, %v2578_v41, %v2529_v60 }
 0x439   : > { %v2651_v37 = vsel %vm297_vm0, %v2650_v4, %v2510_v55  ;;  %v2608_v55 = vrot.slane %v2577_v27, 4  ;;  %v2625_v31 = vperm.slane %v2617_v5, %v12535_v29  ;;  %v2607_v8 = vsel %vm297_vm0, %v2606_v11, %v2577_v27 }
 0x43a   : > { %v2657_v2 = vperm.slane %v2651_v37, %v12535_v29  ;;  %v2639_v24 = vsel %vm297_vm0, %v2638_v46, %v2507_v26  ;;  %v2700_v3 = vrot.slane %v2669_v15, 4  ;;  %v2641_v26 = vsel %vm297_vm0, %v2513_v17, %v2640_v38 }
 0x43b   : > { %v2645_v53 = vperm.slane %v2639_v24, %v12535_v29  ;;  %v2692_v35 = vrot.slane %v2661_v6, 4  ;;  %v2649_v9 = vperm.slane %v2641_v26, %v12535_v29  ;;  %v2609_v4 = vsel %vm297_vm0, %v2595_v57, %v2608_v55 }
 0x43c   : > { %v2680_v63 = vrot.slane %v2657_v2, 4  ;;  %v2583_v46 = vperm.slane %v2579_v48, %v12536_v30  ;;  %v2675_v23 = vsel %vm297_vm0, %v2674_v36, %v2625_v31  ;;  %v2704_v56 = vrot.slane %v2673_v50, 4 }
 0x43d   : > { %v2682_v43 = vrot.slane %v2645_v53, 4  ;;  %v2693_v52 = vsel %vm297_vm0, %v2692_v35, %v2649_v9  ;;  %v2679_v33 = vperm.slane %v2675_v23, %v12536_v30 }
 0x43e   : > { %v2681_v21 = vsel %vm297_vm0, %v2680_v63, %v2645_v53  ;;  %v2697_v17 = vperm.slane %v2693_v52, %v12536_v30  ;;  %v2611_v18 = vsel %vm297_vm0, %v2610_v40, %v2583_v46  ;;  %v2612_v28 = vrot.slane %v2583_v46, 4 }
 0x43f   : > { %v2687_v0 = vperm.slane %v2681_v21, %v12536_v30  ;;  %v2683_v44 = vsel %vm297_vm0, %v2657_v2, %v2682_v43  ;;  %v2708_v10 = vrot.slane %v2679_v33, 4 }
 0x440   : > { %v2691_v7 = vperm.slane %v2683_v44, %v12536_v30  ;;  %v2706_v61 = vrot.slane %v2697_v17, 4  ;;  %v2613_v22 = vsel %vm297_vm0, %v2601_v20, %v2612_v28 }
 0x441   : > { %v2701_v49 = vsel %vm297_vm0, %v2687_v0, %v2700_v3  ;;  %v2698_v39 = vrot.slane %v2687_v0, 4  ;;  %v2709_v24 = vsel %vm297_vm0, %v2697_v17, %v2708_v10 }
 0x442   : > { %2728 = vrot.lane.b32.xlu2 %v2701_v49, %s6910_s26  ;;  %v2702_v45 = vrot.slane %v2691_v7, 4  ;;  %v2707_v37 = vsel %vm297_vm0, %v2706_v61, %v2679_v33  ;;  %v2705_v2 = vsel %vm297_vm0, %v2691_v7, %v2704_v56 }
 0x443   : > { %v2699_v19 = vsel %vm297_vm0, %v2698_v39, %v2669_v15 }
 0x444   : > { %v2703_v25 = vsel %vm297_vm0, %v2702_v45, %v2673_v50  ;;  %2724 = vrot.lane.b32.xlu0 %v2699_v19, %s6910_s26 }
 0x445   : > { %2732 = vrot.lane.b32.xlu1 %v2703_v25, %s6910_s26 }
 0x44a   : > { %2734 = vrot.lane.b32.xlu2 %v2609_v4, %s6910_s26 }
 0x44c   : > { %2730 = vrot.lane.b32.xlu0 %v2607_v8, %s6910_s26 }
 0x44d   : > { %2738 = vrot.lane.b32.xlu1 %v2611_v18, %s6910_s26 }
 0x452   : > { %2740 = vrot.lane.b32.xlu2 %v2707_v37, %s6910_s26 }
 0x454   : > { %2736 = vrot.lane.b32.xlu0 %v2705_v2, %s6910_s26 }
 0x455   : > { %2744 = vrot.lane.b32.xlu1 %v2709_v24, %s6910_s26 }
 0x45c   : > { %2742 = vrot.lane.b32.xlu0 %v2613_v22, %s6910_s26 }
 0x48f   : > { %v2723_v53 = vpop.permute.xlu2 %2722 }
 0x490   : > { %2758 = vst.msk [vmem:[#allocation3 + $0x1] sm:$0xff] %vm480_vm3, %v2723_v53 }
 0x497   : > { %v2770_v34 = vld [vmem:[#allocation3] sm:$0xff] }
 0x498   : > { %v2784_v54 = vrot.slane %v2770_v34, 4 }
 0x49c   : > { %v2729_v15 = vpop.permute.xlu2 %2728 }
 0x49d   : > { %2761 = vst.msk [vmem:[#allocation3 + $0x21] sm:$0xff] %vm480_vm3, %v2729_v15  ;;  %v9263_v15 = vld [vmem:[#allocation3 + $0x1] sm:$0xff] }
 0x49e   : > { %12540 = vst [vmem:[#allocation17_spill] sm:$0xff] %v9263_v15 }
 0x4a4   : > { %v2735_v51 = vpop.permute.xlu2 %2734  ;;  %v9217_v11 = vld [vmem:[#allocation3 + $0x22] sm:$0xff] }
 0x4a5   : > { %v2727_v59 = vpop.permute.xlu1 %2726  ;;  %2764 = vst.msk [vmem:[#allocation3 + $0x49] sm:$0xff] %vm480_vm3, %v2735_v51  ;;  %v9226_v4 = vld [vmem:[#allocation3 + $0x21] sm:$0xff]  ;;  %v4812_v17 = vrot.slane %v9217_v11, 4 }
 0x4a6   : > { %2760 = vst.msk [vmem:[#allocation3 + $0x19] sm:$0xff] %vm480_vm3, %v2727_v59  ;;  %v3858_v18 = vrot.slane %v9226_v4, 4 }
 0x4ac   : > { %v2741_v13 = vpop.permute.xlu2 %2740  ;;  %v2776_v43 = vld [vmem:[#allocation3 + $0x48] sm:$0xff] }
 0x4ad   : > { %2767 = vst.msk [vmem:[#allocation3 + $0x69] sm:$0xff] %vm480_vm3, %v2741_v13  ;;  %v2772_v63 = vld [vmem:[#allocation3 + $0x18] sm:$0xff]  ;;  %v2773_v16 = vld [vmem:[#allocation3 + $0x20] sm:$0xff]  ;;  %v2794_v1 = vrot.slane %v2776_v43, 4  ;;  %v9231_v8 = vld [vmem:[#allocation3 + $0x49] sm:$0xff]  ;;  %v3738_v13 = vrot.slane %v9263_v15, 4 }
 0x4ae   : > { %v2796_v14 = vrot.slane %v2772_v63, 4  ;;  %v9171_v58 = vpack.i.bf16 %v2773_v16, %v2772_v63  ;;  %v2904_v25 = vrot.slane %v2773_v16, 4  ;;  %v9211_v20 = vld [vmem:[#allocation3 + $0x19] sm:$0xff] }
 0x4af   : > { %v9179_v6 = vsel %vm297_vm0, %v2794_v1, %v2772_v63  ;;  %12537 = vst [vmem:[#allocation38_spill] sm:$0xff] %v9211_v20  ;;  %v3750_v48 = vrot.slane %v9211_v20, 4 }
 0x4b0   : > { %6360 = vrot.lane.b32.xlu1 %v9171_v58, %s6912_s28  ;;  %v9176_v38 = vsel %vm297_vm0, %v2776_v43, %v2796_v14 }
 0x4b1   : > { %v9244_v37 = vsel %vm297_vm0, %v9231_v8, %v3750_v48 }
 0x4b6   : > { %v2725_v21 = vpop.permute.xlu0 %2724 }
 0x4b7   : > { %v2733_v0 = vpop.permute.xlu1 %2732  ;;  %2759 = vst.msk [vmem:[#allocation3 + $0x9] sm:$0xff] %vm480_vm3, %v2725_v21  ;;  %v3748_v21 = vrot.slane %v9231_v8, 4 }
 0x4b8   : > { %2763 = vst.msk [vmem:[#allocation3 + $0x39] sm:$0xff] %vm480_vm3, %v2733_v0 }
 0x4be   : > { %v2731_v3 = vpop.permute.xlu0 %2730  ;;  %v2771_v44 = vld [vmem:[#allocation3 + $0x8] sm:$0xff] }
 0x4bf   : > { %2762 = vst.msk [vmem:[#allocation3 + $0x31] sm:$0xff] %vm480_vm3, %v2731_v3  ;;  %v2739_v12 = vpop.permute.xlu1 %2738  ;;  %v6354_v42 = vpack.i.bf16 %v2771_v44, %v2770_v34  ;;  %v2892_v7 = vrot.slane %v2771_v44, 4  ;;  %v9236_v61 = vld [vmem:[#allocation3 + $0x9] sm:$0xff]  ;;  %v9246_v56 = vld [vmem:[#allocation3 + $0x39] sm:$0xff]  ;;  %v9294_v3 = vperm.slane %v9176_v38, %v12535_v29 }
 0x4c0   : > { %2766 = vst.msk [vmem:[#allocation3 + $0x61] sm:$0xff] %vm480_vm3, %v2739_v12  ;;  %v3844_v22 = vrot.slane %v9246_v56, 4  ;;  %v3846_v51 = vrot.slane %v9236_v61, 4 }
 0x4c1   : > { %6355 = vrot.lane.b32.xlu0 %v6354_v42, %s6912_s28 }
 0x4c2   : > { %v9273_v63 = vsel %vm297_vm0, %v3844_v22, %v9236_v61 }
 0x4c6   : > { %v2737_v32 = vpop.permute.xlu0 %2736  ;;  %v2774_v26 = vld [vmem:[#allocation3 + $0x30] sm:$0xff]  ;;  %v2775_v49 = vld [vmem:[#allocation3 + $0x38] sm:$0xff] }
 0x4c7   : > { %2765 = vst.msk [vmem:[#allocation3 + $0x51] sm:$0xff] %vm480_vm3, %v2737_v32  ;;  %v2745_v39 = vpop.permute.xlu1 %2744  ;;  %v2890_v41 = vrot.slane %v2775_v49, 4  ;;  %v9188_v35 = vsel %vm297_vm0, %v2775_v49, %v2892_v7  ;;  %v6364_v50 = vpack.i.bf16 %v2775_v49, %v2774_v26  ;;  %v2782_v45 = vrot.slane %v2774_v26, 4  ;;  %v9190_v47 = vld [vmem:[#allocation3 + $0x60] sm:$0xff]  ;;  %v9192_v19 = vld [vmem:[#allocation3 + $0x68] sm:$0xff]  ;;  %v9266_v59 = vld [vmem:[#allocation3 + $0x31] sm:$0xff] }
 0x4c8   : > { %2769 = vst.msk [vmem:[#allocation3 + $0x81] sm:$0xff] %vm480_vm3, %v2745_v39  ;;  %v9196_v27 = vsel %vm297_vm0, %v2774_v26, %v2784_v54  ;;  %v9207_v9 = vpack.i.bf16 %v9192_v19, %v9190_v47  ;;  %v3736_v14 = vrot.slane %v9266_v59, 4  ;;  %v2914_v12 = vrot.slane %v9192_v19, 4 }
 0x4c9   : > { %v9199_v57 = vsel %vm297_vm0, %v2890_v41, %v2771_v44  ;;  %6365 = vrot.lane.b32.xlu2 %v6364_v50, %s6912_s28  ;;  %v9203_v62 = vsel %vm297_vm0, %v2782_v45, %v2770_v34  ;;  %12541 = vst [vmem:[#allocation15_spill] sm:$0xff] %v9266_v59  ;;  %v9296_v34 = vld [vmem:[#allocation3 + $0x69] sm:$0xff]  ;;  %v9298_v44 = vld [vmem:[#allocation3 + $0x1a] sm:$0xff]  ;;  %v2806_v7 = vrot.slane %v9190_v47, 4  ;;  %v9305_v54 = vperm.slane %v9179_v6, %v12535_v29 }
 0x4ca   : > { %6375 = vrot.lane.b32.xlu1 %v9207_v9, %s6912_s28  ;;  %v9290_v0 = vsel %vm297_vm0, %v3736_v14, %v9263_v15  ;;  %12542 = vst [vmem:[#allocation14_spill] sm:$0xff] %v9296_v34  ;;  %v6419_v32 = vpack.i.bf16 %v9226_v4, %v9211_v20  ;;  %v3868_v38 = vrot.slane %v9296_v34, 4  ;;  %v4704_v26 = vrot.slane %v9298_v44, 4 }
 0x4cb   : > { %v9316_v49 = vsel %vm297_vm0, %v3748_v21, %v9211_v20  ;;  %v9320_v6 = vperm.slane %v9296_v34, %v12535_v29  ;;  %v2915_v39 = vsel %vm297_vm0, 0.0, %v2914_v12  ;;  %v9351_v48 = vperm.slane %v9203_v62, %v12535_v29 }
 0x4cc   : > { %v6424_v14 = vpack.i.bf16 %v9246_v56, %v9266_v59 }
 0x4ce   : > { %v2743_v60 = vpop.permute.xlu0 %2742  ;;  %v2777_v5 = vld [vmem:[#allocation3 + $0x50] sm:$0xff] }
 0x4cf   : > { %2768 = vst.msk [vmem:[#allocation3 + $0x79] sm:$0xff] %vm480_vm3, %v2743_v60  ;;  %v6369_v52 = vpack.i.bf16 %v2777_v5, %v2776_v43  ;;  %v2902_v36 = vrot.slane %v2777_v5, 4  ;;  %v9215_v55 = vsel %vm297_vm0, %v2777_v5, %v2904_v25  ;;  %v9220_v40 = vld [vmem:[#allocation3 + $0x52] sm:$0xff]  ;;  %v9283_v43 = vsel %vm297_vm0, %v9266_v59, %v3738_v13  ;;  %v9285_v1 = vld [vmem:[#allocation3 + $0x4a] sm:$0xff] }
 0x4d0   : > { %v4810_v46 = vrot.slane %v9220_v40, 4  ;;  %v9233_v23 = vld [vmem:[#allocation3 + $0x51] sm:$0xff]  ;;  %v9240_v33 = vsel %vm297_vm0, %v9220_v40, %v4812_v17  ;;  %v9333_v45 = vsel %vm297_vm0, %v9285_v1, %v4704_v26  ;;  %v9337_v25 = vperm.slane %v9188_v35, %v12535_v29 }
 0x4d1   : > { %v9223_v31 = vsel %vm297_vm0, %v2902_v36, %v2773_v16  ;;  %6370 = vrot.lane.b32.xlu0 %v6369_v52, %s6912_s28  ;;  %12538 = vst [vmem:[#allocation16_spill] sm:$0xff] %v9240_v33  ;;  %v9258_v28 = vsel %vm297_vm0, %v9233_v23, %v3858_v18  ;;  %v9278_v16 = vsel %vm297_vm0, %v9246_v56, %v3846_v51  ;;  %v2807_v5 = vsel %vm297_vm0, 0.0, %v2806_v7  ;;  %v9465_v51 = vld [vmem:[#allocation3 + $0x3a] sm:$0xff]  ;;  %v9547_v59 = vld [vmem:[#allocation3 + $0xa] sm:$0xff] }
 0x4d2   : > { %6385 = vrot.lane.b32.xlu1 %v6354_v42, %s6911_s8  ;;  %v9250_v10 = vsel %vm297_vm0, %v4810_v46, %v9217_v11  ;;  %v4702_v42 = vrot.slane %v9285_v1, 4  ;;  %12544 = vst [vmem:[#allocation13_spill] sm:$0xff] %v9333_v45  ;;  %v9341_v60 = vperm.slane %v9196_v27, %v12535_v29  ;;  %v9347_v36 = vperm.slane %v9199_v57, %v12535_v29 }
 0x4d3   : > { %12539 = vst [vmem:[#allocation29_spill] sm:$0xff] %v9250_v10  ;;  %v9355_v35 = vperm.slane %v9192_v19, %v12535_v29  ;;  %v3869_v17 = vsel %vm297_vm0, 0.0, %v3868_v38  ;;  %v9359_v27 = vperm.slane %v2915_v39, %v12535_v29  ;;  %v9363_v46 = vperm.slane %v9190_v47, %v12535_v29 }
 0x4d4   : > { %v9368_v62 = vperm.slane %v2807_v5, %v12535_v29  ;;  %v6414_v19 = vpack.i.bf16 %v9236_v61, %v9263_v15  ;;  %v9394_v38 = vperm.slane %v3869_v17, %v12535_v29  ;;  %12546 = vst [vmem:[#allocation23_spill] sm:$0xff] %v9465_v51  ;;  %v9482_v57 = vperm.slane %v9316_v49, %v12535_v29 }
 0x4d5   : > { %v12549_v41 = vrot.slane %v9341_v60, 4  ;;  %v9517_v15 = vperm.slane %v9273_v63, %v12535_v29  ;;  %12553 = vst [vmem:[#allocation25_spill] sm:$0xff] %v9547_v59  ;;  %vm5673_vm3 = vcmask 1041408  }
 0x4d6   : > { %v9252_v2 = vld [vmem:[#allocation3 + $0x78] sm:$0xff]  ;;  %v9254_v24 = vld [vmem:[#allocation3 + $0x80] sm:$0xff] }
 0x4d7   : > { %v6379_v53 = vpack.i.bf16 %v9254_v24, %v9252_v2  ;;  %v2816_v22 = vrot.slane %v9252_v2, 4  ;;  %v2924_v13 = vrot.slane %v9254_v24, 4  ;;  %v9397_v39 = vld [vmem:[#allocation3 + $0x79] sm:$0xff]  ;;  %v9411_v17 = vperm.slane %v9252_v2, %v12535_v29 }
 0x4d8   : > { %12545 = vst [vmem:[#allocation37_spill] sm:$0xff] %v9397_v39  ;;  %v3770_v2 = vrot.slane %v9397_v39, 4  ;;  %v2841_v49 = vsel %vm297_vm0, %v9294_v3, %v12549_v41 }
 0x4d9   : > { %6395 = vrot.lane.b32.xlu0 %v6364_v50, %s6911_s8  ;;  %6380 = vrot.lane.b32.xlu2 %v6379_v53, %s6912_s28  ;;  %v9325_v50 = vld [vmem:[#allocation3 + $0x61] sm:$0xff]  ;;  %v2817_v7 = vsel %vm297_vm0, 0.0, %v2816_v22 }
 0x4da   : > { %6400 = vrot.lane.b32.xlu1 %v6369_v52, %s6911_s8  ;;  %12543 = vst [vmem:[#allocation12_spill] sm:$0xff] %v9325_v50  ;;  %v3760_v18 = vrot.slane %v9325_v50, 4  ;;  %v9378_v47 = vperm.slane %v9325_v50, %v12535_v29  ;;  %v9433_v12 = vperm.slane %v2817_v7, %v12535_v29  ;;  %v3771_v21 = vsel %vm297_vm0, 0.0, %v3770_v2 }
 0x4db   : > { %v3747_v52 = vperm.slane %v9283_v43, %v12535_v29  ;;  %v6454_v43 = vpack.i.bf16 %v9285_v1, %v9465_v51 }
 0x4dc   : > { %v3761_v26 = vsel %vm297_vm0, 0.0, %v3760_v18  ;;  %v2925_v18 = vsel %vm297_vm0, 0.0, %v2924_v13 }
 0x4dd   : > { %v9424_v22 = vperm.slane %v3761_v26, %v12535_v29  ;;  %v9440_v26 = vperm.slane %v2925_v18, %v12535_v29  ;;  %v9468_v18 = vld [vmem:[#allocation3 + $0x32] sm:$0xff]  ;;  %v3794_v2 = vrot.slane %v3747_v52, 4 }
 0x4de   : > { %v4690_v45 = vrot.slane %v9468_v18, 4 }
 0x4e1   : > { %6410 = vrot.lane.b32.xlu0 %v6379_v53, %s6911_s8  ;;  %6390 = vrot.lane.b32.xlu2 %v9171_v58, %s6911_s8  ;;  %v9329_v58 = vsel %vm297_vm0, %v4702_v42, %v9298_v44  ;;  %v6434_v42 = vpack.i.bf16 %v9296_v34, %v9325_v50  ;;  %v9451_v53 = vperm.slane %v9397_v39, %v12535_v29  ;;  %v12552_v50 = vrot.slane %v9351_v48, 4 }
 0x4e2   : > { %6420 = vrot.lane.b32.xlu1 %v6419_v32, %s6912_s28  ;;  %v9391_v32 = vperm.slane %v9215_v55, %v12535_v29  ;;  %v9407_v55 = vld [vmem:[#allocation3 + $0x81] sm:$0xff]  ;;  %v9501_v33 = vperm.slane %v9329_v58, %v12535_v29  ;;  %v12550_v58 = vrot.slane %v9305_v54, 4  ;;  %v3926_v34 = vrot.slane %v9394_v38, 4 }
 0x4e3   : > { %v9460_v13 = vperm.slane %v9407_v55, %v12535_v29 }
 0x4e4   : > { %12547 = vst [vmem:[#allocation24_spill] sm:$0xff] %v9501_v33 }
 0x4e9   : > { %6415 = vrot.lane.b32.xlu0 %v6414_v19, %s6912_s28  ;;  %6405 = vrot.lane.b32.xlu2 %v9207_v9, %s6911_s8  ;;  %v9403_v9 = vperm.slane %v9223_v31, %v12535_v29  ;;  %v9417_v19 = vperm.slane %v9244_v37, %v12535_v29  ;;  %v9421_v31 = vperm.slane %v9254_v24, %v12535_v29  ;;  %v3878_v24 = vrot.slane %v9407_v55, 4 }
 0x4ea   : > { %6435 = vrot.lane.b32.xlu1 %v6434_v42, %s6912_s28  ;;  %v9428_v42 = vperm.slane %v9258_v28, %v12535_v29  ;;  %v6444_v37 = vpack.i.bf16 %v9217_v11, %v9220_v40  ;;  %v6429_v28 = vpack.i.bf16 %v9233_v23, %v9231_v8 }
 0x4eb   : > { %v3792_v7 = vrot.slane %v9417_v19, 4  ;;  %v3879_v5 = vsel %vm297_vm0, 0.0, %v3878_v24  ;;  %v6449_v24 = vpack.i.bf16 %v9226_v4, %v9233_v23  ;;  %v3795_v41 = vsel %vm297_vm0, %v9417_v19, %v3794_v2 }
 0x4f1   : > { %6430 = vrot.lane.b32.xlu0 %v6429_v28, %s6912_s28  ;;  %6425 = vrot.lane.b32.xlu2 %v6424_v14, %s6912_s28  ;;  %v9476_v28 = vperm.slane %v9278_v16, %v12535_v29  ;;  %v9487_v14 = vperm.slane %v3771_v21, %v12535_v29  ;;  %v9493_v16 = vperm.slane %v3879_v5, %v12535_v29  ;;  %v12548_v5 = vrot.slane %v9294_v3, 4  ;;  %v9530_v3 = vld [vmem:[#allocation3 + $0x2] sm:$0xff] }
 0x4f2   : > { %6445 = vrot.lane.b32.xlu1 %v6444_v37, %s6912_s28  ;;  %v6439_v37 = vpack.i.bf16 %v9407_v55, %v9397_v39  ;;  %v9505_v21 = vperm.slane %v9290_v0, %v12535_v29  ;;  %v2827_v0 = vsel %vm297_vm0, %v12550_v58, %v9351_v48  ;;  %12551 = vst [vmem:[#allocation35_spill] sm:$0xff] %v9530_v3 }
 0x4f3   : > { %v2839_v10 = vsel %vm297_vm0, %v12548_v5, %v9341_v60  ;;  %v9526_v5 = vld [vmem:[#allocation3 + $0x82] sm:$0xff]  ;;  %v4691_v58 = vsel %vm297_vm0, %v4690_v45, %v9530_v3  ;;  %v2829_v39 = vsel %vm297_vm0, %v9305_v54, %v12552_v50  ;;  %v9544_v60 = vperm.slane %v2827_v0, %v12536_v30 }
 0x4f4   : > { %v3782_v63 = vrot.slane %v9505_v21, 4  ;;  %v9550_v19 = vperm.slane %v2829_v39, %v12536_v30  ;;  %v9555_v45 = vperm.slane %v2839_v10, %v12536_v30  ;;  %v3793_v48 = vsel %vm297_vm0, %v3792_v7, %v3747_v52 }
 0x4f5   : > { %v6459_v54 = vpack.i.bf16 %v9547_v59, %v9526_v5  ;;  %v3902_v39 = vrot.slane %v9476_v28, 4  ;;  %v9570_v10 = vperm.slane %v2841_v49, %v12536_v30  ;;  %v9573_v52 = vperm.slane %v3795_v41, %v12536_v30 }
 0x4f6   : > { %v3783_v2 = vsel %vm297_vm0, %v9482_v57, %v3782_v63  ;;  %v12555_v63 = vrot.slane %v9233_v23, 4  ;;  %v2880_v3 = vrot.slane %v9550_v19, 4  ;;  %v4734_v23 = vrot.slane %v9501_v33, 4 }
 0x4f7   : > { %v9562_v50 = vperm.slane %v3783_v2, %v12536_v30  ;;  %v3927_v59 = vsel %vm297_vm0, %v9493_v16, %v3926_v34  ;;  %v12566_v33 = vrot.slane %v9421_v31, 4 }
 0x4f8   : > { %v3857_v2 = vsel %vm297_vm0, %v12555_v63, %v9226_v4  ;;  %v12557_v4 = vrot.slane %v9347_v36, 4 }
 0x4f9   : > { %6450 = vrot.lane.b32.xlu0 %v6449_v24, %s6911_s8  ;;  %6440 = vrot.lane.b32.xlu2 %v6439_v37, %s6912_s28  ;;  %v3890_v24 = vrot.slane %v9517_v15, 4  ;;  %v9567_v37 = vperm.slane %v4691_v58, %v12535_v29  ;;  %v12556_v58 = vrot.slane %v9320_v6, 4  ;;  %v9591_v7 = vperm.slane %v3857_v2, %v12535_v29 }
 0x4fa   : > { %6455 = vrot.lane.b32.xlu1 %v6454_v43, %s6912_s28  ;;  %v12554_v43 = vrot.slane %v9337_v25, 4  ;;  %v2937_v63 = vsel %vm297_vm0, %v9403_v9, %v12557_v4  ;;  %v3834_v41 = vrot.slane %v9562_v50, 4 }
 0x4fb   : > { %v3915_v49 = vsel %vm297_vm0, %v9460_v13, %v12556_v58  ;;  %v2945_v20 = vperm.slane %v2937_v63, %v12536_v30  ;;  %v3891_v2 = vsel %vm297_vm0, %v9591_v7, %v3890_v24  ;;  %v12559_v24 = vrot.slane %v9403_v9, 4 }
 0x4fc   : > { %v2949_v0 = vsel %vm297_vm0, %v9391_v32, %v12554_v43  ;;  %v9595_v43 = vperm.slane %v3793_v48, %v12536_v30  ;;  %v3923_v58 = vperm.slane %v3915_v49, %v12536_v30  ;;  %v3903_v48 = vsel %vm297_vm0, %v9428_v42, %v3902_v39 }
 0x4fd   : > { %v9617_v49 = vsel %vm297_vm0, %v4734_v23, %v9567_v37  ;;  %v3899_v4 = vperm.slane %v3891_v2, %v12536_v30  ;;  %v2935_v39 = vsel %vm297_vm0, %v12559_v24, %v9347_v36  ;;  %v2988_v29 = vrot.slane %v2945_v20, 4 }
 0x4fe   : > { %12558 = vst [vmem:[#allocation31_spill] sm:$0xff] %v9617_v49  ;;  %v3940_v63 = vrot.slane %v3923_v58, 4  ;;  %v9625_v34 = vperm.slane %v2949_v0, %v12536_v30  ;;  %v9639_v9 = vperm.slane %v3927_v59, %v12536_v30  ;;  %v12561_v36 = vrot.slane %v9391_v32, 4 }
 0x4ff   : > { %v3942_v2 = vrot.slane %v3899_v4, 4  ;;  %v12562_v24 = vrot.slane %v9363_v46, 4 }
 0x500   : > { %v9636_v23 = vsel %vm297_vm0, %v3940_v63, %v3899_v4  ;;  %v2947_v0 = vsel %vm297_vm0, %v12561_v36, %v9337_v25  ;;  %v12564_v4 = vrot.slane %v9378_v47, 4 }
 0x501   : > { %5316 = vrot.lane.b32.xlu0 %v9217_v11, %s6911_s8  ;;  %5324 = vrot.lane.b32.xlu2 %v9220_v40, %s6911_s8  ;;  %v9628_v11 = vperm.slane %v2935_v39, %v12536_v30  ;;  %v9631_v40 = vperm.slane %v3903_v48, %v12536_v30  ;;  %v2853_v48 = vsel %vm297_vm0, %v9411_v17, %v12562_v24  ;;  %v12563_v39 = vrot.slane %v9355_v35, 4 }
 0x502   : > { %5320 = vrot.lane.b32.xlu1 %v9465_v51, %s6911_s8  ;;  %v3807_v59 = vsel %vm297_vm0, %v9451_v53, %v12564_v4  ;;  %v2861_v32 = vperm.slane %v2853_v48, %v12536_v30  ;;  %v9662_v24 = vsel %vm297_vm0, %v3923_v58, %v3942_v2  ;;  %v12565_v51 = vrot.slane %v9411_v17, 4 }
 0x503   : > { %12560 = vst [vmem:[#allocation18_spill] sm:$0xff] %v9628_v11  ;;  %v2961_v63 = vsel %vm297_vm0, %v9421_v31, %v12563_v39  ;;  %v2984_v49 = vrot.slane %v9628_v11, 4  ;;  %v3815_v36 = vperm.slane %v3807_v59, %v12536_v30  ;;  %v2959_v4 = vsel %vm297_vm0, %v12566_v33, %v9355_v35 }
 0x504   : > { %v2969_v25 = vperm.slane %v2961_v63, %v12536_v30  ;;  %v2851_v39 = vsel %vm297_vm0, %v12565_v51, %v9363_v46  ;;  %v3948_v11 = vrot.slane %v9639_v9, 4  ;;  %v2953_v48 = vperm.slane %v2947_v0, %v12536_v30 }
 0x505   : > { %v9675_v63 = vsel %vm297_vm0, %v2861_v32, %v2880_v3  ;;  %v2878_v2 = vrot.slane %v2861_v32, 4  ;;  %v12567_v51 = vrot.slane %v9368_v62, 4  ;;  %v12568_v35 = vrot.slane %v9359_v27, 4 }
 0x506   : > { %v9678_v58 = vsel %vm297_vm0, %v2969_v25, %v2988_v29  ;;  %v2986_v59 = vrot.slane %v2969_v25, 4  ;;  %v3832_v31 = vrot.slane %v3815_v36, 4  ;;  %v12569_v29 = vpack.i.bf16 %v9231_v8, %v9246_v56 }
 0x507   : > { %v2865_v33 = vsel %vm297_vm0, %v9433_v12, %v12567_v51  ;;  %v2973_v17 = vsel %vm297_vm0, %v9440_v26, %v12568_v35  ;;  %v9697_v3 = vsel %vm297_vm0, %v2878_v2, %v9550_v19  ;;  %v2992_v25 = vrot.slane %v2953_v48, 4 }
 0x508   : > { %v9700_v0 = vsel %vm297_vm0, %v2986_v59, %v2945_v20  ;;  %v2873_v32 = vperm.slane %v2865_v33, %v12536_v30  ;;  %v2981_v35 = vperm.slane %v2973_v17, %v12536_v30  ;;  %v9708_v8 = vsel %vm297_vm0, %v3832_v31, %v9562_v50 }
 0x509   : > { %6465 = vrot.lane.b32.xlu0 %v12569_v29, %s6911_s8  ;;  %6460 = vrot.lane.b32.xlu2 %v6459_v54, %s6912_s28  ;;  %v9711_v56 = vperm.slane %v2851_v39, %v12536_v30  ;;  %v12570_v20 = vpack.i.bf16 %v9468_v18, %v9298_v44  ;;  %v9720_v2 = vperm.slane %v2959_v4, %v12536_v30  ;;  %v12571_v33 = vrot.slane %v9544_v60, 4 }
 0x50a   : > { %v2886_v19 = vrot.slane %v2873_v32, 4  ;;  %v9723_v59 = vsel %vm297_vm0, %v3815_v36, %v3834_v41  ;;  %v2994_v50 = vrot.slane %v2981_v35, 4  ;;  %v12572_v31 = vrot.slane %v9424_v22, 4 }
 0x50b   : > { %6470 = vrot.lane.b32.xlu1 %v12570_v20, %s6912_s28  ;;  %v9729_v39 = vsel %vm297_vm0, %v9711_v56, %v12571_v33  ;;  %v9743_v41 = vsel %vm297_vm0, %v9720_v2, %v2984_v49  ;;  %v9748_v20 = vsel %vm297_vm0, %v3948_v11, %v9631_v40  ;;  %v12574_v49 = vrot.slane %v9440_v26, 4 }
 0x50c   : > { %v3819_v29 = vsel %vm297_vm0, %v9487_v14, %v12572_v31  ;;  %v9739_v4 = vsel %vm297_vm0, %v2886_v19, %v9570_v10  ;;  %v9752_v33 = vsel %vm297_vm0, %v2994_v50, %v9625_v34  ;;  %v12573_v19 = vrot.slane %v9433_v12, 4 }
 0x50d   : > { %v3827_v36 = vperm.slane %v3819_v29, %v12536_v30  ;;  %v2971_v29 = vsel %vm297_vm0, %v12574_v49, %v9359_v27  ;;  %v6534_v11 = vpack.i.bf16 %v9752_v33, %v9739_v4  ;;  %v3816_v31 = vrot.slane %v9487_v14, 4 }
 0x50e   : > { %v2863_v17 = vsel %vm297_vm0, %v12573_v19, %v9368_v62  ;;  %v2977_v51 = vperm.slane %v2971_v29, %v12536_v30  ;;  %v3838_v46 = vrot.slane %v9595_v43, 4  ;;  %v12575_v62 = vrot.slane %v9428_v42, 4 }
 0x50f   : > { %v3840_v54 = vrot.slane %v3827_v36, 4  ;;  %v2869_v50 = vperm.slane %v2863_v17, %v12536_v30  ;;  %v3924_v26 = vrot.slane %v9493_v16, 4  ;;  %v12576_v14 = vrot.slane %v9555_v45, 4 }
 0x510   : > { %v3901_v12 = vsel %vm297_vm0, %v12575_v62, %v9476_v28  ;;  %v9789_v42 = vsel %vm297_vm0, %v2977_v51, %v2992_v25  ;;  %v12577_v49 = vpack.i.bf16 %v9236_v61, %v9407_v55  ;;  %v2888_v61 = vrot.slane %v9570_v10, 4 }
 0x511   : > { %5332 = vrot.lane.b32.xlu0 %v9526_v5, %s6911_s8  ;;  %5322 = vrot.lane.b32.xlu2 %v9285_v1, %s6911_s8  ;;  %v9781_v27 = vsel %vm297_vm0, %v3840_v54, %v9573_v52  ;;  %v9786_v17 = vsel %vm297_vm0, %v2869_v50, %v12576_v14  ;;  %v2882_v28 = vrot.slane %v2869_v50, 4  ;;  %v2990_v1 = vrot.slane %v2977_v51, 4  ;;  %v9809_v51 = vld [vmem:[#allocation3 + $0x7a] sm:$0xff] }
 0x512   : > { %v3817_v54 = vsel %vm297_vm0, %v3816_v31, %v9424_v22  ;;  %v3907_v50 = vperm.slane %v3901_v12, %v12536_v30  ;;  %v3925_v62 = vsel %vm297_vm0, %v3924_v26, %v9394_v38  ;;  %v2996_v55 = vrot.slane %v9625_v34, 4 }
 0x513   : > { %6480 = vrot.lane.b32.xlu1 %v12577_v49, %s6911_s8  ;;  %v9803_v25 = vsel %vm297_vm0, %v2882_v28, %v9555_v45  ;;  %v3823_v29 = vperm.slane %v3817_v54, %v12536_v30  ;;  %v9812_v22 = vsel %vm297_vm0, %v2990_v1, %v2953_v48  ;;  %v3931_v31 = vperm.slane %v3925_v62, %v12536_v30  ;;  %v4687_v48 = vld [vmem:[#allocation3 + $0x6a] sm:$0xff] }
 0x514   : > { %v3946_v12 = vrot.slane %v3907_v50, 4  ;;  %v12578_v38 = vrot.slane %v9482_v57, 4  ;;  %v9829_v28 = vsel %vm297_vm0, %v2873_v32, %v2888_v61  ;;  %v9832_v10 = vsel %vm297_vm0, %v2981_v35, %v2996_v55  ;;  %v12582_v55 = vld [vmem:[#allocation38_spill] sm:$0xff] }
 0x515   : > { %v9820_v14 = vsel %vm297_vm0, %v3823_v29, %v3838_v46  ;;  %v12579_v34 = vrot.slane %v9451_v53, 4  ;;  %v6474_v1 = vpack.i.bf16 %v9809_v51, %v4687_v48  ;;  %v3888_v32 = vrot.slane %v9591_v7, 4 }
 0x516   : > { %v9826_v26 = vsel %vm297_vm0, %v12578_v38, %v9505_v21  ;;  %v9842_v57 = vsel %vm297_vm0, %v3931_v31, %v3946_v12  ;;  %v12580_v54 = vrot.slane %v9460_v13, 4  ;;  %v3944_v62 = vrot.slane %v3931_v31, 4  ;;  %v12581_v31 = vld [vmem:[#allocation24_spill] sm:$0xff] }
 0x517   : > { %v9838_v46 = vsel %vm297_vm0, %v12579_v34, %v9378_v47  ;;  %v3836_v47 = vrot.slane %v3823_v29, 4  ;;  %v3889_v49 = vsel %vm297_vm0, %v3888_v32, %v9517_v15  ;;  %v3842_v7 = vrot.slane %v9573_v52, 4  ;;  %v12586_v32 = vld [vmem:[#allocation37_spill] sm:$0xff] }
 0x518   : > { %v9853_v53 = vsel %vm297_vm0, %v12580_v54, %v9320_v6  ;;  %v3950_v13 = vrot.slane %v9631_v40, 4  ;;  %v9869_v6 = vsel %vm297_vm0, %v3944_v62, %v3907_v50  ;;  %v4736_v15 = vrot.slane %v9567_v37, 4  ;;  %v12583_v37 = vld [vmem:[#allocation15_spill] sm:$0xff]  ;;  %v4686_v54 = vld [vmem:[#allocation3 + $0x62] sm:$0xff] }
 0x519   : > { %5314 = vrot.lane.b32.xlu0 %v9298_v44, %s6911_s8  ;;  %6475 = vrot.lane.b32.xlu2 %v6474_v1, %s6912_s28  ;;  %v9863_v61 = vsel %vm297_vm0, %v3836_v47, %v9595_v43  ;;  %v9872_v44 = vsel %vm297_vm0, %v3827_v36, %v3842_v7  ;;  %v2874_v29 = vrot.slane %v9711_v56, 4  ;;  %v2982_v50 = vrot.slane %v9720_v2, 4  ;;  %v12585_v1 = vld [vmem:[#allocation14_spill] sm:$0xff]  ;;  %v12587_v2 = vld [vmem:[#allocation25_spill] sm:$0xff]  ;;  %v12589_v47 = vld [vmem:[#allocation23_spill] sm:$0xff] }
 0x51a   : > { %v9879_v43 = vsel %vm297_vm0, %v9639_v9, %v3950_v13  ;;  %v9887_v36 = vsel %vm297_vm0, %v12581_v31, %v4736_v15  ;;  %v6484_v12 = vpack.i.bf16 %v12583_v37, %v12582_v55  ;;  %v12584_v9 = vld [vmem:[#allocation18_spill] sm:$0xff]  ;;  %v6489_v56 = vpack.i.bf16 %v12586_v32, %v12585_v1  ;;  %v12591_v31 = vld [vmem:[#allocation17_spill] sm:$0xff] }
 0x51b   : > { %5318 = vrot.lane.b32.xlu1 %v9468_v18, %s6911_s8  ;;  %v9893_v38 = vsel %vm297_vm0, %v2874_v29, %v9544_v60  ;;  %v9897_v34 = vsel %vm297_vm0, %v2982_v50, %v12584_v9  ;;  %v12588_v60 = vld [vmem:[#allocation35_spill] sm:$0xff]  ;;  %v4798_v62 = vrot.slane %v12589_v47, 4  ;;  %v4822_v13 = vrot.slane %v4687_v48, 4  ;;  %v12590_v50 = vld [vmem:[#allocation12_spill] sm:$0xff] }
 0x51c   : > { %v6494_v7 = vpack.i.bf16 %v4686_v54, %v12588_v60  ;;  %v4692_v29 = vrot.slane %v12588_v60, 4  ;;  %v12592_v55 = vpack.i.bf16 %v12590_v50, %v12591_v31  ;;  %v4832_v37 = vrot.slane %v9526_v5, 4 }
 0x51d   : > { %v4799_v1 = vsel %vm297_vm0, %v4798_v62, %v12587_v2  ;;  %v12596_v47 = vpack.i.bf16 %v9678_v58, %v9675_v63  ;;  %v12600_v62 = vld [vmem:[#allocation16_spill] sm:$0xff]  ;;  %v9966_v40 = vperm.slane %v3889_v49, %v12536_v30  ;;  %v9974_v52 = vperm.slane %v9826_v26, %v12536_v30 }
 0x51e   : > { %v4693_v32 = vsel %vm297_vm0, %v9468_v18, %v4692_v29  ;;  %v4823_v29 = vsel %vm297_vm0, 0.0, %v4822_v13  ;;  %v4833_v58 = vsel %vm297_vm0, 0.0, %v4832_v37  ;;  %v12609_v26 = vpack.i.bf16 %v9700_v0, %v9697_v3 }
 0x51f   : > { %12605 = vst [vmem:[#allocation21_spill] sm:$0xff] %v9966_v40  ;;  %v9998_v49 = vperm.slane %v9838_v46, %v12536_v30  ;;  %v3938_v3 = vrot.slane %v9966_v40, 4  ;;  %v3830_v46 = vrot.slane %v9974_v52, 4  ;;  %v10021_v33 = vperm.slane %v9853_v53, %v12536_v30 }
 0x520   : > { %12607 = vst [vmem:[#allocation22_spill] sm:$0xff] %v9974_v52 }
 0x521   : > { %6485 = vrot.lane.b32.xlu0 %v6484_v12, %s6911_s8  ;;  %5312 = vrot.lane.b32.xlu2 %v12587_v2, %s6911_s8  ;;  %v12593_v12 = vld [vmem:[#allocation10_spill] sm:$0xff]  ;;  %12611 = vst [vmem:[#allocation39_spill] sm:$0xff] %v9998_v49 }
 0x522   : > { %v9922_v9 = vperm.slane %v4687_v48, %v12593_v12  ;;  %v9945_v18 = vperm.slane %v12600_v62, %v12593_v12  ;;  %v9950_v31 = vperm.slane %v9809_v51, %v12593_v12  ;;  %v9953_v63 = vperm.slane %v4799_v1, %v12593_v12  ;;  %12614 = vst [vmem:[#allocation38_spill] sm:$0xff] %v10021_v33 }
 0x523   : > { %6490 = vrot.lane.b32.xlu1 %v6489_v56, %s6911_s8  ;;  %v9912_v15 = vpop.permute.xlu2 %6365  ;;  %v4714_v56 = vrot.slane %v4686_v54, 4  ;;  %v9970_v37 = vperm.slane %v4823_v29, %v12593_v12 }
 0x524   : > { %12594 = vst [vmem:[#allocation27_spill] sm:$0xff] %v9922_v9  ;;  %v4844_v1 = vrot.slane %v9953_v63, 4 }
 0x525   : > { %12601 = vst [vmem:[#allocation19_spill] sm:$0xff] %v9945_v18  ;;  %v4715_v13 = vsel %vm297_vm0, 0.0, %v4714_v56  ;;  %v9980_v56 = vperm.slane %v4833_v58, %v12593_v12 }
 0x526   : > { %12602 = vst [vmem:[#allocation32_spill] sm:$0xff] %v9950_v31  ;;  %v9994_v58 = vperm.slane %v4715_v13, %v12593_v12 }
 0x527   : > { %12603 = vst [vmem:[#allocation33_spill] sm:$0xff] %v9953_v63 }
 0x528   : > { %12606 = vst [vmem:[#allocation40_spill] sm:$0xff] %v9970_v37 }
 0x529   : > { %5330 = vrot.lane.b32.xlu0 %v9809_v51, %s6911_s8  ;;  %5328 = vrot.lane.b32.xlu2 %v4687_v48, %s6911_s8  ;;  %v9941_v48 = vperm.slane %v9526_v5, %v12593_v12  ;;  %v9960_v5 = vperm.slane %v4693_v32, %v12593_v12  ;;  %12608 = vst [vmem:[#allocation36_spill] sm:$0xff] %v9980_v56 }
 0x52a   : > { %12610 = vst [vmem:[#allocation20_spill] sm:$0xff] %v9994_v58 }
 0x52b   : > { %5310 = vrot.lane.b32.xlu1 %v12588_v60, %s6911_s8  ;;  %v9929_v60 = vperm.slane %v4686_v54, %v12593_v12  ;;  %12599 = vst [vmem:[#allocation30_spill] sm:$0xff] %v9941_v48 }
 0x52c   : > { %12604 = vst [vmem:[#allocation34_spill] sm:$0xff] %v9960_v5 }
 0x52d   : > { %12595 = vst [vmem:[#allocation28_spill] sm:$0xff] %v9929_v60  ;;  %v4760_v62 = vrot.slane %v9929_v60, 4 }
 0x52f   : > { %v4761_v29 = vsel %vm297_vm0, %v9950_v31, %v4760_v62 }
 0x531   : > { %6500 = vrot.lane.b32.xlu0 %v12592_v55, %s6911_s8  ;;  %6495 = vrot.lane.b32.xlu2 %v6494_v7, %s6912_s28  ;;  %v12597_v7 = vld [vmem:[#allocation29_spill] sm:$0xff]  ;;  %v4868_v55 = vrot.slane %v9922_v9, 4 }
 0x532   : > { %v9937_v50 = vperm.slane %v12597_v7, %v12593_v12  ;;  %v4724_v7 = vrot.slane %v9809_v51, 4  ;;  %v6368_v51 = vunpack.i.h.bf16 %v9912_v15 }
 0x533   : > { %6520 = vrot.lane.b32.xlu1 %v12596_v47, %s6902_s16  ;;  %v9957_v47 = vpop.permute.xlu1 %6360  ;;  %v4869_v32 = vsel %vm297_vm0, %v9941_v48, %v4868_v55  ;;  %v6356_v21 = vpop.permute.xlu0 %6355  ;;  %v6367_v55 = vunpack.i.l.bf16 %v9912_v15 }
 0x534   : > { %12598 = vst [vmem:[#allocation26_spill] sm:$0xff] %v9937_v50  ;;  %v9983_v35 = vpop.permute.xlu2 %6380  ;;  %v10009_v0 = vperm.slane %v4869_v32, %v12536_v30  ;;  %v6358_v13 = vunpack.i.h.bf16 %v6356_v21  ;;  %v4845_v62 = vsel %vm297_vm0, %v9937_v50, %v4844_v1  ;;  %v6357_v4 = vunpack.i.l.bf16 %v6356_v21 }
 0x535   : > { %v6383_v32 = vunpack.i.h.bf16 %v9983_v35  ;;  %v6382_v16 = vunpack.i.l.bf16 %v9983_v35  ;;  %v10034_v21 = vsel %vm297_vm0, %v10021_v33, %v3938_v3  ;;  %v10037_v53 = vperm.slane %v4845_v62, %v12536_v30 }
 0x536   : > { %12612 = vst [vmem:[#allocation11_spill] sm:$0xff] %v10009_v0  ;;  %v4894_v15 = vrot.slane %v10009_v0, 4  ;;  %v3226_v35 = vrot.slane %v6358_v13, 4  ;;  %v3116_v31 = vrot.slane %v6367_v55, 4  ;;  %v3118_v60 = vrot.slane %v6357_v4, 4 }
 0x537   : > { %12616 = vst [vmem:[#allocation18_spill] sm:$0xff] %v10037_v53  ;;  %v12617_v3 = vpack.i.bf16 %v9636_v23, %v9708_v8  ;;  %v12618_v62 = vpack.i.bf16 %v9743_v41, %v9729_v39  ;;  %v3150_v45 = vrot.slane %v6382_v16, 4  ;;  %v12622_v8 = vpack.i.bf16 %v9662_v24, %v9723_v59 }
 0x538   : > { %v3117_v50 = vsel %vm297_vm0, %v3116_v31, %v6357_v4  ;;  %v3227_v31 = vsel %vm297_vm0, %v6368_v51, %v3226_v35  ;;  %v12624_v59 = vunpack.i.l.bf16 %v9957_v47  ;;  %v3155_v41 = vperm.slane %v6382_v16, %v12593_v12 }
 0x539   : > { %5326 = vrot.lane.b32.xlu2 %v4686_v54, %s6911_s8  ;;  %6505 = vrot.lane.b32.xlu0 %v12609_v26, %s6905_s23  ;;  %v4725_v54 = vsel %vm297_vm0, 0.0, %v4724_v7  ;;  %v10015_v7 = vperm.slane %v4761_v29, %v12536_v30  ;;  %v10030_v29 = vsel %vm297_vm0, %v9998_v49, %v3830_v46  ;;  %v3224_v26 = vrot.slane %v6368_v51, 4  ;;  %s242_s8 = scalar_lea.vmem [#allocation7], %s5888_s11 }
 0x53a   : > { %v3151_v35 = vsel %vm297_vm0, 0.0, %v3150_v45  ;;  %s5808_s28 = sshll.u32 %s242_s8, 4  ;;  %s5809_s28 = int_to_ptr.vmem [resolvable:$true] %s5808_s28 }
 0x53b   : > { %6535 = vrot.lane.b32.xlu1 %v6534_v11, %s6903_s17  ;;  %12613 = vst [vmem:[#allocation24_spill] sm:$0xff] %v10015_v7  ;;  %v10024_v11 = vperm.slane %v4725_v54, %v12593_v12  ;;  %v4786_v19 = vrot.slane %v10015_v7, 4  ;;  %v3225_v46 = vsel %vm297_vm0, %v3224_v26, %v6358_v13  ;;  %v3258_v54 = vrot.slane %v6383_v32, 4  ;;  %v12620_v13 = vld [vmem:[#allocation31_spill] sm:$0xff] }
 0x53c   : > { %v6376_v1 = vpop.permute.xlu1 %6375  ;;  %v10054_v7 = vperm.slane %v9887_v36, %v12536_v30  ;;  %v10058_v26 = vperm.slane %v12620_v13, %v12536_v30  ;;  %v10061_v23 = vpop.permute.xlu2 %6390  ;;  %v10073_v36 = vsel %vm297_vm0, %v4894_v15, %v10037_v53  ;;  %v10081_v4 = vperm.slane %v3225_v46, %v12593_v12 }
 0x53d   : > { %12615 = vst [vmem:[#allocation15_spill] sm:$0xff] %v10024_v11  ;;  %v6378_v48 = vunpack.i.h.bf16 %v6376_v1  ;;  %v6377_v9 = vunpack.i.l.bf16 %v6376_v1  ;;  %v12623_v1 = vunpack.i.h.bf16 %v9957_v47  ;;  %v3119_v15 = vsel %vm297_vm0, %v6367_v55, %v3118_v60 }
 0x53e   : > { %12619 = vst [vmem:[#allocation14_spill] sm:$0xff] %v10054_v7  ;;  %v10085_v24 = vsel %vm297_vm0, %v4786_v19, %v10054_v7  ;;  %v3263_v13 = vperm.slane %v6383_v32, %v12593_v12  ;;  %v3259_v51 = vsel %vm297_vm0, 0.0, %v3258_v54  ;;  %v10099_v19 = vperm.slane %v3227_v31, %v12593_v12 }
 0x53f   : > { %12621 = vst [vmem:[#allocation37_spill] sm:$0xff] %v10058_v26  ;;  %v3140_v46 = vrot.slane %v6377_v9, 4  ;;  %v10106_v32 = vperm.slane %v3119_v15, %v12593_v12  ;;  %v3267_v45 = vperm.slane %v3259_v51, %v12593_v12  ;;  %v3159_v31 = vperm.slane %v3151_v35, %v12593_v12 }
 0x540   : > { %v3292_v7 = vrot.slane %v3263_v13, 4  ;;  %v12626_v15 = vpack.i.bf16 %v9812_v22, %v9803_v25  ;;  %v12627_v25 = vpack.i.bf16 %v9748_v20, %v9781_v27  ;;  %v12628_v20 = vunpack.i.h.bf16 %v10061_v23 }
 0x541   : > { %6510 = vrot.lane.b32.xlu0 %v12617_v3, %s6905_s23  ;;  %6515 = vrot.lane.b32.xlu2 %v12618_v62, %s6906_s25  ;;  %v10077_v3 = vrot.slane %v12623_v1, 4  ;;  %v10089_v62 = vrot.slane %v12624_v59, 4  ;;  %v10094_v1 = vperm.slane %v3117_v50, %v12593_v12  ;;  %v3253_v59 = vperm.slane %v6378_v48, %v12593_v12 }
 0x542   : > { %v3145_v50 = vperm.slane %v6377_v9, %v12593_v12  ;;  %v3141_v51 = vsel %vm297_vm0, 0.0, %v3140_v46  ;;  %v3304_v63 = vrot.slane %v3267_v45, 4  ;;  %v3196_v58 = vrot.slane %v3159_v31, 4 }
 0x543   : > { %6550 = vrot.lane.b32.xlu1 %v12622_v8, %s6902_s16  ;;  %v10067_v39 = vpop.permute.xlu0 %6370  ;;  %v3248_v8 = vrot.slane %v6378_v48, 4  ;;  %v12625_v48 = vpack.i.bf16 %v9789_v42, %v9786_v17  ;;  %v3162_v26 = vrot.slane %v10094_v1, 4  ;;  %v3184_v17 = vrot.slane %v3155_v41, 4 }
 0x544   : > { %v6373_v60 = vunpack.i.h.bf16 %v10067_v39  ;;  %v12267_v54 = vunpack.i.l.bf16 %v10067_v39  ;;  %v3294_v42 = vrot.slane %v3253_v59, 4  ;;  %v3293_v55 = vsel %vm297_vm0, %v3292_v7, %v3253_v59  ;;  %v10139_v5 = vpop.permute.xlu2 %6405 }
 0x545   : > { %v3249_v16 = vsel %vm297_vm0, 0.0, %v3248_v8  ;;  %v10126_v8 = vpop.permute.xlu1 %6385  ;;  %v3149_v0 = vperm.slane %v3141_v51, %v12593_v12  ;;  %v3185_v53 = vsel %vm297_vm0, %v3184_v17, %v3145_v50  ;;  %v3560_v27 = vrot.slane %v12628_v20, 4 }
 0x546   : > { %v3128_v35 = vrot.slane %v12267_v54, 4  ;;  %v3257_v46 = vperm.slane %v3249_v16, %v12593_v12  ;;  %v3186_v54 = vrot.slane %v3145_v50, 4  ;;  %v12630_v16 = vunpack.i.l.bf16 %v9957_v47 }
 0x547   : > { %v3295_v59 = vsel %vm297_vm0, %v3263_v13, %v3294_v42  ;;  %v10150_v9 = vperm.slane %v3293_v55, %v12536_v30  ;;  %v12632_v50 = vunpack.i.h.bf16 %v9957_v47  ;;  %v6388_v17 = vunpack.i.h.bf16 %v10126_v8 }
 0x548   : > { %v3129_v7 = vsel %vm297_vm0, %v3128_v35, %v12630_v16  ;;  %v3305_v20 = vsel %vm297_vm0, %v3304_v63, %v3257_v46  ;;  %v3306_v11 = vrot.slane %v3257_v46, 4  ;;  %v10159_v37 = vperm.slane %v3185_v53, %v12536_v30 }
 0x549   : > { %6530 = vrot.lane.b32.xlu0 %v12625_v48, %s6900_s13  ;;  %6525 = vrot.lane.b32.xlu2 %v12626_v15, %s6904_s29  ;;  %v3236_v48 = vrot.slane %v6373_v60, 4  ;;  %12631 = vst [vmem:[#allocation35_spill] sm:$0xff] %v10150_v9  ;;  %v3197_v35 = vsel %vm297_vm0, %v3196_v58, %v3149_v0  ;;  %v3198_v13 = vrot.slane %v3149_v0, 4  ;;  %v10163_v55 = vperm.slane %v3129_v7, %v12593_v12 }
 0x54a   : > { %12633 = vst [vmem:[#allocation23_spill] sm:$0xff] %v10159_v37  ;;  %v12634_v47 = vpack.i.bf16 %v9842_v57, %v9820_v14  ;;  %v12635_v63 = vpack.i.bf16 %v9832_v10, %v9829_v28  ;;  %v10174_v53 = vperm.slane %v3295_v59, %v12536_v30  ;;  %v6387_v0 = vunpack.i.l.bf16 %v10126_v8 }
 0x54b   : > { %6565 = vrot.lane.b32.xlu1 %v12627_v25, %s6903_s17  ;;  %v6396_v22 = vpop.permute.xlu0 %6395  ;;  %v12629_v25 = vunpack.i.l.bf16 %v10061_v23  ;;  %v3237_v51 = vsel %vm297_vm0, %v3236_v48, %v12632_v50  ;;  %v3239_v57 = vsel %vm297_vm0, %v6373_v60, %v10077_v3  ;;  %v3548_v48 = vrot.slane %v6388_v17, 4 }
 0x54c   : > { %v6398_v42 = vunpack.i.h.bf16 %v6396_v22  ;;  %12636 = vst [vmem:[#allocation12_spill] sm:$0xff] %v10174_v53  ;;  %v10177_v58 = vperm.slane %v3237_v51, %v12593_v12  ;;  %v10187_v28 = vsel %vm297_vm0, %v3267_v45, %v3306_v11  ;;  %v10193_v46 = vperm.slane %v3197_v35, %v12536_v30  ;;  %v10213_v35 = vpop.permute.xlu2 %6425 }
 0x54d   : > { %v3452_v15 = vrot.slane %v12629_v25, 4  ;;  %v3187_v25 = vsel %vm297_vm0, %v3155_v41, %v3186_v54  ;;  %v6397_v41 = vunpack.i.l.bf16 %v6396_v22  ;;  %v10181_v54 = vperm.slane %v3305_v20, %v12536_v30  ;;  %v6401_v22 = vpop.permute.xlu1 %6400 }
 0x54e   : > { %v10190_v10 = vperm.slane %v3187_v25, %v12536_v30  ;;  %12638 = vst [vmem:[#allocation10_spill] sm:$0xff] %v10193_v46  ;;  %v3546_v8 = vrot.slane %v6398_v42, 4  ;;  %v10196_v16 = vsel %vm297_vm0, %v3159_v31, %v3198_v13  ;;  %v3163_v3 = vsel %vm297_vm0, %v10163_v55, %v3162_v26 }
 0x54f   : > { %12637 = vst [vmem:[#allocation17_spill] sm:$0xff] %v10181_v54  ;;  %v3549_v60 = vsel %vm297_vm0, %v6398_v42, %v3548_v48  ;;  %v10205_v45 = vperm.slane %v3239_v57, %v12593_v12  ;;  %v12639_v59 = vrot.slane %v10081_v4, 4  ;;  %v3440_v51 = vrot.slane %v6387_v0, 4 }
 0x550   : > { %v3438_v31 = vrot.slane %v6397_v41, 4  ;;  %v6408_v20 = vunpack.i.h.bf16 %v10139_v5  ;;  %v6407_v25 = vunpack.i.l.bf16 %v10139_v5  ;;  %v6403_v26 = vunpack.i.h.bf16 %v6401_v22 }
 0x551   : > { %6560 = vrot.lane.b32.xlu0 %v12634_v47, %s6900_s13  ;;  %6540 = vrot.lane.b32.xlu2 %v12635_v63, %s6901_s15  ;;  %v3271_v50 = vsel %vm297_vm0, %v10177_v58, %v12639_v59  ;;  %v6402_v13 = vunpack.i.l.bf16 %v6401_v22  ;;  %v3441_v42 = vsel %vm297_vm0, %v6397_v41, %v3440_v51  ;;  %v3547_v47 = vsel %vm297_vm0, %v3546_v8, %v6388_v17 }
 0x552   : > { %v10218_v63 = vperm.slane %v3549_v60, %v12593_v12  ;;  %v10221_v57 = vperm.slane %v3163_v3, %v12536_v30  ;;  %v3558_v48 = vrot.slane %v6403_v26, 4  ;;  %v3561_v59 = vsel %vm297_vm0, %v6403_v26, %v3560_v27 }
 0x553   : > { %v10202_v11 = vpop.permute.xlu0 %6410  ;;  %v3450_v7 = vrot.slane %v6402_v13, 4  ;;  %v10225_v5 = vperm.slane %v3271_v50, %v12536_v30  ;;  %v12640_v22 = vpack.i.bf16 %v10034_v21, %v10030_v29  ;;  %v3439_v17 = vsel %vm297_vm0, %v3438_v31, %v6387_v0 }
 0x554   : > { %v10233_v41 = vperm.slane %v3561_v59, %v12593_v12  ;;  %v3453_v8 = vsel %vm297_vm0, %v6402_v13, %v3452_v15  ;;  %v3212_v3 = vrot.slane %v10190_v10, 4  ;;  %v12641_v27 = vunpack.i.h.bf16 %v10061_v23 }
 0x555   : > { %v12642_v50 = vunpack.i.l.bf16 %v10061_v23  ;;  %v10244_v29 = vperm.slane %v3453_v8, %v12593_v12  ;;  %v3320_v21 = vrot.slane %v10174_v53, 4  ;;  %v10257_v23 = vperm.slane %v3441_v42, %v12593_v12  ;;  %v10314_v56 = vpop.permute.xlu1 %6420 }
 0x556   : > { %v3559_v60 = vsel %vm297_vm0, %v3558_v48, %v12641_v27  ;;  %v3602_v15 = vrot.slane %v10233_v41, 4  ;;  %v3213_v26 = vsel %vm297_vm0, %v3212_v3, %v10221_v57  ;;  %v6413_v48 = vunpack.i.h.bf16 %v10202_v11 }
 0x557   : > { %v3451_v51 = vsel %vm297_vm0, %v3450_v7, %v12642_v50  ;;  %v10248_v0 = vperm.slane %v3559_v60, %v12593_v12  ;;  %v3494_v7 = vrot.slane %v10244_v29, 4  ;;  %v3321_v13 = vsel %vm297_vm0, %v3320_v21, %v10225_v5 }
 0x558   : > { %v10252_v31 = vperm.slane %v3451_v51, %v12593_v12  ;;  %v10264_v59 = vperm.slane %v3439_v17, %v12593_v12  ;;  %v12643_v42 = vunpack.i.l.bf16 %v10067_v39  ;;  %v10281_v17 = vsel %vm297_vm0, %v3602_v15, %v10218_v63 }
 0x559   : > { %6545 = vrot.lane.b32.xlu2 %v12640_v22, %s6906_s25  ;;  %v10267_v22 = vperm.slane %v3547_v47, %v12593_v12  ;;  %v3590_v8 = vrot.slane %v10248_v0, 4  ;;  %v10277_v60 = vsel %vm297_vm0, %v3494_v7, %v10257_v23  ;;  %v6574_v50 = vpack.i.bf16 %v3321_v13, %v3213_v26  ;;  %v10299_v13 = vpop.permute.xlu2 %6440 }
 0x55a   : > { %v3482_v3 = vrot.slane %v10252_v31, 4  ;;  %v3131_v27 = vsel %vm297_vm0, %v12643_v42, %v10089_v62  ;;  %v3160_v51 = vrot.slane %v10163_v55, 4  ;;  %v3570_v21 = vrot.slane %v6408_v20, 4 }
 0x55b   : > { %v10283_v47 = vpop.permute.xlu0 %6415  ;;  %v10292_v39 = vsel %vm297_vm0, %v3590_v8, %v10267_v22  ;;  %v3462_v62 = vrot.slane %v6407_v25, 4  ;;  %6575 = vrot.lane.b32.xlu1 %v6574_v50, %s6905_s23  ;;  %v3580_v7 = vrot.slane %v6413_v48, 4  ;;  %v10296_v15 = vperm.slane %v6413_v48, %v12593_v12 }
 0x55c   : > { %v10288_v14 = vsel %vm297_vm0, %v3482_v3, %v10264_v59  ;;  %12645 = vst [vmem:[#allocation16_spill] sm:$0xff] %v10292_v39  ;;  %v6412_v26 = vunpack.i.l.bf16 %v10202_v11  ;;  %v12646_v55 = vpack.i.bf16 %v9869_v6, %v9863_v61  ;;  %v3139_v3 = vperm.slane %v3131_v27, %v12593_v12 }
 0x55d   : > { %12644 = vst [vmem:[#allocation29_spill] sm:$0xff] %v10288_v14  ;;  %v3268_v8 = vrot.slane %v10177_v58, 4  ;;  %v3280_v42 = vrot.slane %v10205_v45, 4  ;;  %v10309_v50 = vperm.slane %v6408_v20, %v12593_v12  ;;  %v3581_v48 = vsel %vm297_vm0, 0.0, %v3580_v7 }
 0x55e   : > { %v3614_v11 = vrot.slane %v10296_v15, 4  ;;  %v3472_v39 = vrot.slane %v6412_v26, 4  ;;  %v3477_v14 = vperm.slane %v6412_v26, %v12593_v12  ;;  %v3161_v61 = vsel %vm297_vm0, %v3160_v51, %v10094_v1 }
 0x55f   : > { %v3571_v6 = vsel %vm297_vm0, 0.0, %v3570_v21  ;;  %v3467_v58 = vperm.slane %v6407_v25, %v12593_v12  ;;  %v10321_v27 = vperm.slane %v3581_v48, %v12593_v12  ;;  %v3463_v20 = vsel %vm297_vm0, 0.0, %v3462_v62 }
 0x560   : > { %v3473_v7 = vsel %vm297_vm0, 0.0, %v3472_v39  ;;  %v10327_v26 = vsel %vm297_vm0, %v3614_v11, %v10309_v50  ;;  %v12647_v18 = vrot.slane %v10106_v32, 4  ;;  %v12648_v51 = vrot.slane %v10099_v19, 4 }
 0x561   : > { %6555 = vrot.lane.b32.xlu2 %v12646_v55, %s6904_s29  ;;  %v3506_v55 = vrot.slane %v3477_v14, 4  ;;  %v3626_v21 = vrot.slane %v10321_v27, 4  ;;  %v3481_v62 = vperm.slane %v3473_v7, %v12593_v12  ;;  %v3172_v48 = vrot.slane %v3139_v3, 4 }
 0x562   : > { %v3175_v1 = vsel %vm297_vm0, %v3139_v3, %v12647_v18  ;;  %v3283_v25 = vsel %vm297_vm0, %v10205_v45, %v12648_v51  ;;  %v3579_v39 = vperm.slane %v3571_v6, %v12593_v12  ;;  %v10341_v11 = vperm.slane %v3161_v61, %v12536_v30 }
 0x563   : > { %v3507_v40 = vsel %vm297_vm0, %v3506_v55, %v3467_v58  ;;  %v3471_v52 = vperm.slane %v3463_v20, %v12593_v12  ;;  %v3496_v18 = vrot.slane %v10257_v23, 4  ;;  %v3604_v2 = vrot.slane %v10218_v63, 4  ;;  %v10357_v61 = vpop.permute.xlu0 %6430 }
 0x564   : > { %12649 = vst [vmem:[#allocation31_spill] sm:$0xff] %v10341_v11  ;;  %v3518_v33 = vrot.slane %v3481_v62, 4  ;;  %v10347_v45 = vperm.slane %v3175_v1, %v12536_v30  ;;  %v3269_v3 = vsel %vm297_vm0, %v3268_v8, %v10081_v4  ;;  %v10352_v6 = vperm.slane %v3283_v25, %v12536_v30 }
 0x565   : > { %v10355_v7 = vsel %vm297_vm0, %v3626_v21, %v3579_v39  ;;  %v12653_v23 = vpack.i.bf16 %v9879_v43, %v9872_v44  ;;  %v3281_v63 = vsel %vm297_vm0, %v3280_v42, %v10099_v19  ;;  %v12283_v20 = vunpack.i.h.bf16 %v10213_v35  ;;  %v10375_v43 = vpop.permute.xlu2 %5324 }
 0x566   : > { %12650 = vst [vmem:[#allocation41_spill] sm:$0xff] %v10347_v45  ;;  %v12282_v4 = vunpack.i.l.bf16 %v10213_v35  ;;  %v10368_v8 = vsel %vm297_vm0, %v3518_v33, %v3471_v52  ;;  %v3173_v55 = vsel %vm297_vm0, %v3172_v48, %v10106_v32  ;;  %v3616_v1 = vrot.slane %v10309_v50, 4  ;;  %v10386_v48 = vpop.permute.xlu1 %6435 }
 0x567   : > { %12651 = vst [vmem:[#allocation42_spill] sm:$0xff] %v10352_v6  ;;  %v3484_v51 = vrot.slane %v10264_v59, 4  ;;  %v3210_v44 = vrot.slane %v10341_v11, 4  ;;  %v3592_v19 = vrot.slane %v10267_v22, 4  ;;  %v3497_v42 = vsel %vm297_vm0, %v10244_v29, %v3496_v18 }
 0x568   : > { %12652 = vst [vmem:[#allocation43_spill] sm:$0xff] %v10355_v7  ;;  %v3605_v33 = vsel %vm297_vm0, %v10233_v41, %v3604_v2  ;;  %v10383_v25 = vperm.slane %v3269_v3, %v12536_v30  ;;  %v3628_v32 = vrot.slane %v3579_v39, 4  ;;  %v3508_v21 = vrot.slane %v3467_v58, 4 }
 0x569   : > { %6570 = vrot.lane.b32.xlu2 %v12653_v23, %s6901_s15  ;;  %12654 = vst [vmem:[#allocation44_spill] sm:$0xff] %v10368_v8  ;;  %v3520_v50 = vrot.slane %v3471_v52, 4  ;;  %v6443_v59 = vunpack.i.h.bf16 %v10299_v13  ;;  %v4178_v23 = vrot.slane %v12283_v20, 4  ;;  %v4070_v22 = vrot.slane %v12282_v4, 4 }
 0x56a   : > { %12655 = vst [vmem:[#allocation45_spill] sm:$0xff] %v10383_v25  ;;  %v3211_v29 = vsel %vm297_vm0, %v10159_v37, %v3210_v44  ;;  %v3318_v2 = vrot.slane %v10383_v25, 4  ;;  %v10397_v41 = vsel %vm297_vm0, %v10252_v31, %v3484_v51  ;;  %v10400_v52 = vperm.slane %v3497_v42, %v12536_v30 }
 0x56b   : > { %v10403_v58 = vperm.slane %v3605_v33, %v12536_v30  ;;  %v3509_v39 = vsel %vm297_vm0, %v3477_v14, %v3508_v21  ;;  %v10408_v18 = vperm.slane %v10277_v60, %v12536_v30  ;;  %v10412_v3 = vsel %vm297_vm0, %v10248_v0, %v3592_v19 }
 0x56c   : > { %12656 = vst [vmem:[#allocation46_spill] sm:$0xff] %v10400_v52  ;;  %v10416_v31 = vperm.slane %v10281_v17, %v12536_v30  ;;  %v3319_v51 = vsel %vm297_vm0, %v10150_v9, %v3318_v2  ;;  %v3617_v44 = vsel %vm297_vm0, %v10296_v15, %v3616_v1  ;;  %v4212_v42 = vrot.slane %v6443_v59, 4  ;;  %v10436_v1 = vpop.permute.xlu0 %6450 }
 0x56d   : > { %12657 = vst [vmem:[#allocation47_spill] sm:$0xff] %v10403_v58  ;;  %v6442_v14 = vunpack.i.l.bf16 %v10299_v13  ;;  %v6604_v33 = vpack.i.bf16 %v3319_v51, %v3211_v29  ;;  %v10424_v60 = vperm.slane %v3509_v39, %v12536_v30  ;;  %v6418_v17 = vunpack.i.h.bf16 %v10283_v47  ;;  %v10453_v19 = vpop.permute.xlu2 %6460 }
 0x56e   : > { %12658 = vst [vmem:[#allocation48_spill] sm:$0xff] %v10408_v18  ;;  %v3521_v21 = vsel %vm297_vm0, %v3481_v62, %v3520_v50  ;;  %v6417_v2 = vunpack.i.l.bf16 %v10283_v47  ;;  %v6438_v15 = vunpack.i.h.bf16 %v10386_v48  ;;  %v10434_v13 = vperm.slane %v3173_v55, %v12536_v30  ;;  %v10466_v4 = vpop.permute.xlu1 %6445 }
 0x56f   : > { %12659 = vst [vmem:[#allocation49_spill] sm:$0xff] %v10416_v31  ;;  %6605 = vrot.lane.b32.xlu0 %v6604_v33, %s6906_s25  ;;  %v10440_v29 = vperm.slane %v10327_v26, %v12536_v30  ;;  %v10443_v39 = vperm.slane %v3617_v44, %v12536_v30  ;;  %v3629_v62 = vsel %vm297_vm0, %v10321_v27, %v3628_v32  ;;  %v4213_v55 = vsel %vm297_vm0, 0.0, %v4212_v42 }
 0x570   : > { %12660 = vst [vmem:[#allocation50_spill] sm:$0xff] %v10434_v13  ;;  %v4217_v50 = vperm.slane %v6443_v59, %v12593_v12  ;;  %v10449_v47 = vperm.slane %v3507_v40, %v12536_v30  ;;  %v4104_v51 = vrot.slane %v6442_v14, 4  ;;  %v3216_v33 = vrot.slane %v10193_v46, 4 }
 0x571   : > { %12661 = vst [vmem:[#allocation51_spill] sm:$0xff] %v10440_v29  ;;  %v10456_v26 = vperm.slane %v3521_v21, %v12536_v30  ;;  %v4180_v0 = vrot.slane %v6418_v17, 4  ;;  %v10460_v27 = vperm.slane %v3281_v63, %v12536_v30  ;;  %v4072_v32 = vrot.slane %v6417_v2, 4 }
 0x572   : > { %12662 = vst [vmem:[#allocation52_spill] sm:$0xff] %v10449_v47  ;;  %v4207_v40 = vperm.slane %v6438_v15, %v12593_v12  ;;  %v3217_v59 = vsel %vm297_vm0, %v3216_v33, %v10434_v13  ;;  %v3324_v42 = vrot.slane %v10181_v54, 4  ;;  %v10469_v20 = vperm.slane %v3629_v62, %v12536_v30 }
 0x573   : > { %12663 = vst [vmem:[#allocation53_spill] sm:$0xff] %v10456_v26  ;;  %v10473_v44 = vperm.slane %v4213_v55, %v12593_v12  ;;  %v4202_v63 = vrot.slane %v6438_v15, 4  ;;  %v4105_v37 = vsel %vm297_vm0, 0.0, %v4104_v51  ;;  %v4179_v11 = vsel %vm297_vm0, %v4178_v23, %v6418_v17 }
 0x574   : > { %12664 = vst [vmem:[#allocation54_spill] sm:$0xff] %v10460_v27  ;;  %v6437_v9 = vunpack.i.l.bf16 %v10386_v48  ;;  %v3325_v33 = vsel %vm297_vm0, %v3324_v42, %v10460_v27  ;;  %v4071_v25 = vsel %vm297_vm0, %v4070_v22, %v6417_v2  ;;  %v12666_v62 = vunpack.i.h.bf16 %v10213_v35  ;;  %v10509_v42 = vpop.permute.xlu0 %5316 }
 0x575   : > { %12665 = vst [vmem:[#allocation55_spill] sm:$0xff] %v10469_v20  ;;  %v6614_v21 = vpack.i.bf16 %v3325_v33, %v3217_v59  ;;  %v12294_v55 = vunpack.i.l.bf16 %v10357_v61  ;;  %v4246_v47 = vrot.slane %v4217_v50, 4  ;;  %v4109_v15 = vperm.slane %v6442_v14, %v12593_v12  ;;  %v10522_v59 = vpop.permute.xlu2 %5322 }
 0x576   : > { %v4181_v29 = vsel %vm297_vm0, %v12666_v62, %v4180_v0  ;;  %v12667_v51 = vunpack.i.l.bf16 %v10213_v35  ;;  %v4248_v48 = vrot.slane %v4207_v40, 4  ;;  %v10490_v17 = vperm.slane %v4105_v37, %v12593_v12 }
 0x577   : > { %v12668_v22 = vunpack.i.h.bf16 %v10314_v56  ;;  %v4203_v0 = vsel %vm297_vm0, 0.0, %v4202_v63  ;;  %6615 = vrot.lane.b32.xlu0 %v6614_v21, %s6904_s29  ;;  %v10500_v14 = vperm.slane %v4071_v25, %v12593_v12  ;;  %v10503_v35 = vperm.slane %v4179_v11, %v12593_v12 }
 0x578   : > { %v4073_v23 = vsel %vm297_vm0, %v12667_v51, %v4072_v32  ;;  %v10506_v32 = vperm.slane %v4181_v29, %v12593_v12  ;;  %v4099_v37 = vperm.slane %v6437_v9, %v12593_v12  ;;  %v4258_v33 = vrot.slane %v10473_v44, 4 }
 0x579   : > { %v10494_v2 = vrot.slane %v12668_v22, 4  ;;  %v12669_v63 = vunpack.i.l.bf16 %v10314_v56  ;;  %v10515_v62 = vperm.slane %v4073_v23, %v12593_v12  ;;  %v4082_v25 = vrot.slane %v12294_v55, 4 }
 0x57a   : > { %v4211_v11 = vperm.slane %v4203_v0, %v12593_v12  ;;  %v4247_v29 = vsel %vm297_vm0, %v4246_v47, %v4207_v40  ;;  %v4249_v51 = vsel %vm297_vm0, %v4217_v50, %v4248_v48  ;;  %v4094_v22 = vrot.slane %v6437_v9, 4  ;;  %v10531_v40 = vpop.permute.xlu1 %6455 }
 0x57b   : > { %v4084_v21 = vrot.slane %v12669_v63, 4  ;;  %v4138_v54 = vrot.slane %v4109_v15, 4  ;;  %v12670_v23 = vunpack.i.h.bf16 %v10357_v61  ;;  %v4116_v13 = vrot.slane %v10500_v14, 4 }
 0x57c   : > { %v4224_v55 = vrot.slane %v10503_v35, 4  ;;  %v4140_v47 = vrot.slane %v4099_v37, 4  ;;  %v10535_v50 = vperm.slane %v4247_v29, %v12536_v30  ;;  %v10538_v48 = vperm.slane %v4249_v51, %v12536_v30 }
 0x57d   : > { %v4190_v27 = vrot.slane %v12670_v23, 4  ;;  %v4083_v23 = vsel %vm297_vm0, %v4082_v25, %v12669_v63  ;;  %v4259_v46 = vsel %vm297_vm0, %v4258_v33, %v4211_v11  ;;  %v4260_v31 = vrot.slane %v4211_v11, 4 }
 0x57e   : > { %12671 = vst [vmem:[#allocation56_spill] sm:$0xff] %v10535_v50  ;;  %v4095_v0 = vsel %vm297_vm0, 0.0, %v4094_v22  ;;  %v6448_v7 = vunpack.i.h.bf16 %v10466_v4  ;;  %v12673_v18 = vunpack.i.h.bf16 %v10314_v56  ;;  %v6447_v29 = vunpack.i.l.bf16 %v10466_v4 }
 0x57f   : > { %12672 = vst [vmem:[#allocation57_spill] sm:$0xff] %v10538_v48  ;;  %v10552_v51 = vperm.slane %v10196_v16, %v12536_v30  ;;  %v3222_v8 = vrot.slane %v10347_v45, 4  ;;  %v4141_v25 = vsel %vm297_vm0, %v4109_v15, %v4140_v47  ;;  %v10557_v33 = vperm.slane %v4083_v23, %v12593_v12  ;;  %v10575_v23 = vpop.permute.xlu0 %6465 }
 0x580   : > { %v4191_v9 = vsel %vm297_vm0, %v4190_v27, %v12673_v18  ;;  %v6463_v11 = vunpack.i.h.bf16 %v10453_v19  ;;  %v5146_v22 = vrot.slane %v6448_v7, 4  ;;  %v5144_v63 = vrot.slane %v6447_v29, 4  ;;  %v10592_v27 = vpop.permute.xlu2 %6475 }
 0x581   : > { %12674 = vst [vmem:[#allocation58_spill] sm:$0xff] %v10552_v51  ;;  %v3223_v56 = vsel %vm297_vm0, %v10552_v51, %v3222_v8  ;;  %v10564_v4 = vperm.slane %v10187_v28, %v12536_v30  ;;  %v3330_v16 = vrot.slane %v10352_v6, 4  ;;  %v10568_v18 = vperm.slane %v4259_v46, %v12536_v30 }
 0x582   : > { %v10572_v15 = vperm.slane %v4191_v9, %v12593_v12  ;;  %v5147_v47 = vsel %vm297_vm0, %v6447_v29, %v5146_v22  ;;  %v4139_v8 = vsel %vm297_vm0, %v4138_v54, %v4099_v37  ;;  %v5145_v49 = vsel %vm297_vm0, %v5144_v63, %v6448_v7 }
 0x583   : > { %12675 = vst [vmem:[#allocation59_spill] sm:$0xff] %v10564_v4  ;;  %v5155_v28 = vperm.slane %v5147_v47, %v12593_v12  ;;  %v3331_v6 = vsel %vm297_vm0, %v10564_v4, %v3330_v16  ;;  %v10584_v46 = vsel %vm297_vm0, %v10473_v44, %v4260_v31  ;;  %v10587_v9 = vperm.slane %v4095_v0, %v12593_v12 }
 0x584   : > { %12676 = vst [vmem:[#allocation60_spill] sm:$0xff] %v10568_v18  ;;  %v10590_v29 = vperm.slane %v4141_v25, %v12536_v30  ;;  %v6629_v22 = vpack.i.bf16 %v3331_v6, %v3223_v56  ;;  %v4117_v54 = vsel %vm297_vm0, %v10557_v33, %v4116_v13  ;;  %v5134_v7 = vrot.slane %v6463_v11, 4  ;;  %v10611_v25 = vpop.permute.xlu1 %5320 }
 0x585   : > { %v10597_v37 = vperm.slane %v5145_v49, %v12593_v12  ;;  %v6457_v63 = vunpack.i.l.bf16 %v10531_v40  ;;  %v10601_v31 = vperm.slane %v4139_v8, %v12536_v30  ;;  %v12679_v44 = vunpack.i.l.bf16 %v10357_v61 }
 0x586   : > { %12677 = vst [vmem:[#allocation61_spill] sm:$0xff] %v10590_v29  ;;  %v4225_v6 = vsel %vm297_vm0, %v10572_v15, %v4224_v55  ;;  %6630 = vrot.lane.b32.xlu0 %v6629_v22, %s6901_s15  ;;  %v3493_v13 = vperm.slane %v10397_v41, %v12536_v30  ;;  %v6462_v49 = vunpack.i.l.bf16 %v10453_v19  ;;  %v5188_v56 = vrot.slane %v5155_v28, 4 }
 0x587   : > { %12678 = vst [vmem:[#allocation62_spill] sm:$0xff] %v10601_v31  ;;  %v4085_v0 = vsel %vm297_vm0, %v12679_v44, %v4084_v21  ;;  %v5132_v16 = vrot.slane %v6457_v63, 4  ;;  %v5135_v47 = vsel %vm297_vm0, %v6457_v63, %v5134_v7  ;;  %v12680_v21 = vrot.slane %v10424_v60, 4 }
 0x588   : > { %v5143_v8 = vperm.slane %v5135_v47, %v12593_v12  ;;  %v3601_v55 = vperm.slane %v10412_v3, %v12536_v30  ;;  %v10622_v22 = vperm.slane %v4117_v54, %v12536_v30  ;;  %v5176_v41 = vrot.slane %v10597_v37, 4 }
 0x589   : > { %v3535_v44 = vsel %vm297_vm0, %v12680_v21, %v3493_v13  ;;  %v5133_v19 = vsel %vm297_vm0, %v5132_v16, %v6463_v11  ;;  %v4166_v45 = vrot.slane %v10590_v29, 4  ;;  %v10628_v7 = vperm.slane %v4225_v6, %v12536_v30 }
 0x58a   : > { %12681 = vst [vmem:[#allocation63_spill] sm:$0xff] %v10622_v22  ;;  %v10631_v63 = vperm.slane %v5133_v19, %v12593_v12  ;;  %v10634_v47 = vsel %vm297_vm0, %v5188_v56, %v5143_v8  ;;  %v5190_v21 = vrot.slane %v5143_v8, 4  ;;  %v12683_v3 = vrot.slane %v10443_v39, 4 }
 0x58b   : > { %12682 = vst [vmem:[#allocation64_spill] sm:$0xff] %v10628_v7  ;;  %v12684_v4 = vrot.slane %v10490_v17, 4  ;;  %v4167_v6 = vsel %vm297_vm0, %v4166_v45, %v10622_v22  ;;  %v4274_v19 = vrot.slane %v10538_v48, 4  ;;  %v12685_v56 = vunpack.i.h.bf16 %v10357_v61 }
 0x58c   : > { %v3643_v54 = vsel %vm297_vm0, %v12683_v3, %v3601_v55  ;;  %v10652_v29 = vsel %vm297_vm0, %v5176_v41, %v10631_v63  ;;  %v10655_v3 = vsel %vm297_vm0, %v5155_v28, %v5190_v21  ;;  %v3536_v51 = vrot.slane %v3493_v13, 4  ;;  %v10667_v13 = vpop.permute.xlu2 %5312 }
 0x58d   : > { %v4151_v11 = vsel %vm297_vm0, %v12684_v4, %v10587_v9  ;;  %v6579_v16 = vpack.i.bf16 %v3643_v54, %v3535_v44  ;;  %v4193_v8 = vsel %vm297_vm0, %v12685_v56, %v10494_v2  ;;  %v10657_v4 = vpop.permute.xlu0 %5332  ;;  %v4093_v44 = vperm.slane %v4085_v0, %v12593_v12 }
 0x58e   : > { %v5166_v45 = vrot.slane %v6462_v49, 4  ;;  %v4275_v61 = vsel %vm297_vm0, %v4274_v19, %v10628_v7  ;;  %v3644_v54 = vrot.slane %v3601_v55, 4  ;;  %v5171_v2 = vperm.slane %v6462_v49, %v12593_v12 }
 0x58f   : > { %6580 = vrot.lane.b32.xlu2 %v6579_v16, %s6905_s23  ;;  %v6584_v56 = vpack.i.bf16 %v4275_v61, %v4167_v6  ;;  %v3537_v41 = vsel %vm297_vm0, %v10424_v60, %v3536_v51  ;;  %v5468_v28 = vrot.slane %v10509_v42, 4  ;;  %v4152_v21 = vrot.slane %v10587_v9, 4  ;;  %v10681_v6 = vpop.permute.xlu1 %6470 }
 0x590   : > { %v4201_v0 = vperm.slane %v4193_v8, %v12593_v12  ;;  %v3645_v16 = vsel %vm297_vm0, %v10443_v39, %v3644_v54  ;;  %v6477_v19 = vunpack.i.l.bf16 %v10592_v27  ;;  %v6452_v49 = vunpack.i.l.bf16 %v10436_v1 }
 0x591   : > { %6585 = vrot.lane.b32.xlu1 %v6584_v56, %s6905_s23  ;;  %v6639_v60 = vpack.i.bf16 %v3645_v16, %v3537_v41  ;;  %v10679_v51 = vsel %vm297_vm0, %v10375_v43, %v5468_v28  ;;  %v10684_v9 = vperm.slane %v4151_v11, %v12536_v30  ;;  %v4126_v8 = vrot.slane %v4093_v44, 4 }
 0x592   : > { %v6453_v39 = vunpack.i.h.bf16 %v10436_v1  ;;  %v3542_v61 = vrot.slane %v10456_v26, 4  ;;  %v5167_v54 = vsel %vm297_vm0, 0.0, %v5166_v45  ;;  %v5200_v55 = vrot.slane %v5171_v2, 4 }
 0x593   : > { %12686 = vst [vmem:[#allocation65_spill] sm:$0xff] %v10684_v9  ;;  %6640 = vrot.lane.b32.xlu0 %v6639_v60, %s6902_s16  ;;  %v5161_v56 = vperm.slane %v6477_v19, %v12593_v12  ;;  %v3650_v41 = vrot.slane %v10469_v20, 4  ;;  %v4114_v28 = vrot.slane %v10557_v33, 4  ;;  %v12687_v16 = vrot.slane %v10515_v62, 4 }
 0x594   : > { %v4222_v48 = vrot.slane %v10572_v15, 4  ;;  %v4234_v1 = vrot.slane %v4201_v0, 4  ;;  %v12688_v26 = vrot.slane %v10506_v32, 4  ;;  %v4512_v7 = vrot.slane %v6452_v49, 4 }
 0x595   : > { %v4129_v11 = vsel %vm297_vm0, %v4093_v44, %v12687_v16  ;;  %v10701_v60 = vsel %vm297_vm0, %v5200_v55, %v5161_v56  ;;  %v5202_v22 = vrot.slane %v5161_v56, 4  ;;  %v10704_v20 = vperm.slane %v5167_v54, %v12593_v12  ;;  %v10719_v54 = vpop.permute.xlu0 %5314 }
 0x596   : > { %v4237_v45 = vsel %vm297_vm0, %v4201_v0, %v12688_v26  ;;  %v4514_v33 = vrot.slane %v6453_v39, 4  ;;  %v3543_v53 = vsel %vm297_vm0, %v3542_v61, %v10400_v52  ;;  %v3651_v15 = vsel %vm297_vm0, %v3650_v41, %v10403_v58 }
 0x597   : > { %v10712_v44 = vsel %vm297_vm0, %v10490_v17, %v4152_v21  ;;  %v10715_v26 = vperm.slane %v4129_v11, %v12536_v30  ;;  %v5178_v0 = vrot.slane %v10631_v63, 4  ;;  %v5203_v55 = vsel %vm297_vm0, %v5171_v2, %v5202_v22 }
 0x598   : > { %v4115_v56 = vsel %vm297_vm0, %v4114_v28, %v10500_v14  ;;  %v10725_v61 = vsel %vm297_vm0, %v4126_v8, %v10515_v62  ;;  %v4223_v17 = vsel %vm297_vm0, %v4222_v48, %v10503_v35  ;;  %v10731_v21 = vsel %vm297_vm0, %v4234_v1, %v10506_v32  ;;  %v5329_v14 = vpop.permute.xlu2 %5328 }
 0x599   : > { %v10734_v63 = vperm.slane %v4237_v45, %v12536_v30  ;;  %v4513_v22 = vsel %vm297_vm0, %v4512_v7, %v6453_v39  ;;  %v6654_v2 = vpack.i.bf16 %v3651_v15, %v3543_v53  ;;  %v5456_v41 = vrot.slane %v10667_v13, 4 }
 0x59a   : > { %v4515_v62 = vsel %vm297_vm0, %v6452_v49, %v4514_v33  ;;  %v10741_v8 = vperm.slane %v5203_v55, %v12536_v30  ;;  %v12309_v35 = vunpack.i.l.bf16 %v10681_v6  ;;  %v10750_v53 = vperm.slane %v4115_v56, %v12536_v30  ;;  %v10757_v49 = vpop.permute.xlu1 %6480 }
 0x59b   : > { %6655 = vrot.lane.b32.xlu0 %v6654_v2, %s6903_s17  ;;  %v10747_v32 = vsel %vm297_vm0, %v10611_v25, %v5456_v41  ;;  %v10753_v48 = vperm.slane %v4223_v17, %v12536_v30  ;;  %v5179_v7 = vsel %vm297_vm0, %v10597_v37, %v5178_v0  ;;  %v10760_v39 = vperm.slane %v4513_v22, %v12593_v12 }
 0x59c   : > { %12689 = vst [vmem:[#allocation66_spill] sm:$0xff] %v10750_v53  ;;  %v6458_v11 = vunpack.i.h.bf16 %v10531_v40  ;;  %v6478_v1 = vunpack.i.h.bf16 %v10592_v27  ;;  %v10766_v45 = vperm.slane %v4515_v62, %v12593_v12  ;;  %v12691_v33 = vrot.slane %v10375_v43, 4 }
 0x59d   : > { %12690 = vst [vmem:[#allocation67_spill] sm:$0xff] %v10753_v48  ;;  %v5038_v37 = vrot.slane %v12309_v35, 4  ;;  %v4164_v0 = vrot.slane %v10750_v53, 4  ;;  %v5156_v55 = vrot.slane %v6477_v19, 4  ;;  %v4272_v40 = vrot.slane %v10753_v48, 4 }
 0x59e   : > { %v5467_v15 = vsel %vm297_vm0, %v12691_v33, %v10509_v42  ;;  %v10778_v27 = vperm.slane %v5179_v7, %v12536_v30  ;;  %v5228_v42 = vrot.slane %v10741_v8, 4  ;;  %v5488_v22 = vrot.slane %v10657_v4, 4 }
 0x59f   : > { %v10781_v17 = vsel %vm297_vm0, %v6458_v11, %v5038_v37  ;;  %v4165_v43 = vsel %vm297_vm0, %v10601_v31, %v4164_v0  ;;  %v4544_v2 = vrot.slane %v10760_v39, 4  ;;  %v10788_v19 = vrot.slane %v6458_v11, 4  ;;  %v10795_v0 = vpop.permute.xlu0 %6485 }
 0x5a0   : > { %v5058_v41 = vrot.slane %v6478_v1, 4  ;;  %v4273_v62 = vsel %vm297_vm0, %v10535_v50, %v4272_v40  ;;  %v5229_v33 = vsel %vm297_vm0, %v5228_v42, %v10778_v27  ;;  %v5489_v37 = vsel %vm297_vm0, 0.0, %v5488_v22 }
 0x5a1   : > { %v6664_v7 = vpack.i.bf16 %v4273_v62, %v4165_v43  ;;  %v5478_v16 = vrot.slane %v5329_v14, 4  ;;  %v10798_v35 = vperm.slane %v5467_v15, %v12593_v12  ;;  %v5157_v28 = vsel %vm297_vm0, 0.0, %v5156_v55  ;;  %v10811_v15 = vpop.permute.xlu2 %6495 }
 0x5a2   : > { %v6589_v11 = vpack.i.bf16 %v5229_v33, %v10073_v36  ;;  %v10803_v56 = vperm.slane %v5489_v37, %v12593_v12  ;;  %v5454_v40 = vrot.slane %v10611_v25, 4  ;;  %v12693_v43 = vunpack.i.l.bf16 %v10575_v23 }
 0x5a3   : > { %6665 = vrot.lane.b32.xlu0 %v6664_v7, %s6906_s25  ;;  %v5479_v22 = vsel %vm297_vm0, 0.0, %v5478_v16  ;;  %v12310_v62 = vunpack.i.h.bf16 %v10757_v49  ;;  %v10815_v55 = vperm.slane %v10679_v51, %v12593_v12  ;;  %v10818_v36 = vperm.slane %v6478_v1, %v12593_v12 }
 0x5a4   : > { %12692 = vst [vmem:[#allocation68_spill] sm:$0xff] %v10803_v56  ;;  %v4500_v42 = vrot.slane %v12693_v43, 4  ;;  %6590 = vrot.lane.b32.xlu2 %v6589_v11, %s6905_s23  ;;  %v5534_v25 = vrot.slane %v10803_v56, 4  ;;  %v10823_v33 = vperm.slane %v5479_v22, %v12593_v12  ;;  %v5059_v16 = vsel %vm297_vm0, 0.0, %v5058_v41  ;;  %v10831_v43 = vpop.permute.xlu1 %5318 }
 0x5a5   : > { %12694 = vst [vmem:[#allocation69_spill] sm:$0xff] %v10815_v55  ;;  %v5165_v7 = vperm.slane %v5157_v28, %v12593_v12  ;;  %v5455_v1 = vsel %vm297_vm0, %v5454_v40, %v10667_v13  ;;  %v5483_v11 = vperm.slane %v5329_v14, %v12593_v12  ;;  %v10846_v37 = vperm.slane %v10652_v29, %v12536_v30 }
 0x5a6   : > { %v4501_v51 = vsel %vm297_vm0, %v4500_v42, %v12310_v62  ;;  %12695 = vst [vmem:[#allocation70_spill] sm:$0xff] %v10831_v43  ;;  %v10838_v22 = vsel %vm297_vm0, %v5534_v25, %v10823_v33  ;;  %v10850_v42 = vperm.slane %v10634_v47, %v12536_v30  ;;  %v10854_v13 = vperm.slane %v10725_v61, %v12536_v30 }
 0x5a7   : > { %12696 = vst [vmem:[#allocation71_spill] sm:$0xff] %v10838_v22  ;;  %v10841_v41 = vperm.slane %v4501_v51, %v12593_v12  ;;  %v10858_v14 = vperm.slane %v10655_v3, %v12536_v30  ;;  %v5498_v40 = vrot.slane %v10798_v35, 4  ;;  %v5067_v25 = vperm.slane %v5059_v16, %v12593_v12  ;;  %v10886_v31 = vpop.permute.xlu0 %5330 }
 0x5a8   : > { %12697 = vst [vmem:[#allocation72_spill] sm:$0xff] %v10846_v37  ;;  %v5461_v28 = vperm.slane %v5455_v1, %v12593_v12  ;;  %v4170_v61 = vrot.slane %v10684_v9, 4  ;;  %v10872_v3 = vperm.slane %v10701_v60, %v12536_v30  ;;  %v5214_v62 = vrot.slane %v5165_v7, 4 }
 0x5a9   : > { %12698 = vst [vmem:[#allocation73_spill] sm:$0xff] %v10854_v13  ;;  %v10864_v29 = vsel %vm297_vm0, %v4544_v2, %v10841_v41  ;;  %v12702_v50 = vunpack.i.h.bf16 %v10575_v23  ;;  %v5524_v48 = vrot.slane %v5483_v11, 4  ;;  %v10882_v51 = vperm.slane %v10731_v21, %v12536_v30  ;;  %v10901_v9 = vpop.permute.xlu2 %5326 }
 0x5aa   : > { %12699 = vst [vmem:[#allocation74_spill] sm:$0xff] %v10858_v14  ;;  %v4171_v2 = vsel %vm297_vm0, %v4170_v61, %v10854_v13  ;;  %v4278_v1 = vrot.slane %v10568_v18, 4  ;;  %v5360_v47 = vrot.slane %v10719_v54, 4  ;;  %v5104_v60 = vrot.slane %v5067_v25, 4 }
 0x5ab   : > { %12700 = vst [vmem:[#allocation75_spill] sm:$0xff] %v10864_v29  ;;  %v10876_v16 = vrot.slane %v12702_v50, 4  ;;  %v12704_v53 = vrot.slane %v10704_v20, 4  ;;  %v6498_v61 = vunpack.i.h.bf16 %v10811_v15  ;;  %v5500_v37 = vrot.slane %v5461_v28, 4 }
 0x5ac   : > { %12701 = vst [vmem:[#allocation76_spill] sm:$0xff] %v10872_v3  ;;  %v5493_v3 = vperm.slane %v10657_v4, %v12593_v12  ;;  %v4279_v21 = vsel %vm297_vm0, %v4278_v1, %v10882_v51  ;;  %v10898_v29 = vsel %vm297_vm0, %v10522_v59, %v5360_v47  ;;  %v6497_v18 = vunpack.i.l.bf16 %v10811_v15  ;;  %v10914_v15 = vpop.permute.xlu1 %6490 }
 0x5ad   : > { %12703 = vst [vmem:[#allocation77_spill] sm:$0xff] %v10882_v51  ;;  %v5213_v50 = vsel %vm297_vm0, %v12704_v53, %v5165_v7  ;;  %v5047_v53 = vperm.slane %v10781_v17, %v12593_v12  ;;  %v6674_v4 = vpack.i.bf16 %v4279_v21, %v4171_v2  ;;  %v5048_v13 = vrot.slane %v6498_v61, 4 }
 0x5ae   : > { %v5525_v7 = vsel %vm297_vm0, %v5493_v3, %v5524_v48  ;;  %v10908_v22 = vsel %vm297_vm0, %v10704_v20, %v5214_v62  ;;  %v10911_v1 = vperm.slane %v5213_v50, %v12536_v30  ;;  %v6473_v47 = vunpack.i.h.bf16 %v10681_v6 }
 0x5af   : > { %12705 = vst [vmem:[#allocation78_spill] sm:$0xff] %v10908_v22  ;;  %v5026_v51 = vrot.slane %v6497_v18, 4  ;;  %v10918_v56 = vperm.slane %v10747_v32, %v12593_v12  ;;  %v12706_v48 = vunpack.i.l.bf16 %v10681_v6  ;;  %v5522_v2 = vrot.slane %v5493_v3, 4  ;;  %6675 = vrot.lane.b32.xlu0 %v6674_v4, %s6904_s29 }
 0x5b0   : > { %v5049_v20 = vsel %vm297_vm0, 0.0, %v5048_v13  ;;  %v10927_v62 = vperm.slane %v5525_v7, %v12536_v30  ;;  %v6482_v50 = vunpack.i.l.bf16 %v10757_v49  ;;  %v5499_v55 = vsel %vm297_vm0, %v5498_v40, %v5461_v28 }
 0x5b1   : > { %v5037_v17 = vsel %vm297_vm0, %v10788_v19, %v12706_v48  ;;  %v5057_v21 = vperm.slane %v5049_v20, %v12593_v12  ;;  %v5027_v32 = vsel %vm297_vm0, %v6473_v47, %v5026_v51  ;;  %v5080_v6 = vrot.slane %v5047_v53, 4 }
 0x5b2   : > { %v5035_v58 = vperm.slane %v5027_v32, %v12593_v12  ;;  %v5501_v19 = vsel %vm297_vm0, %v10798_v35, %v5500_v37  ;;  %v5024_v3 = vrot.slane %v6473_v47, 4  ;;  %v10937_v13 = vperm.slane %v5037_v17, %v12593_v12 }
 0x5b3   : > { %v5106_v7 = vrot.slane %v5057_v21, 4  ;;  %v10940_v4 = vsel %vm297_vm0, %v5104_v60, %v5057_v21  ;;  %v5523_v48 = vsel %vm297_vm0, %v5522_v2, %v5483_v11  ;;  %v12708_v51 = vunpack.i.h.bf16 %v10757_v49  ;;  %v10955_v60 = vpop.permute.xlu0 %6500 }
 0x5b4   : > { %12707 = vst [vmem:[#allocation79_spill] sm:$0xff] %v10940_v4  ;;  %v10946_v28 = vsel %vm297_vm0, %v5080_v6, %v5035_v58  ;;  %v5082_v40 = vrot.slane %v5035_v58, 4  ;;  %v4534_v32 = vrot.slane %v6482_v50, 4  ;;  %v10952_v37 = vperm.slane %v5501_v19, %v12536_v30  ;;  %v10974_v6 = vpop.permute.xlu2 %6515 }
 0x5b5   : > { %v4502_v20 = vrot.slane %v12708_v51, 4  ;;  %12709 = vst [vmem:[#allocation80_spill] sm:$0xff] %v10946_v28  ;;  %v10949_v35 = vsel %vm297_vm0, %v5067_v25, %v5106_v7  ;;  %v5550_v47 = vrot.slane %v10927_v62, 4  ;;  %v5025_v11 = vsel %vm297_vm0, %v5024_v3, %v6497_v18 }
 0x5b6   : > { %12710 = vst [vmem:[#allocation81_spill] sm:$0xff] %v10949_v35  ;;  %v10959_v49 = vsel %vm297_vm0, %v5047_v53, %v5082_v40  ;;  %v10963_v17 = vperm.slane %v10712_v44, %v12536_v30  ;;  %v4176_v58 = vrot.slane %v10715_v26, 4  ;;  %v10970_v2 = vperm.slane %v10584_v46, %v12536_v30  ;;  %v10990_v35 = vpop.permute.xlu1 %5310 }
 0x5b7   : > { %12711 = vst [vmem:[#allocation82_spill] sm:$0xff] %v10959_v49  ;;  %v5551_v25 = vsel %vm297_vm0, %v5550_v47, %v10952_v37  ;;  %v4284_v21 = vrot.slane %v10734_v63, 4  ;;  %v6487_v18 = vunpack.i.l.bf16 %v10795_v0  ;;  %v12712_v53 = vunpack.i.l.bf16 %v10575_v23 }
 0x5b8   : > { %v4539_v19 = vperm.slane %v6482_v50, %v12593_v12  ;;  %v5053_v3 = vperm.slane %v6498_v61, %v12593_v12  ;;  %5595 = vrot.lane.b32.xlu1 %v5551_v25, %s6905_s23  ;;  %v4177_v46 = vsel %vm297_vm0, %v10963_v17, %v4176_v58  ;;  %v10985_v7 = vperm.slane %v5499_v55, %v12536_v30 }
 0x5b9   : > { %v4503_v44 = vsel %vm297_vm0, %v12712_v53, %v4502_v20  ;;  %v4546_v51 = vrot.slane %v10841_v41, 4  ;;  %v4285_v40 = vsel %vm297_vm0, %v10970_v2, %v4284_v21  ;;  %v4406_v47 = vrot.slane %v6487_v18, 4 }
 0x5ba   : > { %12713 = vst [vmem:[#allocation83_spill] sm:$0xff] %v10985_v7  ;;  %v4535_v50 = vsel %vm297_vm0, 0.0, %v4534_v32  ;;  %v12714_v61 = vrot.slane %v10522_v59, 4  ;;  %v5031_v58 = vperm.slane %v5025_v11, %v12593_v12  ;;  %v6689_v25 = vpack.i.bf16 %v4285_v40, %v4177_v46 }
 0x5bb   : > { %v5068_v55 = vrot.slane %v10937_v13, 4  ;;  %v11000_v41 = vperm.slane %v5523_v48, %v12536_v30  ;;  %v11003_v21 = vperm.slane %v4503_v44, %v12593_v12  ;;  %v12716_v53 = vunpack.i.h.bf16 %v10575_v23 }
 0x5bc   : > { %v5359_v20 = vsel %vm297_vm0, %v12714_v61, %v10719_v54  ;;  %v4568_v49 = vrot.slane %v4539_v19, 4  ;;  %v12717_v59 = vrot.slane %v10818_v36, 4  ;;  %6690 = vrot.lane.b32.xlu0 %v6689_v25, %s6901_s15  ;;  %v6493_v11 = vunpack.i.h.bf16 %v10914_v15  ;;  %v11048_v14 = vpop.permute.xlu2 %6525 }
 0x5bd   : > { %12715 = vst [vmem:[#allocation84_spill] sm:$0xff] %v11000_v41  ;;  %v4407_v32 = vsel %vm297_vm0, %v12716_v53, %v4406_v47  ;;  %v6492_v46 = vunpack.i.l.bf16 %v10914_v15  ;;  %v4547_v48 = vsel %vm297_vm0, %v10760_v39, %v4546_v51  ;;  %v11017_v44 = vperm.slane %v4535_v50, %v12593_v12  ;;  %v11033_v50 = vpop.permute.xlu0 %6505 }
 0x5be   : > { %v5093_v54 = vsel %vm297_vm0, %v12717_v59, %v5053_v3  ;;  %v11020_v23 = vperm.slane %v5359_v20, %v12593_v12  ;;  %v5346_v40 = vrot.slane %v10831_v43, 4  ;;  %v5094_v47 = vrot.slane %v5053_v3, 4 }
 0x5bf   : > { %v5069_v61 = vsel %vm297_vm0, %v5068_v55, %v5031_v58  ;;  %v4524_v53 = vrot.slane %v6492_v46, 4  ;;  %v4529_v25 = vperm.slane %v6492_v46, %v12593_v12  ;;  %v5070_v59 = vrot.slane %v5031_v58, 4 }
 0x5c0   : > { %v11026_v15 = vperm.slane %v5093_v54, %v12536_v30  ;;  %v11030_v39 = vperm.slane %v10901_v9, %v12593_v12  ;;  %v6518_v51 = vunpack.i.h.bf16 %v10974_v6  ;;  %v4426_v20 = vrot.slane %v6493_v11, 4 }
 0x5c1   : > { %v4525_v3 = vsel %vm297_vm0, 0.0, %v4524_v53  ;;  %v11037_v55 = vsel %vm297_vm0, %v4568_v49, %v4529_v25  ;;  %v4570_v28 = vrot.slane %v4529_v25, 4  ;;  %v11040_v58 = vperm.slane %v5069_v61, %v12536_v30 }
 0x5c2   : > { %12718 = vst [vmem:[#allocation85_spill] sm:$0xff] %v11026_v15  ;;  %v4405_v54 = vsel %vm297_vm0, %v10876_v16, %v6487_v18  ;;  %v11045_v46 = vperm.slane %v4525_v3, %v12593_v12  ;;  %v5548_v4 = vrot.slane %v10985_v7, 4  ;;  %v5095_v53 = vsel %vm297_vm0, %v10818_v36, %v5094_v47 }
 0x5c3   : > { %12719 = vst [vmem:[#allocation86_spill] sm:$0xff] %v11030_v39  ;;  %v4571_v49 = vsel %vm297_vm0, %v4539_v19, %v4570_v28  ;;  %v6517_v25 = vunpack.i.l.bf16 %v10974_v6  ;;  %v11056_v61 = vsel %vm665_vm4, %v9897_v34, %v6518_v51  ;;  %v6488_v16 = vunpack.i.h.bf16 %v10795_v0 }
 0x5c4   : > { %12720 = vst [vmem:[#allocation87_spill] sm:$0xff] %v11037_v55  ;;  %v11060_v18 = vperm.slane %v4571_v49, %v12536_v30  ;;  %v4582_v3 = vrot.slane %v11045_v46, 4  ;;  %v5549_v7 = vsel %vm297_vm0, %v11000_v41, %v5548_v4  ;;  %v11065_v55 = vpop.permute.xlu1 %6520  ;;  %v4411_v36 = vperm.slane %v4405_v54, %v12593_v12 }
 0x5c5   : > { %12721 = vst [vmem:[#allocation88_spill] sm:$0xff] %v11040_v58  ;;  %v5416_v28 = vrot.slane %v11030_v39, 4  ;;  %v4427_v6 = vsel %vm297_vm0, 0.0, %v4426_v20  ;;  %5591 = vrot.lane.b32.xlu0 %v5549_v7, %s6906_s25  ;;  %v11073_v34 = vperm.slane %v10886_v31, %v12593_v12  ;;  %v4415_v0 = vperm.slane %v4407_v32, %v12593_v12 }
 0x5c6   : > { %12722 = vst [vmem:[#allocation89_spill] sm:$0xff] %v11060_v18  ;;  %v4431_v19 = vperm.slane %v6493_v11, %v12593_v12  ;;  %v11079_v4 = vsel %vm297_vm0, %v11017_v44, %v4582_v3  ;;  %v3054_v47 = vsel %vm665_vm4, %v9893_v38, %v6517_v25  ;;  %v5347_v51 = vsel %vm297_vm0, %v5346_v40, %v10990_v35 }
 0x5c7   : > { %12723 = vst [vmem:[#allocation90_spill] sm:$0xff] %v11079_v4  ;;  %v11086_v7 = vperm.slane %v4547_v48, %v12536_v30  ;;  %v4596_v20 = vrot.slane %v11060_v18, 4  ;;  %v6503_v54 = vunpack.i.h.bf16 %v10955_v60  ;;  %v11092_v32 = vsel %vm297_vm0, %v10937_v13, %v5070_v59  ;;  %v11108_v18 = vpop.permute.xlu0 %6510 }
 0x5c8   : > { %v11095_v11 = vperm.slane %v5095_v53, %v12536_v30  ;;  %v4435_v49 = vperm.slane %v4427_v6, %v12593_v12  ;;  %v6502_v38 = vunpack.i.l.bf16 %v10955_v60  ;;  %v4392_v25 = vrot.slane %v6488_v16, 4 }
 0x5c9   : > { %12724 = vst [vmem:[#allocation91_spill] sm:$0xff] %v11086_v7  ;;  %v4436_v40 = vrot.slane %v4411_v36, 4  ;;  %v5417_v48 = vsel %vm297_vm0, %v11073_v34, %v5416_v28  ;;  %v4597_v3 = vsel %vm297_vm0, %v4596_v20, %v11086_v7  ;;  %v11104_v41 = vperm.slane %v5347_v51, %v12593_v12  ;;  %v11114_v7 = vpop.permute.xlu2 %6540 }
 0x5ca   : > { %v6594_v13 = vpack.i.bf16 %v10085_v24, %v4597_v3  ;;  %v4416_v59 = vrot.slane %v6503_v54, 4  ;;  %v4421_v53 = vperm.slane %v6503_v54, %v12593_v12  ;;  %v4448_v6 = vrot.slane %v4415_v0, 4  ;;  %12725 = vst [vmem:[#allocation92_spill] sm:$0xff] %v11114_v7 }
 0x5cb   : > { %v4460_v60 = vrot.slane %v4431_v19, 4  ;;  %v4393_v4 = vsel %vm297_vm0, %v4392_v25, %v6502_v38  ;;  %v4394_v22 = vrot.slane %v6502_v38, 4  ;;  %v4472_v52 = vrot.slane %v4435_v49, 4 }
 0x5cc   : > { %6595 = vrot.lane.b32.xlu2 %v6594_v13, %s6905_s23  ;;  %v4417_v28 = vsel %vm297_vm0, 0.0, %v4416_v59  ;;  %v4462_v20 = vrot.slane %v4421_v53, 4  ;;  %v4399_v51 = vperm.slane %v4393_v4, %v12593_v12  ;;  %v11117_v24 = vperm.slane %v5417_v48, %v12536_v30  ;;  %v11126_v4 = vpop.permute.xlu1 %6535 }
 0x5cd   : > { %v4425_v54 = vperm.slane %v4417_v28, %v12593_v12  ;;  %v4395_v3 = vsel %vm297_vm0, %v6488_v16, %v4394_v22  ;;  %12727 = vst [vmem:[#allocation94_spill] sm:$0xff] %v11126_v4  ;;  %v4461_v25 = vsel %vm297_vm0, %v4460_v60, %v4421_v53  ;;  %v6508_v53 = vunpack.i.h.bf16 %v11033_v50  ;;  %v6801_v4 = vld [vmem:[#allocation3 + $0x3a] sm:$0xff] }
 0x5ce   : > { %12726 = vst [vmem:[#allocation93_spill] sm:$0xff] %v11117_v24  ;;  %v4403_v13 = vperm.slane %v4395_v3, %v12593_v12  ;;  %v4437_v59 = vsel %vm297_vm0, %v4436_v40, %v4399_v51  ;;  %v4438_v39 = vrot.slane %v4399_v51, 4  ;;  %v4463_v48 = vsel %vm297_vm0, %v4431_v19, %v4462_v20 }
 0x5cf   : > { %v4474_v7 = vrot.slane %v4425_v54, 4  ;;  %v11130_v28 = vsel %vm297_vm0, %v4472_v52, %v4425_v54  ;;  %v6523_v3 = vunpack.i.h.bf16 %v11065_v55  ;;  %v11138_v40 = vperm.slane %v4437_v59, %v12536_v30 }
 0x5d0   : > { %12728 = vst [vmem:[#allocation95_spill] sm:$0xff] %v11130_v28  ;;  %v11133_v22 = vsel %vm297_vm0, %v4448_v6, %v4403_v13  ;;  %v4450_v16 = vrot.slane %v4403_v13, 4  ;;  %v3214_v51 = vrot.slane %v10221_v57, 4  ;;  %v3322_v19 = vrot.slane %v10225_v5, 4  ;;  %v12733_v57 = vld [vmem:[#allocation12_spill] sm:$0xff] }
 0x5d1   : > { %12729 = vst [vmem:[#allocation96_spill] sm:$0xff] %v11133_v22  ;;  %v11141_v43 = vsel %vm297_vm0, %v4435_v49, %v4474_v7  ;;  %v11149_v6 = vperm.slane %v4463_v48, %v12536_v30  ;;  %v6507_v60 = vunpack.i.l.bf16 %v11033_v50  ;;  %v4439_v20 = vsel %vm297_vm0, %v4411_v36, %v4438_v39  ;;  %v11165_v50 = vpop.permute.xlu0 %6530 }
 0x5d2   : > { %12730 = vst [vmem:[#allocation97_spill] sm:$0xff] %v11138_v40  ;;  %v11146_v52 = vsel %vm297_vm0, %v4415_v0, %v4450_v16  ;;  %v6522_v54 = vunpack.i.l.bf16 %v11065_v55  ;;  %v3215_v7 = vsel %vm297_vm0, %v10190_v10, %v3214_v51  ;;  %v3323_v5 = vsel %vm297_vm0, %v12733_v57, %v3322_v19  ;;  %v6546_v19 = vpop.permute.xlu2 %6545  ;;  %v12737_v57 = vld [vmem:[#allocation41_spill] sm:$0xff] }
 0x5d3   : > { %12731 = vst [vmem:[#allocation98_spill] sm:$0xff] %v11141_v43  ;;  %v11160_v0 = vperm.slane %v4461_v25, %v12536_v30  ;;  %v6609_v49 = vpack.i.bf16 %v3323_v5, %v3215_v7  ;;  %v3055_v13 = vsel %vm667_vm5, %v3054_v47, %v6507_v60  ;;  %v3062_v59 = vsel %vm667_vm5, %v11056_v61, %v6508_v53  ;;  %v12735_v25 = vld [vmem:[#allocation58_spill] sm:$0xff]  ;;  %v12736_v47 = vld [vmem:[#allocation59_spill] sm:$0xff] }
 0x5d4   : > { %12732 = vst [vmem:[#allocation99_spill] sm:$0xff] %v11146_v52  ;;  %v11168_v39 = vsel %vm669_vm6, %v3055_v13, %v6522_v54  ;;  %v11171_v55 = vsel %vm669_vm6, %v3062_v59, %v6523_v3  ;;  %v4486_v10 = vrot.slane %v11138_v40, 4  ;;  %v5118_v36 = vrot.slane %v11040_v58, 4  ;;  %v12738_v5 = vld [vmem:[#allocation42_spill] sm:$0xff]  ;;  %v6551_v59 = vpop.permute.xlu1 %6550 }
 0x5d5   : > { %12734 = vst [vmem:[#allocation12_spill] sm:$0xff] %v11160_v0  ;;  %6610 = vrot.lane.b32.xlu2 %v6609_v49, %s6902_s16  ;;  %v3220_v48 = vrot.slane %v12735_v25, 4  ;;  %v3328_v16 = vrot.slane %v12736_v47, 4  ;;  %v11179_v61 = vperm.slane %v4439_v20, %v12536_v30  ;;  %v4488_v51 = vrot.slane %v11149_v6, 4  ;;  %v12743_v58 = vld [vmem:[#allocation22_spill] sm:$0xff] }
 0x5d6   : > { %v4487_v3 = vsel %vm297_vm0, %v11160_v0, %v4486_v10  ;;  %v5119_v53 = vsel %vm297_vm0, %v11026_v15, %v5118_v36  ;;  %v11188_v60 = vperm.slane %v11092_v32, %v12536_v30  ;;  %v5120_v54 = vrot.slane %v11095_v11, 4 }
 0x5d7   : > { %v6709_v7 = vpack.i.bf16 %v4487_v3, %v5119_v53  ;;  %v3221_v20 = vsel %vm297_vm0, %v3220_v48, %v12737_v57  ;;  %v3329_v49 = vsel %vm297_vm0, %v3328_v16, %v12738_v5  ;;  %v4489_v13 = vsel %vm297_vm0, %v4488_v51, %v11179_v61  ;;  %v12739_v3 = vld [vmem:[#allocation39_spill] sm:$0xff]  ;;  %v12740_v53 = vld [vmem:[#allocation38_spill] sm:$0xff] }
 0x5d8   : > { %v6624_v10 = vpack.i.bf16 %v3329_v49, %v3221_v20  ;;  %v5121_v36 = vsel %vm297_vm0, %v5120_v54, %v11188_v60  ;;  %v6513_v32 = vunpack.i.h.bf16 %v11108_v18  ;;  %v6512_v25 = vunpack.i.l.bf16 %v11108_v18  ;;  %v12741_v20 = vld [vmem:[#allocation25_spill] sm:$0xff] }
 0x5d9   : > { %6710 = vrot.lane.b32.xlu0 %v6709_v7, %s6906_s25  ;;  %v6599_v47 = vpack.i.bf16 %v4489_v13, %v5121_v36  ;;  %v3828_v48 = vrot.slane %v12739_v3, 4  ;;  %v3936_v57 = vrot.slane %v12740_v53, 4  ;;  %v6548_v16 = vunpack.i.h.bf16 %v6546_v19  ;;  %v12744_v7 = vld [vmem:[#allocation21_spill] sm:$0xff]  ;;  %v12745_v3 = vld [vmem:[#allocation19_spill] sm:$0xff] }
 0x5da   : > { %v6547_v5 = vunpack.i.l.bf16 %v6546_v19  ;;  %v6553_v38 = vunpack.i.h.bf16 %v6551_v59  ;;  %v6552_v51 = vunpack.i.l.bf16 %v6551_v59  ;;  %v12742_v49 = vrot.slane %v12741_v20, 4  ;;  %v12746_v20 = vld [vmem:[#allocation36_spill] sm:$0xff] }
 0x5db   : > { %6600 = vrot.lane.b32.xlu1 %v6599_v47, %s6905_s23  ;;  %v3829_v18 = vsel %vm297_vm0, %v3828_v48, %v12743_v58  ;;  %v3937_v13 = vsel %vm297_vm0, %v3936_v57, %v12744_v7  ;;  %v4854_v19 = vrot.slane %v12745_v3, 4  ;;  %v4878_v40 = vrot.slane %v12746_v20, 4  ;;  %v12747_v57 = vld [vmem:[#allocation44_spill] sm:$0xff] }
 0x5dc   : > { %v4801_v54 = vsel %vm297_vm0, %v6801_v4, %v12742_v49  ;;  %v4015_v59 = vsel %vm665_vm4, %v3937_v13, %v6548_v16  ;;  %v4008_v53 = vsel %vm665_vm4, %v3829_v18, %v6547_v5  ;;  %v5232_v4 = vrot.slane %v10911_v1, 4  ;;  %v6561_v16 = vpop.permute.xlu0 %6560  ;;  %v12749_v13 = vld [vmem:[#allocation48_spill] sm:$0xff] }
 0x5dd   : > { %v11213_v36 = vperm.slane %v4801_v54, %v12593_v12  ;;  %6625 = vrot.lane.b32.xlu2 %v6624_v10, %s6903_s17  ;;  %v4009_v58 = vsel %vm667_vm5, %v4008_v53, %v6512_v25  ;;  %v4016_v47 = vsel %vm667_vm5, %v4015_v59, %v6513_v32  ;;  %v11227_v49 = vperm.slane %v12747_v57, %v12536_v30  ;;  %v12748_v10 = vld [vmem:[#allocation40_spill] sm:$0xff]  ;;  %v12750_v59 = vld [vmem:[#allocation43_spill] sm:$0xff] }
 0x5de   : > { %v4017_v5 = vsel %vm669_vm6, %v4016_v47, %v6553_v38  ;;  %v4010_v54 = vsel %vm669_vm6, %v4009_v58, %v6552_v51  ;;  %v4879_v25 = vsel %vm297_vm0, %v4878_v40, %v12748_v10  ;;  %v5233_v7 = vsel %vm297_vm0, %v5232_v4, %v10850_v42  ;;  %v6556_v38 = vpop.permute.xlu2 %6555  ;;  %v12751_v51 = vld [vmem:[#allocation49_spill] sm:$0xff] }
 0x5df   : > { %v4855_v48 = vsel %vm297_vm0, %v4854_v19, %v11213_v36  ;;  %v11237_v32 = vperm.slane %v4879_v25, %v12536_v30  ;;  %v3540_v19 = vrot.slane %v12749_v13, 4  ;;  %v11244_v53 = vperm.slane %v12750_v59, %v12536_v30 }
 0x5e0   : > { %v11232_v18 = vperm.slane %v4855_v48, %v12536_v30  ;;  %v3648_v58 = vrot.slane %v12751_v51, 4  ;;  %v12752_v47 = vrot.slane %v11104_v41, 4  ;;  %v5442_v48 = vrot.slane %v11117_v24, 4 }
 0x5e1   : > { %v6533_v57 = vunpack.i.h.bf16 %v11165_v50  ;;  %v4898_v4 = vrot.slane %v11237_v32, 4  ;;  %v3541_v25 = vsel %vm297_vm0, %v11227_v49, %v3540_v19  ;;  %v6532_v0 = vunpack.i.l.bf16 %v11165_v50 }
 0x5e2   : > { %v5393_v40 = vsel %vm297_vm0, %v11020_v23, %v12752_v47  ;;  %v3649_v15 = vsel %vm297_vm0, %v11244_v53, %v3648_v58  ;;  %v12753_v43 = vunpack.i.l.bf16 %v11048_v14  ;;  %v12754_v52 = vunpack.i.h.bf16 %v11048_v14 }
 0x5e3   : > { %v11257_v59 = vperm.slane %v5393_v40, %v12536_v30  ;;  %v6558_v24 = vunpack.i.h.bf16 %v6556_v38  ;;  %v4899_v19 = vsel %vm297_vm0, %v4898_v4, %v11232_v18  ;;  %v6649_v40 = vpack.i.bf16 %v3649_v15, %v3541_v25  ;;  %v12758_v4 = vld [vmem:[#allocation64_spill] sm:$0xff]  ;;  %v12760_v25 = vld [vmem:[#allocation54_spill] sm:$0xff] }
 0x5e4   : > { %v3057_v47 = vsel %vm671_vm7, %v11168_v39, %v12753_v43  ;;  %v3064_v22 = vsel %vm671_vm7, %v11171_v55, %v12754_v52  ;;  %v6714_v28 = vpack.i.bf16 %v5233_v7, %v4899_v19  ;;  %v6557_v14 = vunpack.i.l.bf16 %v6556_v38 }
 0x5e5   : > { %v5443_v50 = vsel %vm297_vm0, %v5442_v48, %v11257_v59  ;;  %v11275_v58 = vsel %vm673_vm8, %v3057_v47, %v6532_v0  ;;  %v11279_v43 = vsel %vm673_vm8, %v3064_v22, %v6533_v57  ;;  %v4018_v52 = vsel %vm671_vm7, %v4017_v5, %v6558_v24  ;;  %6650 = vrot.lane.b32.xlu2 %v6649_v40, %s6900_s13  ;;  %v12757_v48 = vld [vmem:[#allocation63_spill] sm:$0xff]  ;;  %v12759_v57 = vld [vmem:[#allocation50_spill] sm:$0xff]  ;;  %v6606_v40 = vpop.permute.xlu0 %6605 }
 0x5e6   : > { %12755 = vst [vmem:[#allocation58_spill] sm:$0xff] %v11275_v58  ;;  %5567 = vrot.lane.b32.xlu1 %v5443_v50, %s6905_s23  ;;  %v5370_v55 = vrot.slane %v10901_v9, 4  ;;  %v5380_v15 = vrot.slane %v10886_v31, 4  ;;  %v4168_v0 = vrot.slane %v12757_v48, 4  ;;  %6715 = vrot.lane.b32.xlu0 %v6714_v28, %s6904_s29  ;;  %v4011_v7 = vsel %vm671_vm7, %v4010_v54, %v6557_v14  ;;  %v12762_v28 = vld [vmem:[#allocation61_spill] sm:$0xff]  ;;  %v12764_v48 = vld [vmem:[#allocation10_spill] sm:$0xff] }
 0x5e7   : > { %12756 = vst [vmem:[#allocation59_spill] sm:$0xff] %v11279_v43  ;;  %v4276_v22 = vrot.slane %v12758_v4, 4  ;;  %v3218_v38 = vrot.slane %v12759_v57, 4  ;;  %v3326_v24 = vrot.slane %v12760_v25, 4  ;;  %v12761_v9 = vrot.slane %v10766_v45, 4  ;;  %v12763_v50 = vld [vmem:[#allocation57_spill] sm:$0xff] }
 0x5e8   : > { %v6563_v47 = vunpack.i.h.bf16 %v6561_v16  ;;  %v6562_v19 = vunpack.i.l.bf16 %v6561_v16  ;;  %v4169_v54 = vsel %vm297_vm0, %v12762_v28, %v4168_v0  ;;  %v12765_v57 = vld [vmem:[#allocation17_spill] sm:$0xff]  ;;  %v4580_v5 = vrot.slane %v11017_v44, 4  ;;  %v12822_v58 = vld [vmem:[#allocation32_spill] sm:$0xff] }
 0x5e9   : > { %v11297_v31 = vsel %vm297_vm0, %v12761_v9, %v11003_v21  ;;  %v4277_v14 = vsel %vm297_vm0, %v12763_v50, %v4276_v22  ;;  %v3219_v4 = vsel %vm297_vm0, %v12764_v48, %v3218_v38  ;;  %v3327_v25 = vsel %vm297_vm0, %v12765_v57, %v3326_v24  ;;  %v12773_v57 = vld [vmem:[#allocation51_spill] sm:$0xff]  ;;  %v12824_v43 = vld [vmem:[#allocation72_spill] sm:$0xff] }
 0x5ea   : > { %v5381_v9 = vsel %vm297_vm0, 0.0, %v5380_v15  ;;  %v11310_v39 = vsel %vm673_vm8, %v4011_v7, %v6562_v19  ;;  %v11313_v16 = vsel %vm673_vm8, %v4018_v52, %v6563_v47  ;;  %v11317_v0 = vperm.slane %v10898_v29, %v12593_v12  ;;  %v12768_v7 = vld [vmem:[#allocation29_spill] sm:$0xff] }
 0x5eb   : > { %12766 = vst [vmem:[#allocation41_spill] sm:$0xff] %v11310_v39  ;;  %v5390_v22 = vrot.slane %v11020_v23, 4  ;;  %v5371_v38 = vsel %vm297_vm0, 0.0, %v5370_v55  ;;  %v6619_v28 = vpack.i.bf16 %v3327_v25, %v3219_v4  ;;  %v4581_v44 = vsel %vm297_vm0, %v4580_v5, %v11045_v46  ;;  %v12770_v55 = vld [vmem:[#allocation16_spill] sm:$0xff] }
 0x5ec   : > { %12767 = vst [vmem:[#allocation42_spill] sm:$0xff] %v11313_v16  ;;  %v5552_v15 = vrot.slane %v10952_v37, 4  ;;  %v6669_v24 = vpack.i.bf16 %v4277_v14, %v4169_v54  ;;  %v11326_v19 = vperm.slane %v12768_v7, %v12536_v30  ;;  %v11329_v52 = vperm.slane %v5381_v9, %v12593_v12  ;;  %v12774_v9 = vld [vmem:[#allocation45_spill] sm:$0xff] }
 0x5ed   : > { %v5414_v29 = vrot.slane %v11073_v34, 4  ;;  %v4174_v23 = vrot.slane %v10963_v17, 4  ;;  %v11336_v47 = vperm.slane %v12770_v55, %v12536_v30  ;;  %v4490_v46 = vrot.slane %v11179_v61, 4  ;;  %v12772_v61 = vld [vmem:[#allocation52_spill] sm:$0xff] }
 0x5ee   : > { %12769 = vst [vmem:[#allocation39_spill] sm:$0xff] %v11326_v19  ;;  %6620 = vrot.lane.b32.xlu1 %v6619_v28, %s6900_s13  ;;  %v5553_v37 = vsel %vm297_vm0, %v10927_v62, %v5552_v15  ;;  %6670 = vrot.lane.b32.xlu2 %v6669_v24, %s6902_s16  ;;  %v4282_v5 = vrot.slane %v10970_v2, 4  ;;  %v3532_v54 = vrot.slane %v11326_v19, 4  ;;  %v11345_v34 = vperm.slane %v4581_v44, %v12536_v30  ;;  %v12775_v28 = vld [vmem:[#allocation35_spill] sm:$0xff] }
 0x5ef   : > { %12771 = vst [vmem:[#allocation38_spill] sm:$0xff] %v11336_v47  ;;  %5599 = vrot.lane.b32.xlu0 %v5553_v37, %s6902_s16  ;;  %v5122_v17 = vrot.slane %v11188_v60, 4  ;;  %v4175_v50 = vsel %vm297_vm0, %v4174_v23, %v10715_v26  ;;  %v3640_v62 = vrot.slane %v11336_v47, 4  ;;  %v6608_v48 = vunpack.i.h.bf16 %v6606_v40  ;;  %v12777_v15 = vld [vmem:[#allocation31_spill] sm:$0xff] }
 0x5f0   : > { %v4283_v14 = vsel %vm297_vm0, %v4282_v5, %v10734_v63  ;;  %v3533_v2 = vsel %vm297_vm0, %v12772_v61, %v3532_v54  ;;  %v6607_v4 = vunpack.i.l.bf16 %v6606_v40  ;;  %v12776_v44 = vrot.slane %v12775_v28, 4  ;;  %v12778_v26 = vld [vmem:[#allocation23_spill] sm:$0xff]  ;;  %v12780_v63 = vld [vmem:[#allocation13_spill] sm:$0xff] }
 0x5f1   : > { %v3641_v25 = vsel %vm297_vm0, %v12773_v57, %v3640_v62  ;;  %v12779_v24 = vrot.slane %v12778_v26, 4  ;;  %v11368_v23 = vperm.slane %v12780_v63, %v12593_v12  ;;  %v4491_v40 = vsel %vm297_vm0, %v11149_v6, %v4490_v46  ;;  %v12781_v5 = vld [vmem:[#allocation15_spill] sm:$0xff]  ;;  %v11379_v62 = vpop.permute.xlu0 %6615  ;;  %v12782_v6 = vld [vmem:[#allocation20_spill] sm:$0xff] }
 0x5f2   : > { %v3317_v60 = vsel %vm297_vm0, %v12776_v44, %v12774_v9  ;;  %v4770_v54 = vrot.slane %v12781_v5, 4  ;;  %v5348_v9 = vrot.slane %v10990_v35, 4  ;;  %v5123_v28 = vsel %vm297_vm0, %v11095_v11, %v5122_v17  ;;  %v12783_v35 = vld [vmem:[#allocation34_spill] sm:$0xff] }
 0x5f3   : > { %v3209_v7 = vsel %vm297_vm0, %v12779_v24, %v12777_v15  ;;  %v11373_v55 = vsel %vm665_vm4, %v3317_v60, %v6608_v48  ;;  %v6634_v44 = vpack.i.bf16 %v3641_v25, %v3533_v2  ;;  %v4746_v15 = vrot.slane %v11368_v23, 4  ;;  %v12784_v17 = vld [vmem:[#allocation18_spill] sm:$0xff] }
 0x5f4   : > { %v11376_v37 = vsel %vm665_vm4, %v3209_v7, %v6607_v4  ;;  %v6684_v26 = vpack.i.bf16 %v4283_v14, %v4175_v50  ;;  %v4771_v46 = vsel %vm297_vm0, %v4770_v54, %v12782_v6  ;;  %v3538_v48 = vrot.slane %v11227_v49, 4 }
 0x5f5   : > { %v3646_v4 = vrot.slane %v11244_v53, 4  ;;  %v6729_v60 = vpack.i.bf16 %v4491_v40, %v5123_v28  ;;  %v4600_v24 = vrot.slane %v11345_v34, 4  ;;  %v4747_v7 = vsel %vm297_vm0, %v4746_v15, %v12783_v35  ;;  %v12785_v28 = vld [vmem:[#allocation86_spill] sm:$0xff] }
 0x5f6   : > { %6635 = vrot.lane.b32.xlu1 %v6634_v44, %s6906_s25  ;;  %v11394_v11 = vperm.slane %v4771_v46, %v12536_v30  ;;  %6685 = vrot.lane.b32.xlu2 %v6684_v26, %s6903_s17  ;;  %v4896_v50 = vrot.slane %v12784_v17, 4  ;;  %v5230_v14 = vrot.slane %v10778_v27, 4  ;;  %v3539_v49 = vsel %vm297_vm0, %v3538_v48, %v12749_v13  ;;  %v12786_v46 = vld [vmem:[#allocation70_spill] sm:$0xff] }
 0x5f7   : > { %v3647_v53 = vsel %vm297_vm0, %v3646_v4, %v12751_v51  ;;  %v5402_v2 = vrot.slane %v11317_v0, 4  ;;  %6730 = vrot.lane.b32.xlu0 %v6729_v60, %s6902_s16  ;;  %v11406_v25 = vperm.slane %v4747_v7, %v12536_v30  ;;  %v11410_v54 = vperm.slane %v5371_v38, %v12593_v12  ;;  %v12789_v60 = vld [vmem:[#allocation46_spill] sm:$0xff] }
 0x5f8   : > { %v4790_v63 = vrot.slane %v11394_v11, 4  ;;  %v6644_v40 = vpack.i.bf16 %v3647_v53, %v3539_v49  ;;  %v5391_v27 = vsel %vm297_vm0, %v5390_v22, %v11104_v41  ;;  %v11416_v13 = vperm.slane %v11297_v31, %v12536_v30  ;;  %v12787_v22 = vld [vmem:[#allocation11_spill] sm:$0xff] }
 0x5f9   : > { %v5231_v51 = vsel %vm297_vm0, %v10741_v8, %v5230_v14  ;;  %v5415_v44 = vsel %vm297_vm0, %v5414_v29, %v12785_v28  ;;  %v5426_v15 = vrot.slane %v11329_v52, 4  ;;  %v4856_v38 = vrot.slane %v11213_v36, 4  ;;  %v11439_v17 = vpop.permute.xlu0 %6630  ;;  %v12792_v14 = vld [vmem:[#allocation74_spill] sm:$0xff] }
 0x5fa   : > { %v4791_v26 = vsel %vm297_vm0, %v4790_v63, %v11406_v25  ;;  %v5349_v41 = vsel %vm297_vm0, %v12786_v46, %v5348_v9  ;;  %v4601_v31 = vsel %vm297_vm0, %v4600_v24, %v11416_v13  ;;  %v4897_v48 = vsel %vm297_vm0, %v12787_v22, %v4896_v50  ;;  %12790 = vst [vmem:[#allocation22_spill] sm:$0xff] %v11439_v17  ;;  %v12791_v50 = vld [vmem:[#allocation78_spill] sm:$0xff] }
 0x5fb   : > { %v4880_v8 = vrot.slane %v12748_v10, 4  ;;  %v11434_v29 = vperm.slane %v5391_v27, %v12536_v30  ;;  %v6704_v4 = vpack.i.bf16 %v5231_v51, %v4897_v48  ;;  %v3544_v7 = vrot.slane %v12789_v60, 4  ;;  %v12793_v51 = vld [vmem:[#allocation47_spill] sm:$0xff]  ;;  %v12797_v48 = vld [vmem:[#allocation53_spill] sm:$0xff]  ;;  %v12819_v60 = vld [vmem:[#allocation30_spill] sm:$0xff] }
 0x5fc   : > { %v4857_v36 = vsel %vm297_vm0, %v12745_v3, %v4856_v38  ;;  %v11448_v10 = vperm.slane %v12791_v50, %v12536_v30  ;;  %v5238_v49 = vrot.slane %v12792_v14, 4  ;;  %v6734_v53 = vpack.i.bf16 %v4791_v26, %v4601_v31  ;;  %v12828_v17 = vld [vmem:[#allocation82_spill] sm:$0xff] }
 0x5fd   : > { %12788 = vst [vmem:[#allocation25_spill] sm:$0xff] %v11434_v29  ;;  %v11442_v9 = vperm.slane %v4857_v36, %v12536_v30  ;;  %v4881_v24 = vsel %vm297_vm0, %v12746_v20, %v4880_v8  ;;  %v4900_v3 = vrot.slane %v11232_v18, 4  ;;  %v5234_v27 = vrot.slane %v10850_v42, 4  ;;  %v12800_v36 = vld [vmem:[#allocation68_spill] sm:$0xff] }
 0x5fe   : > { %6645 = vrot.lane.b32.xlu1 %v6644_v40, %s6904_s29  ;;  %v11453_v63 = vperm.slane %v4881_v24, %v12536_v30  ;;  %6705 = vrot.lane.b32.xlu2 %v6704_v4, %s6902_s16  ;;  %v3652_v20 = vrot.slane %v12793_v51, 4  ;;  %v11462_v38 = vsel %vm297_vm0, %v11448_v10, %v5238_v49  ;;  %v12794_v26 = vrot.slane %v10918_v56, 4  ;;  %v12795_v40 = vld [vmem:[#allocation69_spill] sm:$0xff]  ;;  %v12798_v4 = vld [vmem:[#allocation55_spill] sm:$0xff] }
 0x5ff   : > { %v4904_v28 = vrot.slane %v11442_v9, 4  ;;  %v11469_v31 = vperm.slane %v5349_v41, %v12593_v12  ;;  %6735 = vrot.lane.b32.xlu0 %v6734_v53, %s6904_s29  ;;  %v11473_v42 = vperm.slane %v5415_v44, %v12536_v30  ;;  %v11477_v18 = vsel %vm297_vm0, %v11237_v32, %v4900_v3  ;;  %v12802_v49 = vld [vmem:[#allocation95_spill] sm:$0xff]  ;;  %v11508_v3 = vpop.permute.xlu1 %6565 }
 0x600   : > { %v5513_v46 = vsel %vm297_vm0, %v12795_v40, %v12794_v26  ;;  %v11481_v22 = vsel %vm297_vm0, %v10911_v1, %v5234_v27  ;;  %v3545_v8 = vsel %vm297_vm0, %v12797_v48, %v3544_v7  ;;  %v3653_v12 = vsel %vm297_vm0, %v12798_v4, %v3652_v20  ;;  %12803 = vst [vmem:[#allocation19_spill] sm:$0xff] %v11508_v3  ;;  %v12805_v26 = vld [vmem:[#allocation73_spill] sm:$0xff]  ;;  %v12829_v3 = vld [vmem:[#allocation76_spill] sm:$0xff] }
 0x601   : > { %12796 = vst [vmem:[#allocation21_spill] sm:$0xff] %v11473_v42  ;;  %v11489_v41 = vsel %vm297_vm0, %v11453_v63, %v4904_v28  ;;  %v6724_v44 = vpack.i.bf16 %v11481_v22, %v11477_v18  ;;  %v5440_v32 = vrot.slane %v11434_v29, 4  ;;  %v12799_v1 = vrot.slane %v10823_v33, 4  ;;  %v12804_v33 = vld [vmem:[#allocation71_spill] sm:$0xff]  ;;  %v12806_v18 = vld [vmem:[#allocation77_spill] sm:$0xff] }
 0x602   : > { %v12801_v24 = vrot.slane %v12795_v40, 4  ;;  %v11506_v53 = vperm.slane %v12802_v49, %v12536_v30  ;;  %v5444_v27 = vrot.slane %v11257_v59, 4  ;;  %v11516_v20 = vperm.slane %v12804_v33, %v12536_v30 }
 0x603   : > { %v5537_v7 = vsel %vm297_vm0, %v12800_v36, %v12799_v1  ;;  %v6659_v28 = vpack.i.bf16 %v3653_v12, %v3545_v8  ;;  %v4172_v40 = vrot.slane %v12805_v26, 4  ;;  %v5403_v22 = vsel %vm297_vm0, %v5402_v2, %v11469_v31  ;;  %v12807_v36 = vld [vmem:[#allocation79_spill] sm:$0xff]  ;;  %v12808_v2 = vld [vmem:[#allocation33_spill] sm:$0xff] }
 0x604   : > { %v5511_v50 = vsel %vm297_vm0, %v12801_v24, %v10918_v56  ;;  %v11512_v51 = vperm.slane %v5537_v7, %v12536_v30  ;;  %v4280_v56 = vrot.slane %v12806_v18, 4  ;;  %v11523_v48 = vperm.slane %v5513_v46, %v12536_v30  ;;  %v12809_v7 = vld [vmem:[#allocation26_spill] sm:$0xff] }
 0x605   : > { %v11527_v4 = vperm.slane %v5511_v50, %v12536_v30  ;;  %v5554_v1 = vrot.slane %v11516_v20, 4  ;;  %v11532_v8 = vperm.slane %v12807_v36, %v12536_v30  ;;  %v5441_v12 = vsel %vm297_vm0, %v11473_v42, %v5440_v32  ;;  %v12811_v50 = vld [vmem:[#allocation93_spill] sm:$0xff]  ;;  %v11547_v26 = vpop.permute.xlu0 %6640  ;;  %v12814_v36 = vld [vmem:[#allocation60_spill] sm:$0xff] }
 0x606   : > { %v5558_v59 = vrot.slane %v11512_v51, 4  ;;  %6660 = vrot.lane.b32.xlu1 %v6659_v28, %s6901_s15  ;;  %v12810_v46 = vrot.slane %v12809_v7, 4  ;;  %v11542_v49 = vperm.slane %v5403_v22, %v12536_v30  ;;  %v5445_v33 = vsel %vm297_vm0, %v12811_v50, %v5444_v27  ;;  %5563 = vrot.lane.b32.xlu2 %v5441_v12, %s6906_s25  ;;  %12812 = vst [vmem:[#allocation36_spill] sm:$0xff] %v11547_v26  ;;  %v12813_v27 = vld [vmem:[#allocation65_spill] sm:$0xff] }
 0x607   : > { %v11555_v28 = vsel %vm297_vm0, %v5554_v1, %v11527_v4  ;;  %v5427_v18 = vsel %vm297_vm0, %v5426_v15, %v11410_v54  ;;  %5571 = vrot.lane.b32.xlu0 %v5445_v33, %s6902_s16  ;;  %v4173_v22 = vsel %vm297_vm0, %v12813_v27, %v4172_v40  ;;  %v4281_v12 = vsel %vm297_vm0, %v12814_v36, %v4280_v56  ;;  %v12815_v1 = vld [vmem:[#allocation75_spill] sm:$0xff]  ;;  %v12816_v15 = vld [vmem:[#allocation96_spill] sm:$0xff] }
 0x608   : > { %v4843_v24 = vsel %vm297_vm0, %v12810_v46, %v12808_v2  ;;  %v11551_v32 = vsel %vm297_vm0, %v5558_v59, %v11523_v48  ;;  %v5433_v59 = vperm.slane %v5427_v18, %v12536_v30  ;;  %v5448_v2 = vrot.slane %v11542_v49, 4  ;;  %v12817_v18 = vld [vmem:[#allocation80_spill] sm:$0xff] }
 0x609   : > { %v11570_v7 = vperm.slane %v12815_v1, %v12536_v30  ;;  %v11573_v46 = vperm.slane %v4843_v24, %v12536_v30  ;;  %v11577_v50 = vperm.slane %v12816_v15, %v12536_v30  ;;  %v4492_v40 = vrot.slane %v11506_v53, 4  ;;  %v12818_v24 = vld [vmem:[#allocation27_spill] sm:$0xff] }
 0x60a   : > { %v4558_v33 = vrot.slane %v11003_v21, 4  ;;  %v11582_v56 = vsel %vm297_vm0, %v5433_v59, %v5448_v2  ;;  %v11586_v27 = vperm.slane %v12817_v18, %v12536_v30  ;;  %v5124_v36 = vrot.slane %v11532_v8, 4  ;;  %v12821_v21 = vld [vmem:[#allocation28_spill] sm:$0xff] }
 0x60b   : > { %v6679_v1 = vpack.i.bf16 %v4281_v12, %v4173_v22  ;;  %v12820_v29 = vrot.slane %v12819_v60, 4  ;;  %v11595_v42 = vsel %vm297_vm0, %v4492_v40, %v11577_v50  ;;  %v12823_v2 = vrot.slane %v12822_v58, 4  ;;  %v12825_v60 = vld [vmem:[#allocation37_spill] sm:$0xff]  ;;  %v11610_v12 = vpop.permute.xlu2 %6570  ;;  %v6576_v40 = vpop.permute.xlu1 %6575 }
 0x60c   : > { %v5226_v18 = vrot.slane %v12824_v43, 4  ;;  %v11604_v16 = vsel %vm297_vm0, %v5124_v36, %v11586_v27  ;;  %12826 = vst [vmem:[#allocation44_spill] sm:$0xff] %v11610_v12  ;;  %v5091_v36 = vperm.slane %v12828_v17, %v12536_v30  ;;  %v4792_v26 = vrot.slane %v11406_v25, 4 }
 0x60d   : > { %v4867_v15 = vsel %vm297_vm0, %v12820_v29, %v12818_v24  ;;  %v4759_v39 = vsel %vm297_vm0, %v12823_v2, %v12821_v21  ;;  %v4784_v29 = vrot.slane %v12825_v60, 4  ;;  %v4892_v24 = vrot.slane %v11573_v46, 4  ;;  %v12827_v21 = vld [vmem:[#allocation99_spill] sm:$0xff]  ;;  %v11629_v58 = vpop.permute.xlu0 %6655 }
 0x60e   : > { %v11607_v22 = vperm.slane %v4759_v39, %v12536_v30  ;;  %v4459_v2 = vperm.slane %v12827_v21, %v12536_v30  ;;  %6680 = vrot.lane.b32.xlu1 %v6679_v1, %s6900_s13  ;;  %v4873_v39 = vperm.slane %v4867_v15, %v12536_v30  ;;  %v5227_v43 = vsel %vm297_vm0, %v12829_v3, %v5226_v18  ;;  %v12831_v21 = vld [vmem:[#allocation98_spill] sm:$0xff]  ;;  %v12832_v1 = vld [vmem:[#allocation81_spill] sm:$0xff] }
 0x60f   : > { %6725 = vrot.lane.b32.xlu2 %v6724_v44, %s6900_s13  ;;  %12830 = vst [vmem:[#allocation40_spill] sm:$0xff] %v11629_v58  ;;  %v4483_v17 = vperm.slane %v12831_v21, %v12536_v30  ;;  %v5115_v15 = vperm.slane %v12832_v1, %v12536_v30  ;;  %v5130_v19 = vrot.slane %v5091_v36, 4  ;;  %v4559_v18 = vsel %vm297_vm0, %v10766_v45, %v4558_v33 }
 0x610   : > { %v11625_v12 = vsel %vm297_vm0, %v11607_v22, %v4784_v29  ;;  %v4498_v47 = vrot.slane %v4459_v2, 4  ;;  %v12833_v29 = vld [vmem:[#allocation87_spill] sm:$0xff]  ;;  %v6578_v25 = vunpack.i.h.bf16 %v6576_v40  ;;  %v12834_v44 = vpack.i.bf16 %v11462_v38, %v11489_v41 }
 0x611   : > { %v11639_v3 = vperm.slane %v12833_v29, %v12536_v30  ;;  %v11647_v21 = vsel %vm297_vm0, %v11394_v11, %v4792_v26  ;;  %v6577_v58 = vunpack.i.l.bf16 %v6576_v40  ;;  %v4893_v1 = vsel %vm297_vm0, %v4873_v39, %v4892_v24  ;;  %v12837_v40 = vld [vmem:[#allocation62_spill] sm:$0xff] }
 0x612   : > { %6755 = vrot.lane.b32.xlu0 %v12834_v44, %s6901_s15  ;;  %v11651_v57 = vsel %vm297_vm0, %v4483_v17, %v4498_v47  ;;  %v11654_v45 = vsel %vm297_vm0, %v5115_v15, %v5130_v19  ;;  %v6694_v33 = vpack.i.bf16 %v5227_v43, %v4893_v1  ;;  %v5446_v61 = vrot.slane %v5433_v59, 4  ;;  %v12836_v59 = vld [vmem:[#allocation66_spill] sm:$0xff] }
 0x613   : > { %v6779_v29 = vpack.i.bf16 %v11651_v57, %v11654_v45  ;;  %v4902_v38 = vrot.slane %v11453_v63, 4  ;;  %v4594_v41 = vrot.slane %v11570_v7, 4  ;;  %v5236_v11 = vrot.slane %v11448_v10, 4 }
 0x614   : > { %v11663_v26 = vsel %vm667_vm5, %v11376_v37, %v6577_v58  ;;  %v12835_v47 = vrot.slane %v12783_v35, 4  ;;  %v11671_v43 = vsel %vm297_vm0, %v5446_v61, %v11542_v49  ;;  %v11679_v10 = vsel %vm667_vm5, %v11373_v55, %v6578_v25  ;;  %v11696_v25 = vpop.permute.xlu2 %6580 }
 0x615   : > { %v11675_v63 = vsel %vm297_vm0, %v4902_v38, %v11442_v9  ;;  %v4772_v37 = vrot.slane %v12782_v6, 4  ;;  %v12838_v35 = vrot.slane %v12837_v40, 4  ;;  %v4496_v61 = vrot.slane %v4483_v17, 4  ;;  %v6666_v17 = vpop.permute.xlu0 %6665  ;;  %v12839_v38 = vld [vmem:[#allocation67_spill] sm:$0xff] }
 0x616   : > { %v4749_v19 = vsel %vm297_vm0, %v11368_v23, %v12835_v47  ;;  %v11688_v23 = vsel %vm297_vm0, %v5236_v11, %v12792_v14  ;;  %v5128_v49 = vrot.slane %v5115_v15, 4  ;;  %6695 = vrot.lane.b32.xlu1 %v6694_v33, %s6906_s25  ;;  %v4890_v58 = vrot.slane %v4873_v39, 4 }
 0x617   : > { %v4163_v24 = vsel %vm297_vm0, %v12838_v35, %v12836_v59  ;;  %v6739_v9 = vpack.i.bf16 %v11688_v23, %v11675_v63  ;;  %v4757_v55 = vperm.slane %v4749_v19, %v12536_v30  ;;  %v4773_v6 = vsel %vm297_vm0, %v12781_v5, %v4772_v37  ;;  %5603 = vrot.lane.b32.xlu2 %v11555_v28, %s6904_s29  ;;  %v12842_v59 = vld [vmem:[#allocation90_spill] sm:$0xff]  ;;  %v12848_v63 = vld [vmem:[#allocation84_spill] sm:$0xff] }
 0x618   : > { %v4595_v14 = vsel %vm297_vm0, %v11639_v3, %v4594_v41  ;;  %v11703_v15 = vsel %vm297_vm0, %v4496_v61, %v4459_v2  ;;  %v11706_v44 = vsel %vm297_vm0, %v5128_v49, %v5091_v36  ;;  %v5556_v1 = vrot.slane %v11527_v4, 4  ;;  %v12840_v41 = vld [vmem:[#allocation56_spill] sm:$0xff] }
 0x619   : > { %v6668_v5 = vunpack.i.h.bf16 %v6666_v17  ;;  %v6667_v39 = vunpack.i.l.bf16 %v6666_v17  ;;  %v6769_v28 = vpack.i.bf16 %v11703_v15, %v11706_v44  ;;  %v4781_v33 = vperm.slane %v4773_v6, %v12536_v30 }
 0x61a   : > { %5611 = vrot.lane.b32.xlu0 %v11551_v32, %s6903_s17  ;;  %v12841_v11 = vrot.slane %v12840_v41, 4  ;;  %v11720_v36 = vsel %vm297_vm0, %v11516_v20, %v5556_v1  ;;  %v4796_v4 = vrot.slane %v4757_v55, 4  ;;  %v11724_v32 = vsel %vm297_vm0, %v4890_v58, %v11573_v46  ;;  %v12847_v41 = vld [vmem:[#allocation24_spill] sm:$0xff] }
 0x61b   : > { %v4342_v19 = vsel %vm665_vm4, %v4163_v24, %v6667_v39  ;;  %v4567_v37 = vperm.slane %v4559_v18, %v12536_v30  ;;  %v4591_v40 = vperm.slane %v12842_v59, %v12536_v30  ;;  %v4794_v61 = vrot.slane %v4781_v33, 4  ;;  %v12845_v39 = vld [vmem:[#allocation89_spill] sm:$0xff] }
 0x61c   : > { %v4271_v2 = vsel %vm297_vm0, %v12841_v11, %v12839_v38  ;;  %v11732_v35 = vsel %vm297_vm0, %v4781_v33, %v4796_v4  ;;  %v4782_v20 = vrot.slane %v11607_v22, 4  ;;  %v6699_v49 = vpack.i.bf16 %v11625_v12, %v4595_v14  ;;  %v11746_v17 = vpop.permute.xlu2 %6590  ;;  %v12844_v12 = vld [vmem:[#allocation91_spill] sm:$0xff] }
 0x61d   : > { %v4349_v47 = vsel %vm665_vm4, %v4271_v2, %v6668_v5  ;;  %v4606_v6 = vrot.slane %v4567_v37, 4  ;;  %v11737_v46 = vsel %vm297_vm0, %v4794_v61, %v4757_v55  ;;  %v5404_v18 = vrot.slane %v11469_v31, 4 }
 0x61e   : > { %v11741_v24 = vsel %vm297_vm0, %v4782_v20, %v12825_v60  ;;  %6700 = vrot.lane.b32.xlu1 %v6699_v49, %s6906_s25  ;;  %v12843_v22 = vpack.i.bf16 %v11595_v42, %v11604_v16  ;;  %v4598_v55 = vrot.slane %v12844_v12, 4  ;;  %v4494_v60 = vrot.slane %v11577_v50, 4  ;;  %v12846_v16 = vld [vmem:[#allocation14_spill] sm:$0xff] }
 0x61f   : > { %v4607_v58 = vsel %vm297_vm0, %v4591_v40, %v4606_v6  ;;  %v5126_v1 = vrot.slane %v11586_v27, 4  ;;  %v5428_v31 = vrot.slane %v11410_v54, 4  ;;  %v4602_v5 = vrot.slane %v11416_v13, 4 }
 0x620   : > { %6745 = vrot.lane.b32.xlu2 %v12843_v22, %s6904_s29  ;;  %v6774_v14 = vpack.i.bf16 %v11732_v35, %v4607_v58  ;;  %v4599_v33 = vsel %vm297_vm0, %v12845_v39, %v4598_v55  ;;  %v4788_v42 = vrot.slane %v12846_v16, 4  ;;  %v4495_v38 = vsel %vm297_vm0, %v11506_v53, %v4494_v60  ;;  %v6586_v53 = vpop.permute.xlu1 %6585 }
 0x621   : > { %v5127_v50 = vsel %vm297_vm0, %v11532_v8, %v5126_v1  ;;  %v4603_v27 = vsel %vm297_vm0, %v11345_v34, %v4602_v5  ;;  %v5429_v13 = vsel %vm297_vm0, %v11329_v52, %v5428_v31  ;;  %v11779_v34 = vpop.permute.xlu0 %6675  ;;  %v4604_v61 = vrot.slane %v4591_v40, 4  ;;  %v12850_v5 = vld [vmem:[#allocation85_spill] sm:$0xff] }
 0x622   : > { %5579 = vrot.lane.b32.xlu0 %v11582_v56, %s6900_s13  ;;  %v6759_v54 = vpack.i.bf16 %v4495_v38, %v5127_v50  ;;  %v5405_v56 = vsel %vm297_vm0, %v11317_v0, %v5404_v18  ;;  %v4789_v11 = vsel %vm297_vm0, %v12847_v41, %v4788_v42  ;;  %v6749_v59 = vpack.i.bf16 %v11647_v21, %v4603_v27  ;;  %v12852_v27 = vld [vmem:[#allocation97_spill] sm:$0xff] }
 0x623   : > { %v5413_v2 = vperm.slane %v5405_v56, %v12536_v30  ;;  %v6719_v4 = vpack.i.bf16 %v4789_v11, %v4599_v33  ;;  %v5437_v8 = vperm.slane %v5429_v13, %v12536_v30  ;;  %v6587_v20 = vunpack.i.l.bf16 %v6586_v53  ;;  %v12853_v56 = vld [vmem:[#allocation88_spill] sm:$0xff] }
 0x624   : > { %v4605_v30 = vsel %vm297_vm0, %v4604_v61, %v4567_v37  ;;  %v6588_v21 = vunpack.i.h.bf16 %v6586_v53  ;;  %v5560_v58 = vrot.slane %v11523_v48, 4  ;;  %v5546_v23 = vrot.slane %v12848_v63, 4 }
 0x625   : > { %v5452_v35 = vrot.slane %v5413_v2, 4  ;;  %v6764_v49 = vpack.i.bf16 %v11737_v46, %v4605_v30  ;;  %v4343_v6 = vsel %vm667_vm5, %v4342_v19, %v6587_v20  ;;  %v5450_v40 = vrot.slane %v5437_v8, 4 }
 0x626   : > { %6720 = vrot.lane.b32.xlu1 %v6719_v4, %s6902_s16  ;;  %v11782_v0 = vpop.permute.xlu2 %6595  ;;  %v4350_v18 = vsel %vm667_vm5, %v4349_v47, %v6588_v21  ;;  %v5561_v57 = vsel %vm297_vm0, %v11512_v51, %v5560_v58  ;;  %v12849_v51 = vld [vmem:[#allocation83_spill] sm:$0xff]  ;;  %v6617_v15 = vunpack.i.l.bf16 %v11379_v62  ;;  %v5116_v39 = vrot.slane %v12850_v5, 4 }
 0x627   : > { %v5453_v52 = vsel %vm297_vm0, %v5437_v8, %v5452_v35 }
 0x628   : > { %6750 = vrot.lane.b32.xlu2 %v6749_v59, %s6900_s13  ;;  %v5117_v13 = vsel %vm297_vm0, %v5116_v39, %v12853_v56 }
 0x62a   : > { %6780 = vrot.lane.b32.xlu0 %v6779_v29, %s6901_s15 }
 0x62e   : > { %6740 = vrot.lane.b32.xlu1 %v6739_v9, %s6903_s17  ;;  %v11802_v45 = vpop.permute.xlu0 %6690  ;;  %v5451_v9 = vsel %vm297_vm0, %v5450_v40, %v5413_v2 }
 0x62f   : > { %v6611_v29 = vpop.permute.xlu2 %6610 }
 0x630   : > { %5575 = vrot.lane.b32.xlu2 %v11671_v43, %s6904_s29  ;;  %v6613_v37 = vunpack.i.h.bf16 %v6611_v29  ;;  %v6612_v19 = vunpack.i.l.bf16 %v6611_v29  ;;  %v5547_v43 = vsel %vm297_vm0, %v5546_v23, %v12849_v51  ;;  %v6583_v51 = vunpack.i.h.bf16 %v11696_v25  ;;  %s5912_s29 = sshll.u32 %s6965_s22, 3 }
 0x631   : > { %s5806_s26 = scalar_lea.hbm %s12180_s5, %s5912_s29 }
 0x632   : > { %v3390_v48 = vsel %vm669_vm6, %v11663_v26, %v6612_v19  ;;  %v3397_v47 = vsel %vm669_vm6, %v11679_v10, %v6613_v37  ;;  %v5596_v10 = vpop.permute.xlu1 %5595  ;;  %v12854_v19 = vld [vmem:[#allocation52_spill] sm:$0xff]  ;;  %s5810_s22 = sshll.u32 %s5806_s26, 4  ;;  %s5811_s22 = int_to_ptr.hbm [resolvable:$true] %s5810_s22 }
 0x633   : > { %v3530_v40 = vrot.slane %v12854_v19, 4  ;;  %s6846_s10 = sshra.s32 %s5811_s22, 4  ;;  %s6847_s10 = int_to_ptr.hbm [resolvable:$true] %s6846_s10 }
 0x634   : > { %s6848_s12 = scalar_lea.hbm %s6847_s10, 8  ;;  %p6853_p0 = scmp.lt.s32.totalorder %s6847_s10, %s12180_s5 }
 0x635   : > { %p6849_p6 = scmp.ne.s32.totalorder %s6847_s10, %s6848_s12 }
 0x636   : > { %5607 = vrot.lane.b32.xlu1 %v11720_v36, %s6900_s13  ;;  %v6618_v36 = vunpack.i.h.bf16 %v11379_v62 }
 0x637   : > { %v5592_v46 = vpop.permute.xlu0 %5591  ;;  %v11819_v22 = vpop.permute.xlu2 %6625  ;;  %p6850_p9 = pnand %p6849_p6, %p6994_p11 }
 0x638   : > { %6770 = vrot.lane.b32.xlu2 %v6769_v28, %s6903_s17  ;;  %v5625_v26 = vsel %vm665_vm4, %v5547_v43, %v5592_v46  ;;  %v3391_v28 = vsel %vm671_vm7, %v3390_v48, %v6617_v15  ;;  %v3398_v55 = vsel %vm671_vm7, %v3397_v47, %v6618_v36  ;;  %v12855_v48 = vld [vmem:[#allocation51_spill] sm:$0xff]  ;;  %v6582_v43 = vunpack.i.l.bf16 %v11696_v25  ;;  %v12858_v15 = vld [vmem:[#allocation36_spill] sm:$0xff] }
 0x639   : > { %v11822_v12 = vsel %vm667_vm5, %v5625_v26, %v5596_v10  ;;  %v3638_v47 = vrot.slane %v12855_v48, 4  ;;  %v12856_v46 = vld [vmem:[#allocation39_spill] sm:$0xff]  ;;  %v12857_v10 = vld [vmem:[#allocation38_spill] sm:$0xff]  ;;  %p6851_p13 = pneg %p6850_p9 }
 0x63a   : > { %v3531_v26 = vsel %vm297_vm0, %v3530_v40, %v12856_v46  ;;  %v6592_v40 = vunpack.i.l.bf16 %v11746_v17 }
 0x63b   : > { %v3639_v36 = vsel %vm297_vm0, %v3638_v47, %v12857_v10 }
 0x63e   : > { %6760 = vrot.lane.b32.xlu1 %v6759_v54, %s6900_s13  ;;  %s6852_s13 = scalar_lea.hbm %s12180_s5, 16 }
 0x63f   : > { %v11828_v44 = vpop.permute.xlu2 %6650  ;;  %p6854_p1 = scmp.lt.s32.totalorder %s6852_s13, %s6848_s12 }
 0x640   : > { %6775 = vrot.lane.b32.xlu2 %v6774_v14, %s6901_s15  ;;  %v12851_v14 = vld [vmem:[#allocation12_spill] sm:$0xff] }
 0x641   : > { %v4484_v33 = vrot.slane %v12851_v14, 4  ;;  %p6855_p3 = por %p6854_p1, %p6853_p0 }
 0x643   : > { %v4485_v54 = vsel %vm297_vm0, %v4484_v33, %v12852_v27  ;;  %p6856_p4 = pnand %p6855_p3, %p6851_p13 }
 0x646   : > { %6765 = vrot.lane.b32.xlu1 %v6764_v49, %s6903_s17  ;;  %v6678_v49 = vunpack.i.h.bf16 %v11779_v34 }
 0x648   : > { %5587 = vrot.lane.b32.xlu2 %v5453_v52, %s6901_s15  ;;  %v6671_v60 = vpop.permute.xlu2 %6670 }
 0x649   : > { %v6673_v1 = vunpack.i.h.bf16 %v6671_v60  ;;  %v6672_v31 = vunpack.i.l.bf16 %v6671_v60 }
 0x64b   : > { %v4344_v16 = vsel %vm669_vm6, %v4343_v6, %v6672_v31  ;;  %v4351_v62 = vsel %vm669_vm6, %v4350_v18, %v6673_v1  ;;  %v6711_v42 = vpop.permute.xlu0 %6710  ;;  %v6677_v6 = vunpack.i.l.bf16 %v11779_v34 }
 0x64c   : > { %v6713_v38 = vunpack.i.h.bf16 %v6711_v42  ;;  %v6712_v50 = vunpack.i.l.bf16 %v6711_v42  ;;  %v4352_v29 = vsel %vm671_vm7, %v4351_v62, %v6678_v49  ;;  %v6653_v42 = vunpack.i.h.bf16 %v11828_v44 }
 0x64d   : > { %v6601_v41 = vpop.permute.xlu1 %6600 }
 0x64e   : > { %5615 = vrot.lane.b32.xlu1 %v5561_v57, %s6901_s15  ;;  %v4664_v11 = vsel %vm665_vm4, %v4485_v54, %v6713_v38  ;;  %v5296_v2 = vsel %vm665_vm4, %v5117_v13, %v6712_v50  ;;  %v6603_v4 = vunpack.i.h.bf16 %v6601_v41  ;;  %v6602_v53 = vunpack.i.l.bf16 %v6601_v41 }
 0x64f   : > { %v4345_v57 = vsel %vm671_vm7, %v4344_v16, %v6677_v6  ;;  %v6652_v38 = vunpack.i.l.bf16 %v11828_v44 }
 0x650   : > { %v11846_v59 = vsel %vm667_vm5, %v4664_v11, %v6603_v4  ;;  %v11849_v8 = vsel %vm667_vm5, %v5296_v2, %v6602_v53  ;;  %v11854_v52 = vpop.permute.xlu2 %6685 }
 0x656   : > { %5583 = vrot.lane.b32.xlu1 %v5451_v9, %s6903_s17 }
 0x658   : > { %v11852_v35 = vpop.permute.xlu1 %5567  ;;  %v11856_v61 = vpop.permute.xlu0 %6715 }
 0x659   : > { %v11868_v37 = vpop.permute.xlu2 %6705 }
 0x660   : > { %v6621_v20 = vpop.permute.xlu1 %6620 }
 0x661   : > { %v6623_v30 = vunpack.i.h.bf16 %v6621_v20  ;;  %v6622_v21 = vunpack.i.l.bf16 %v6621_v20  ;;  %v11872_v23 = vpop.permute.xlu0 %5599  ;;  %v11888_v14 = vpop.permute.xlu2 %5563 }
 0x663   : > { %v11861_v18 = vsel %vm673_vm8, %v3391_v28, %v6622_v21  ;;  %v11864_v58 = vsel %vm673_vm8, %v3398_v55, %v6623_v30  ;;  %v6643_v28 = vunpack.i.h.bf16 %v12858_v15  ;;  %v6642_v55 = vunpack.i.l.bf16 %v12858_v15 }
 0x668   : > { %v6636_v63 = vpop.permute.xlu1 %6635 }
 0x669   : > { %v6638_v34 = vunpack.i.h.bf16 %v6636_v63  ;;  %v6637_v9 = vunpack.i.l.bf16 %v6636_v63  ;;  %v11892_v50 = vpop.permute.xlu0 %6730  ;;  %v6726_v11 = vpop.permute.xlu2 %6725 }
 0x66b   : > { %v3717_v60 = vsel %vm665_vm4, %v3639_v36, %v6638_v34  ;;  %v3710_v1 = vsel %vm665_vm4, %v3531_v26, %v6637_v9  ;;  %v12859_v34 = vld [vmem:[#allocation76_spill] sm:$0xff] }
 0x66c   : > { %v3718_v31 = vsel %vm667_vm5, %v3717_v60, %v6583_v51  ;;  %v3711_v5 = vsel %vm667_vm5, %v3710_v1, %v6582_v43  ;;  %v6598_v43 = vunpack.i.h.bf16 %v11782_v0 }
 0x66d   : > { %v3712_v25 = vsel %vm669_vm6, %v3711_v5, %v6642_v55  ;;  %v3719_v39 = vsel %vm669_vm6, %v3718_v31, %v6643_v28  ;;  %v6593_v28 = vunpack.i.h.bf16 %v11746_v17  ;;  %v6708_v31 = vunpack.i.h.bf16 %v11868_v37 }
 0x66e   : > { %v6717_v17 = vunpack.i.l.bf16 %v11856_v61 }
 0x670   : > { %v6646_v33 = vpop.permute.xlu1 %6645 }
 0x671   : > { %v6648_v16 = vunpack.i.h.bf16 %v6646_v33  ;;  %v6647_v62 = vunpack.i.l.bf16 %v6646_v33  ;;  %v11904_v2 = vpop.permute.xlu0 %6735  ;;  %v11912_v21 = vpop.permute.xlu2 %5603  ;;  %v6718_v33 = vunpack.i.h.bf16 %v11856_v61 }
 0x673   : > { %v3713_v27 = vsel %vm671_vm7, %v3712_v25, %v6647_v62  ;;  %v3720_v54 = vsel %vm671_vm7, %v3719_v39, %v6648_v16  ;;  %v4592_v16 = vrot.slane %v11639_v3, 4  ;;  %v12861_v62 = vld [vmem:[#allocation92_spill] sm:$0xff] }
 0x674   : > { %v11897_v56 = vsel %vm673_vm8, %v3713_v27, %v6652_v38  ;;  %v11900_v13 = vsel %vm673_vm8, %v3720_v54, %v6653_v42  ;;  %v6543_v42 = vunpack.i.h.bf16 %v12861_v62  ;;  %v12862_v27 = vld [vmem:[#allocation94_spill] sm:$0xff] }
 0x675   : > { %v6538_v54 = vunpack.i.h.bf16 %v12862_v27 }
 0x678   : > { %v11902_v41 = vpop.permute.xlu1 %6660 }
 0x679   : > { %v11914_v49 = vpop.permute.xlu0 %5571 }
 0x67a   : > { %v11920_v63 = vpop.permute.xlu2 %6745 }
 0x680   : > { %v6681_v4 = vpop.permute.xlu1 %6680 }
 0x681   : > { %v6683_v53 = vunpack.i.h.bf16 %v6681_v4  ;;  %v6682_v44 = vunpack.i.l.bf16 %v6681_v4  ;;  %v12863_v4 = vld [vmem:[#allocation19_spill] sm:$0xff] }
 0x682   : > { %v11936_v55 = vpop.permute.xlu2 %6750 }
 0x683   : > { %v11907_v20 = vsel %vm673_vm8, %v4345_v57, %v6682_v44  ;;  %v11910_v30 = vsel %vm673_vm8, %v4352_v29, %v6683_v53  ;;  %v5224_v29 = vrot.slane %v12859_v34, 4  ;;  %v6568_v53 = vunpack.i.h.bf16 %v12863_v4 }
 0x684   : > { %v6756_v9 = vpop.permute.xlu0 %6755 }
 0x688   : > { %v6696_v6 = vpop.permute.xlu1 %6695 }
 0x689   : > { %v6697_v19 = vunpack.i.l.bf16 %v6696_v6  ;;  %v6698_v46 = vunpack.i.h.bf16 %v6696_v6 }
 0x68b   : > { %v4969_v48 = vsel %vm665_vm4, %v11724_v32, %v6697_v19  ;;  %v12860_v32 = vld [vmem:[#allocation72_spill] sm:$0xff]  ;;  %v6567_v19 = vunpack.i.l.bf16 %v12863_v4 }
 0x68c   : > { %v4970_v47 = vsel %vm667_vm5, %v4969_v48, %v6592_v40  ;;  %v5225_v36 = vsel %vm297_vm0, %v5224_v29, %v12860_v32  ;;  %v11943_v5 = vpop.permute.xlu0 %5611  ;;  %v12864_v40 = vld [vmem:[#allocation44_spill] sm:$0xff]  ;;  %v6728_v48 = vunpack.i.h.bf16 %v6726_v11  ;;  %v6758_v32 = vunpack.i.h.bf16 %v6756_v9 }
 0x68d   : > { %v5303_v15 = vsel %vm665_vm4, %v5225_v36, %v6698_v46  ;;  %v6573_v61 = vunpack.i.h.bf16 %v12864_v40  ;;  %v6572_v29 = vunpack.i.l.bf16 %v12864_v40  ;;  %v6757_v36 = vunpack.i.l.bf16 %v6756_v9 }
 0x68e   : > { %v5304_v1 = vsel %vm667_vm5, %v5303_v15, %v6593_v28  ;;  %v11961_v15 = vpop.permute.xlu2 %5575 }
 0x68f   : > { %v5305_v25 = vsel %vm669_vm6, %v5304_v1, %v6708_v31 }
 0x690   : > { %v11922_v57 = vpop.permute.xlu1 %6700  ;;  %v5306_v6 = vsel %vm671_vm7, %v5305_v25, %v6718_v33  ;;  %v6733_v33 = vunpack.i.h.bf16 %v11892_v50 }
 0x691   : > { %v6703_v51 = vunpack.i.h.bf16 %v11922_v57  ;;  %v5307_v1 = vsel %vm673_vm8, %v5306_v6, %v6728_v48  ;;  %v6597_v6 = vunpack.i.l.bf16 %v11782_v0 }
 0x693   : > { %v4962_v26 = vsel %vm665_vm4, %v11741_v24, %v6703_v51  ;;  %v6707_v24 = vunpack.i.l.bf16 %v11868_v37  ;;  %v12865_v51 = vld [vmem:[#allocation22_spill] sm:$0xff] }
 0x694   : > { %v11930_v10 = vsel %vm667_vm5, %v4962_v26, %v6598_v43  ;;  %v6633_v43 = vunpack.i.h.bf16 %v12865_v51  ;;  %v11977_v48 = vpop.permute.xlu0 %5579 }
 0x695   : > { %v4971_v39 = vsel %vm669_vm6, %v4970_v47, %v6707_v24  ;;  %v6727_v47 = vunpack.i.l.bf16 %v6726_v11  ;;  %v12866_v24 = vld [vmem:[#allocation40_spill] sm:$0xff] }
 0x696   : > { %v4972_v44 = vsel %vm671_vm7, %v4971_v39, %v6717_v17  ;;  %v6658_v25 = vunpack.i.h.bf16 %v12866_v24  ;;  %v6732_v17 = vunpack.i.l.bf16 %v11892_v50  ;;  %v6663_v50 = vunpack.i.h.bf16 %v11902_v41 }
 0x697   : > { %v4973_v28 = vsel %vm673_vm8, %v4972_v44, %v6727_v47  ;;  %v6657_v44 = vunpack.i.l.bf16 %v12866_v24  ;;  %v6687_v24 = vunpack.i.l.bf16 %v11854_v52 }
 0x698   : > { %v11938_v60 = vpop.permute.xlu1 %6720 }
 0x6a0   : > { %v6741_v34 = vpop.permute.xlu1 %6740 }
 0x6a1   : > { %v6743_v46 = vunpack.i.h.bf16 %v6741_v34  ;;  %v6742_v26 = vunpack.i.l.bf16 %v6741_v34 }
 0x6a3   : > { %v4974_v11 = vsel %vm675_vm9, %v4973_v28, %v6742_v26  ;;  %v5308_v39 = vsel %vm675_vm9, %v5307_v1, %v6743_v46  ;;  %v6693_v46 = vunpack.i.h.bf16 %v11802_v45  ;;  %v6692_v28 = vunpack.i.l.bf16 %v11802_v45 }
 0x6a4   : > { %v11972_v9 = vsel %vm677_vm10, %v4974_v11, %v6757_v36  ;;  %v5309_v34 = vsel %vm677_vm10, %v5308_v39, %v6758_v32  ;;  %v6628_v36 = vunpack.i.h.bf16 %v11819_v22  ;;  %v6627_v32 = vunpack.i.l.bf16 %v11819_v22 }
 0x6a5   : > { %v12349_v47 = vrot.slane %v11972_v9, 4  ;;  %v5665_v26 = vrot.slane %v5309_v34, 6  ;;  %v6688_v1 = vunpack.i.h.bf16 %v11854_v52  ;;  %v4666_v11 = vsel %vm669_vm6, %v11846_v59, %v6733_v33 }
 0x6a6   : > { %v5298_v45 = vsel %vm669_vm6, %v11849_v8, %v6732_v17  ;;  %v6748_v39 = vunpack.i.h.bf16 %v11920_v63  ;;  %v6747_v22 = vunpack.i.l.bf16 %v11920_v63  ;;  %v6702_v59 = vunpack.i.l.bf16 %v11922_v57 }
 0x6a7   : > { %v11989_v0 = vsel %vm5673_vm3, %v12349_v47, %v5665_v26  ;;  %v4354_v38 = vsel %vm675_vm9, %v11910_v30, %v6688_v1  ;;  %v3722_v26 = vsel %vm675_vm9, %v11900_v13, %v6658_v25  ;;  %v12867_v47 = vld [vmem:[#allocation42_spill] sm:$0xff]  ;;  %v6738_v63 = vunpack.i.h.bf16 %v11904_v2  ;;  %v6771_v25 = vpop.permute.xlu2 %6770 }
 0x6a8   : > { %v11997_v34 = vpop.permute.xlu1 %5607  ;;  %v4020_v52 = vsel %vm675_vm9, %v12867_v47, %v6568_v53  ;;  %v12008_v33 = vsel %vm677_vm10, %v4354_v38, %v6693_v46  ;;  %v3723_v8 = vsel %vm677_vm10, %v3722_v26, %v6663_v50  ;;  %v3400_v30 = vsel %vm675_vm9, %v11864_v58, %v6628_v36  ;;  %v12868_v58 = vld [vmem:[#allocation59_spill] sm:$0xff]  ;;  %v12869_v26 = vld [vmem:[#allocation41_spill] sm:$0xff] }
 0x6a9   : > { %v4021_v17 = vsel %vm677_vm10, %v4020_v52, %v6573_v61  ;;  %v5641_v37 = vrot.slane %v3723_v8, 4  ;;  %v6737_v13 = vunpack.i.l.bf16 %v11904_v2  ;;  %v4593_v57 = vsel %vm297_vm0, %v4592_v16, %v11570_v7 }
 0x6aa   : > { %v5647_v31 = vrot.slane %v4021_v17, 6  ;;  %v3401_v38 = vsel %vm677_vm10, %v3400_v30, %v6633_v43  ;;  %v6662_v53 = vunpack.i.l.bf16 %v11902_v41  ;;  %v3066_v2 = vsel %vm675_vm9, %v12868_v58, %v6538_v54  ;;  %v6781_v41 = vpop.permute.xlu0 %6780 }
 0x6ab   : > { %v5635_v47 = vrot.slane %v3401_v38, 2  ;;  %v4667_v46 = vsel %vm671_vm7, %v4666_v11, %v6748_v39  ;;  %v5299_v3 = vsel %vm671_vm7, %v5298_v45, %v6747_v22  ;;  %v4671_v7 = vsel %vm665_vm4, %v4593_v57, %v6702_v59 }
 0x6ac   : > { %v12023_v61 = vsel %vm5673_vm3, %v5641_v37, %v5647_v31  ;;  %v3067_v16 = vsel %vm677_vm10, %v3066_v2, %v6543_v42  ;;  %v6722_v43 = vunpack.i.l.bf16 %v11938_v60  ;;  %v4347_v54 = vsel %vm675_vm9, %v11907_v20, %v6687_v24 }
 0x6ad   : > { %v12037_v31 = vsel %vm2350_vm11, %v5635_v47, %v5641_v37  ;;  %v12040_v50 = vsel %vm5668_vm15, %v3067_v16, %v5635_v47  ;;  %v6753_v36 = vunpack.i.h.bf16 %v11936_v55  ;;  %v6773_v1 = vunpack.i.h.bf16 %v6771_v25 }
 0x6ae   : > { %v6723_v11 = vunpack.i.h.bf16 %v11938_v60  ;;  %v4348_v42 = vsel %vm677_vm10, %v4347_v54, %v6692_v28  ;;  %v3715_v37 = vsel %vm675_vm9, %v11897_v56, %v6657_v44  ;;  %v4013_v52 = vsel %vm675_vm9, %v12869_v26, %v6567_v19  ;;  %v12874_v26 = vld [vmem:[#allocation21_spill] sm:$0xff] }
 0x6af   : > { %v6783_v59 = vunpack.i.h.bf16 %v6781_v41  ;;  %v4672_v20 = vsel %vm667_vm5, %v4671_v7, %v6597_v6  ;;  %v3716_v24 = vsel %vm677_vm10, %v3715_v37, %v6662_v53  ;;  %v4014_v60 = vsel %vm677_vm10, %v4013_v52, %v6572_v29 }
 0x6b0   : > { %v6761_v45 = vpop.permute.xlu1 %6760  ;;  %v4673_v28 = vsel %vm669_vm6, %v4672_v20, %v6722_v43  ;;  %v5640_v17 = vrot.slane %v3716_v24, 4  ;;  %v5646_v56 = vrot.slane %v4014_v60, 6  ;;  %v4964_v4 = vsel %vm669_vm6, %v11930_v10, %v6723_v11  ;;  %v6776_v10 = vpop.permute.xlu2 %6775 }
 0x6b1   : > { %v6763_v39 = vunpack.i.h.bf16 %v6761_v45  ;;  %v6762_v22 = vunpack.i.l.bf16 %v6761_v45  ;;  %v3393_v6 = vsel %vm675_vm9, %v11861_v18, %v6627_v32  ;;  %v6772_v30 = vunpack.i.l.bf16 %v6771_v25 }
 0x6b2   : > { %v12068_v29 = vsel %vm5673_vm3, %v5640_v17, %v5646_v56  ;;  %v12870_v57 = vunpack.i.l.bf16 %v12865_v51  ;;  %v6752_v53 = vunpack.i.l.bf16 %v11936_v55  ;;  %v12871_v2 = vunpack.i.l.bf16 %v12862_v27 }
 0x6b3   : > { %v4668_v8 = vsel %vm673_vm8, %v4667_v46, %v6763_v39  ;;  %v5300_v19 = vsel %vm673_vm8, %v5299_v3, %v6762_v22  ;;  %v12872_v46 = vld [vmem:[#allocation58_spill] sm:$0xff]  ;;  %v4674_v32 = vsel %vm671_vm7, %v4673_v28, %v6737_v13  ;;  %v4965_v25 = vsel %vm671_vm7, %v4964_v4, %v6738_v63  ;;  %v5683_v13 = vld [vmem:[%s12179_s4] sm:$0xf] }
 0x6b4   : > { %v4669_v44 = vsel %vm675_vm9, %v4668_v8, %v6773_v1  ;;  %v3394_v38 = vsel %vm677_vm10, %v3393_v6, %v12870_v57  ;;  %v3059_v18 = vsel %vm675_vm9, %v12872_v46, %v12871_v2  ;;  %v5301_v3 = vsel %vm675_vm9, %v5300_v19, %v6772_v30  ;;  %5686 = vperm.xlu0 %6784, %v5683_v13  }
 0x6b5   : > { %v4670_v40 = vsel %vm677_vm10, %v4669_v44, %v6783_v59  ;;  %v5634_v58 = vrot.slane %v3394_v38, 2  ;;  %v12873_v51 = vunpack.i.l.bf16 %v12861_v62  ;;  %v6782_v16 = vunpack.i.l.bf16 %v6781_v41  ;;  %v12876_v44 = vld [vmem:[#allocation25_spill] sm:$0xff] }
 0x6b6   : > { %v5652_v47 = vrot.slane %v4670_v40, 2  ;;  %v6778_v1 = vunpack.i.h.bf16 %v6776_v10  ;;  %v6777_v45 = vunpack.i.l.bf16 %v6776_v10  ;;  %v4675_v62 = vsel %vm673_vm8, %v4674_v32, %v6752_v53 }
 0x6b7   : > { %v3060_v7 = vsel %vm677_vm10, %v3059_v18, %v12873_v51  ;;  %v5671_v54 = vsel %vm2350_vm11, %v5634_v58, %v5640_v17  ;;  %v4966_v41 = vsel %vm673_vm8, %v4965_v25, %v6753_v36  ;;  %v5302_v39 = vsel %vm677_vm10, %v5301_v3, %v6782_v16 }
 0x6b8   : > { %v6766_v55 = vpop.permute.xlu1 %6765  ;;  %v5676_v43 = vsel %vm5668_vm15, %v4348_v42, %v5652_v47  ;;  %v5669_v27 = vsel %vm5668_vm15, %v3060_v7, %v5634_v58  ;;  %v5627_v42 = vsel %vm669_vm6, %v11822_v12, %v11872_v23  ;;  %v5438_v52 = vrot.slane %v12874_v26, 4  ;;  %v5782_v26 = vld.sshfl [vmem:[#allocation1] sm:$0xff pattern:$0x75316420] }
 0x6b9   : > { %v6768_v63 = vunpack.i.h.bf16 %v6766_v55  ;;  %v6767_v11 = vunpack.i.l.bf16 %v6766_v55  ;;  %v5628_v59 = vsel %vm671_vm7, %v5627_v42, %v11912_v21  ;;  %v5664_v8 = vrot.slane %v5302_v39, 6 }
 0x6ba   : > { %v5629_v36 = vsel %vm673_vm8, %v5628_v59, %v11997_v34  ;;  %v12875_v12 = vrot.slane %v11972_v9, 4  ;;  %v5439_v34 = vsel %vm297_vm0, %v5438_v52, %v12876_v44  ;;  %vm5689_vm0 = vcmask 441344  }
 0x6bb   : > { %v4676_v22 = vsel %vm675_vm9, %v4675_v62, %v6767_v11  ;;  %v4967_v37 = vsel %vm675_vm9, %v4966_v41, %v6768_v63  ;;  %v5630_v19 = vsel %vm675_vm9, %v5629_v36, %v11943_v5  ;;  %v5618_v9 = vsel %vm665_vm4, %v5439_v34, %v11888_v14  ;;  %v5588_v14 = vpop.permute.xlu2 %5587  ;;  %v5783_v62 = vld.sshfl [vmem:[#allocation1 + $0x8] sm:$0xff pattern:$0x75316420] }
 0x6bc   : > { %v4677_v20 = vsel %vm677_vm10, %v4676_v22, %v6777_v45  ;;  %v4968_v24 = vsel %vm677_vm10, %v4967_v37, %v6778_v1 }
 0x6bd   : > { %v5653_v60 = vrot.slane %v4677_v20, 2  ;;  %v5658_v28 = vrot.slane %v4968_v24, 4 }
 0x6bf   : > { %v5679_v23 = vsel %vm2350_vm11, %v5653_v60, %v12875_v12  ;;  %v5677_v17 = vsel %vm5668_vm15, %v12008_v33, %v5653_v60  ;;  %v5680_v56 = vsel %vm5673_vm3, %v5658_v28, %v5664_v8  ;;  %v5678_v21 = vsel %vm2350_vm11, %v5652_v47, %v5658_v28 }
 0x6c0   : > { %v5616_v4 = vpop.permute.xlu1 %5615  ;;  %v5619_v33 = vsel %vm667_vm5, %v5618_v9, %v11852_v35  ;;  %v5682_v35 = vld [vmem:[%s12178_s3] sm:$0xf] }
 0x6c1   : > { %v5631_v6 = vsel %vm677_vm10, %v5630_v19, %v5616_v4  ;;  %v5620_v30 = vsel %vm669_vm6, %v5619_v33, %v11914_v49 }
 0x6c2   : > { %5902 = vmatpush.msk.msra.mxu3 %vm5668_vm15, %v5631_v6  ;;  %v5621_v5 = vsel %vm671_vm7, %v5620_v30, %v11961_v15 }
 0x6c3   : > { %v5622_v40 = vsel %vm673_vm8, %v5621_v5, %v11977_v48 }
 0x6c4   : > { %5729 = vmatpush.msra.mxu3 %v11989_v0 }
 0x6c6   : > { %5730 = vmatpush.msra.mxu3 %v5679_v23 }
 0x6c8   : > { %v5584_v57 = vpop.permute.xlu1 %5583  ;;  %5731 = vmatpush.msra.mxu3 %v5677_v17 }
 0x6c9   : > { %v5623_v38 = vsel %vm675_vm9, %v5622_v40, %v5584_v57 }
 0x6ca   : > { %5732 = vmatpush.msra.mxu3 %v12023_v61  ;;  %v5624_v0 = vsel %vm677_vm10, %v5623_v38, %v5588_v14 }
 0x6cb   : > { %5900 = vmatpush.msk.msra.mxu2 %vm5668_vm15, %v5624_v0 }
 0x6cc   : > { %5733 = vmatpush.msra.mxu3 %v12037_v31 }
 0x6cd   : > { %5709 = vmatpush.msra.mxu2 %v5680_v56 }
 0x6ce   : > { %5734 = vmatpush.msra.mxu3 %v12040_v50 }
 0x6cf   : > { %5710 = vmatpush.msra.mxu2 %v5678_v21  ;;  %5903 = vmatmul.msk.f32.vlgmr.msra.gmra.mxu3 %vm5689_vm0, %v5682_v35 }
 0x6d1   : > { %5711 = vmatpush.msra.mxu2 %v5676_v43 }
 0x6d3   : > { %5712 = vmatpush.msra.mxu2 %v12068_v29 }
 0x6d5   : > { %5713 = vmatpush.msra.mxu2 %v5671_v54 }
 0x6d7   : > { %5714 = vmatpush.msra.mxu2 %v5669_v27 }
 0x6d8   : > { %5901 = vmatmul.msk.f32.vlgmr.msra.gmra.mxu2 %vm5689_vm0, %v5682_v35 }
 0x726   : > { %v5687_v49 = vpop.permute.xlu0 %5686 }
 0x752   : > { %v5736_v15 = vpop.f32.mrf.mxu3 }
 0x753   : > { %v5737_v48 = vadd.f32 %v5736_v15, %v5687_v49 }
 0x755   : > { %v5905_v61 = vmul.f32 -1.442695, %v5737_v48 }
 0x757   : > { %6793 = vpow2.f32 %v5905_v61 }
 0x75b   : > { %v5716_v31 = vpop.f32.mrf.mxu2 }
 0x75c   : > { %v5717_v53 = vadd.f32 %v5716_v31, %v5687_v49 }
 0x75d   : > { %v6794_v10 = vpop.eup %6793 }
 0x75e   : > { %v5746_v47 = vadd.f32 1.0, %v6794_v10  ;;  %v5904_v58 = vmul.f32 -1.442695, %v5717_v53 }
 0x760   : > { %6795 = vrcp.f32 %v5746_v47  ;;  %vm5767_vm4 = vweird.f32 %v5746_v47  ;;  %v5773_v25 = vand.u32 2147483648, %v5746_v47  ;;  %v5771_v51 = vand.u32 2147483647, %v5746_v47 }
 0x761   : > { %6797 = vpow2.f32 %v5904_v58 }
 0x762   : > { %v5774_v55 = vor.u32 1.1754944e-38, %v5773_v25  ;;  %vm5772_vm7 = vcmp.eq.f32.partialorder %v5771_v51, 8.507059e+37 }
 0x766   : > { %v6796_v50 = vpop.eup %6795 }
 0x767   : > { %v6798_v2 = vpop.eup %6797  ;;  %v5763_v46 = vmul.f32 %v6796_v50, %v5746_v47  ;;  %vm5768_vm5 = vweird.f32 %v6796_v50 }
 0x768   : > { %v5745_v18 = vadd.f32 1.0, %v6798_v2  ;;  %vm5769_vm6 = vmor %vm5767_vm4, %vm5768_vm5 }
 0x769   : > { %v5764_v29 = vsub.f32 1.0, %v5763_v46 }
 0x76a   : > { %6799 = vrcp.f32 %v5745_v18  ;;  %v5758_v13 = vand.u32 2147483648, %v5745_v18  ;;  %v5756_v11 = vand.u32 2147483647, %v5745_v18  ;;  %vm5752_vm9 = vweird.f32 %v5745_v18 }
 0x76b   : > { %v5765_v32 = vmul.f32 %v6796_v50, %v5764_v29 }
 0x76c   : > { %v5759_v41 = vor.u32 1.1754944e-38, %v5758_v13  ;;  %vm5757_vm1 = vcmp.eq.f32.partialorder %v5756_v11, 8.507059e+37 }
 0x76d   : > { %v5766_v3 = vadd.f32 %v6796_v50, %v5765_v32 }
 0x76f   : > { %v5770_v7 = vsel %vm5769_vm6, %v6796_v50, %v5766_v3 }
 0x770   : > { %v6800_v16 = vpop.eup %6799  ;;  %v5775_v54 = vsel %vm5772_vm7, %v5774_v55, %v5770_v7 }
 0x771   : > { %v5748_v43 = vmul.f32 %v6800_v16, %v5745_v18  ;;  %v5778_v1 = vmul.f32 %v5775_v54, %v5737_v48  ;;  %vm5753_vm8 = vweird.f32 %v6800_v16 }
 0x772   : > { %vm5754_vm10 = vmor %vm5752_vm9, %vm5753_vm8 }
 0x773   : > { %v5749_v27 = vsub.f32 1.0, %v5748_v43  ;;  %v5787_v39 = vadd.f32 %v5783_v62, %v5778_v1 }
 0x775   : > { %v5750_v63 = vmul.f32 %v6800_v16, %v5749_v27  ;;  %v5790_v52 = vrot.slane %v5787_v39, 4 }
 0x777   : > { %v5751_v45 = vadd.f32 %v6800_v16, %v5750_v63 }
 0x779   : > { %v5755_v42 = vsel %vm5754_vm10, %v6800_v16, %v5751_v45 }
 0x77a   : > { %v5760_v22 = vsel %vm5757_vm1, %v5759_v41, %v5755_v42 }
 0x77b   : > { %v5777_v37 = vmul.f32 %v5760_v22, %v5717_v53 }
 0x77d   : > { %v5786_v59 = vadd.f32 %v5782_v26, %v5777_v37 }
 0x77f   : > { %v5791_v20 = vsel %vm2350_vm11, %v5786_v59, %v5790_v52 }
 0x780   : > { %5793 = vst [vmem:[%s242_s8] sm:$0xff] %v5791_v20 }
 0x781   : > { %6859 = shalt.err (!%p6856_p4)
}
 0x782   : > { %5915 = dma.vmem_to_hbm [thread:$0]  (%p6994_p11), %s5809_s28, 128, %s5811_s22, %s5795_s9  }
 0x783 PF: > { %s5822_s7 = sand.u32 1, %s6886_s18   ;;  %p12877_p7 = scmp.ge.s32.totalorder %s6898_s21, 2 }
 0x784   : > { %s5823_s17 = scalar_lea.sflag [#allocation6], %s5822_s7 }
 0x785   : > { %p5922_p5 = pnand %p12877_p7, %p6998_p12 }
 0x787   : > { %p5923_p8 = pneg %p5922_p5 }
 0x789   : > { %6881 = dma.done.wait (%p5923_p8), %s5823_s17, 128  }
 0x78a   : > { %6883 = vsyncadd (%p5923_p8), %s5823_s17, 4294967168  ;;  %p18_p10 = scmp.ge.s32.totalorder %s6969_s24, 4   ;;  %s12878_s18 = smov %s6890_s19 }
 0x78b   : > { %s12879_s19 = smov %s6894_s20  ;;  %s12880_s20 = smov %s6981_s27 }
 0x78c   : > { %s12881_s21 = smov %s6969_s24  ;;  %20 = sbr.rel (!%p18_p10) target bundleno = 5 (0x5), region = 92 }
 0x791   :  { %5829 = vsyncpa [#allocation5], 1 }
 0x792   :  { %5831 = vsyncpa [#allocation5 + $0x1], 1 }
 0x793   :  { %5832 = vsyncpa [#allocation6], 1 }
 0x794   :  { %5834 = vsyncpa [#allocation6 + $0x1], 1 }

</bundles_post_ra>
